<compile_context>
chip_gen: v6e
topology: v6e:2x2x1
jax: 0.10.0
libtpu: 0.0.40
codegen_flags: <defaults>
</compile_context>

<pallas_src>
import math
from functools import partial

import numpy as np
import jax
import jax.numpy as jnp
from jax.experimental import pallas as pl
from jax.experimental.pallas import tpu as pltpu

# ----------------------------- config (small synthetic) ----------------------------
B = 2            # batch
N_PTS = 16       # joints (n_pts)
COORD_IN = 3     # coords_dim[0]
COORD_OUT = 3    # coords_dim[1]
HID = 32         # hid_dim
N_HEAD = 4       # n_head
L_LAYERS = 2     # num_layer
EMD = HID * 4    # emd_dim
K_CHEB = 3       # ChebConv(K=2) -> K+1 = 3 polynomial terms (T0=I, T1=L, T2=2L^2-I)
OUT_PAD = 128    # lane-dense padded output channel count (sliced back to COORD_OUT in JAX)

MXU_DTYPE = jnp.bfloat16   # matmul-operand dtype (f32 accumulate). Set to jnp.float32 for exact.

# ----------------------------- packed-slab row offsets -------------------------------
# (shared between pack_params and the kernel; all slicing uses static offsets)
# global slab: (GLOB_ROWS, OUT_PAD)
TV0 = 0                                   # Chebyshev basis [T0; T1; T2]   (K*N rows, N cols)
LGN0 = TV0 + K_CHEB * N_PTS               # GraphNet Laplacian             (N rows, N cols)
GCIN_W0 = LGN0 + N_PTS                    # gconv_input W stacked          (K*Cin rows, HID cols)
GCIN_B = GCIN_W0 + K_CHEB * COORD_IN      # gconv_input b                  (1 row, HID cols)
GCOUT_W0 = GCIN_B + 1                     # gconv_output W stacked, padded (K*HID rows, OUT_PAD)
GCOUT_B = GCOUT_W0 + K_CHEB * HID         # gconv_output b
GLOB_ROWS = GCOUT_B + 1

# per-layer slab A: (L, LA_ROWS, 3*HID)
LA_QKV0 = 0                               # fused [Wq | Wk | Wv]           (HID rows, 3*HID cols)
LA_F1W0 = HID                             # GraphNet fc1 W                 (HID rows, 2*HID cols)
VR0 = 2 * HID                             # bias / LayerNorm vector rows
VR_LN1A, VR_LN1B, VR_BQKV, VR_BO = VR0, VR0 + 1, VR0 + 2, VR0 + 3
VR_LN2A, VR_LN2B, VR_F1B, VR_F2B = VR0 + 4, VR0 + 5, VR0 + 6, VR0 + 7
VR_B1, VR_B2 = VR0 + 8, VR0 + 9
LA_ROWS = VR0 + 10
LA_COLS = 3 * HID

# per-layer slab B: (L, LB_ROWS, HID)
LB_WO0 = 0                                # attention output projection    (HID rows)
LB_F2W0 = HID                             # GraphNet fc2 W                 (2*HID rows)
LB_W1 = 3 * HID                           # ResCheb g1 W stacked           (K*HID rows)
LB_W2 = LB_W1 + K_CHEB * HID              # ResCheb g2 W stacked           (K*HID rows)
LB_ROWS = LB_W2 + K_CHEB * HID


# ----------------------------- plain-JAX / numpy glue ---------------------------------
def timestep_embedding(t, dim):
    half = dim // 2
    freqs = jnp.exp(-math.log(10000.0) * jnp.arange(half, dtype=jnp.float32) / (half - 1))
    emb = t.astype(jnp.float32)[:, None] * freqs[None, :]
    emb = jnp.concatenate([jnp.sin(emb), jnp.cos(emb)], axis=1)
    if dim % 2:
        emb = jnp.pad(emb, ((0, 0), (0, 1)))
    return emb


def cheb_polynomials(adj):
    """Chebyshev basis [I, L, 2L^2 - I] (K=2) of the symmetric-normalized Laplacian."""
    a = np.asarray(adj, dtype=np.float32)
    n = a.shape[0]
    d_inv_sqrt = np.sum(a, axis=-1) ** (-0.5)
    lap = np.eye(n, dtype=np.float32) - d_inv_sqrt[:, None] * a * d_inv_sqrt[None, :]
    t2 = 2.0 * (lap @ lap) - np.eye(n, dtype=np.float32)
    return np.stack([np.eye(n, dtype=np.float32), lap, t2], axis=0)


# ----------------------------- fused Pallas kernel ------------------------------------
def _gcndiff_fused_kernel(x_ref, mb_ref, tp_ref, glob_ref, la_ref, lb_ref, o_ref,
                          *, n_head, n_layers, batch_tile, use_lgn_matmul):
    f32 = jnp.float32
    mxu = MXU_DTYPE
    n = N_PTS
    d = HID
    dk = d // n_head
    inv_sqrt_dk = 1.0 / math.sqrt(dk)

    # ---- global (layer-independent) weights: loaded & cast ONCE per grid step ----
    tv_m = glob_ref[TV0:TV0 + K_CHEB * n, 0:n].astype(mxu)                       # (K*N, N)
    gi_w = glob_ref[GCIN_W0:GCIN_W0 + K_CHEB * COORD_IN, 0:HID].astype(mxu)      # (K*Cin, HID)
    gi_b = glob_ref[GCIN_B:GCIN_B + 1, 0:HID]
    go_w = glob_ref[GCOUT_W0:GCOUT_W0 + K_CHEB * HID, 0:OUT_PAD].astype(mxu)     # (K*HID, 128)
    go_b = glob_ref[GCOUT_B:GCOUT_B + 1, 0:OUT_PAD]
    if use_lgn_matmul:
        lgn_m = glob_ref[LGN0:LGN0 + n, 0:n].astype(mxu)                         # (N, N)

    def cheb(inp, w_stack_m, bias):
        # y = sum_k T_k @ inp @ W_k + b as TWO matmuls:
        #   (K*N,N)@(N,C) -> lane-concat of the K row-blocks -> (N,K*C)@(K*C,Cout)
        tx = jnp.dot(tv_m, inp.astype(mxu), preferred_element_type=f32)          # (K*N, C)
        tx2 = jnp.concatenate([tx[k * n:(k + 1) * n, :] for k in range(K_CHEB)],
                              axis=-1)                                            # (N, K*C)
        return jnp.dot(tx2.astype(mxu), w_stack_m, preferred_element_type=f32) + bias

    def layer_norm(v, a, b):
        # DiffPose custom LayerNorm: unbiased std, eps added OUTSIDE the sqrt.
        dd = v.shape[-1]
        mean = jnp.mean(v, axis=-1, keepdims=True)
        var = jnp.sum((v - mean) ** 2, axis=-1, keepdims=True) / (dd - 1)
        inv = pl.reciprocal(jnp.sqrt(var) + 1e-6, approx=True)
        return a * (v - mean) * inv + b

    # ---- gconv_input for every batch element handled by this grid step ----
    outs, mbias = [], []
    for bi in range(batch_tile):
        outs.append(cheb(x_ref[bi].astype(f32), gi_w, gi_b))                     # (N, HID)
        mbias.append(mb_ref[bi])                                                  # (1, N) additive

    for l in range(n_layers):
        # per-layer weights: loaded & cast once, shared by all batch elements of this step
        wqkv = la_ref[l, LA_QKV0:LA_QKV0 + HID, :].astype(mxu)                    # (HID, 3*HID)
        f1w = la_ref[l, LA_F1W0:LA_F1W0 + HID, 0:2 * HID].astype(mxu)             # (HID, 2*HID)
        ln1a = la_ref[l, VR_LN1A:VR_LN1A + 1, 0:HID]
        ln1b = la_ref[l, VR_LN1B:VR_LN1B + 1, 0:HID]
        bqkv = la_ref[l, VR_BQKV:VR_BQKV + 1, :]
        bo = la_ref[l, VR_BO:VR_BO + 1, 0:HID]
        ln2a = la_ref[l, VR_LN2A:VR_LN2A + 1, 0:HID]
        ln2b = la_ref[l, VR_LN2B:VR_LN2B + 1, 0:HID]
        f1b = la_ref[l, VR_F1B:VR_F1B + 1, 0:2 * HID]
        f2b = la_ref[l, VR_F2B:VR_F2B + 1, 0:HID]
        b1 = la_ref[l, VR_B1:VR_B1 + 1, 0:HID]
        b2 = la_ref[l, VR_B2:VR_B2 + 1, 0:HID]
        wo = lb_ref[l, LB_WO0:LB_WO0 + HID, :].astype(mxu)                        # (HID, HID)
        f2w = lb_ref[l, LB_F2W0:LB_F2W0 + 2 * HID, :].astype(mxu)                 # (2*HID, HID)
        w1 = lb_ref[l, LB_W1:LB_W1 + K_CHEB * HID, :].astype(mxu)                 # (K*HID, HID)
        w2 = lb_ref[l, LB_W2:LB_W2 + K_CHEB * HID, :].astype(mxu)

        for bi in range(batch_tile):
            out = outs[bi]

            # ===== GraAttenLayer sublayer 0: LN -> fused-QKV multi-head attention -> +res =====
            xn = layer_norm(out, ln1a, ln1b)
            qkv = jnp.dot(xn.astype(mxu), wqkv, preferred_element_type=f32) + bqkv  # (N, 3D)
            split = lambda base: jnp.stack(
                [qkv[:, base + h * dk: base + (h + 1) * dk] for h in range(n_head)], axis=0)
            qh, kh, vh = split(0), split(d), split(2 * d)                            # (H, N, dk)
            s = jnp.einsum('hqd,hkd->hqk', qh.astype(mxu), kh.astype(mxu),
                           preferred_element_type=f32) * inv_sqrt_dk                 # (H, N, N)
            s = s + mbias[bi]                 # additive key mask (== masked_fill(mask==0, -1e9))
            s = s - jnp.max(s, axis=-1, keepdims=True)
            p = jnp.exp(s)
            p = p * pl.reciprocal(jnp.sum(p, axis=-1, keepdims=True), approx=True)
            oh = jnp.einsum('hqk,hkd->hqd', p.astype(mxu), vh.astype(mxu),
                            preferred_element_type=f32)                              # (H, N, dk)
            attn = jnp.concatenate([oh[h] for h in range(n_head)], axis=-1)          # (N, D)
            attn = jnp.dot(attn.astype(mxu), wo, preferred_element_type=f32) + bo
            x1 = out + attn                                                           # dropout=id

            # ===== GraAttenLayer sublayer 1: LN -> GraphNet (two LAM_Gconv) -> +res =====
            xn2 = layer_norm(x1, ln2a, ln2b)
            if use_lgn_matmul:
                xn2 = jnp.dot(lgn_m, xn2.astype(mxu), preferred_element_type=f32)
            h0 = jnp.dot(xn2.astype(mxu), f1w, preferred_element_type=f32) + f1b
            h0 = jnp.maximum(h0, 0.0)
            if use_lgn_matmul:
                h0 = jnp.dot(lgn_m, h0.astype(mxu), preferred_element_type=f32)
            h1 = jnp.dot(h0.astype(mxu), f2w, preferred_element_type=f32) + f2b
            x1 = x1 + h1
            # (when A_hat == I, its scaled-identity Laplacian was folded into f1w / f2w)

            # ===== _ResChebGC_diff: res + g2(relu(g1(x)) + temb_proj(swish(temb))) =====
            g1 = jnp.maximum(cheb(x1, w1, b1), 0.0)
            g1 = g1 + tp_ref[bi, l:l + 1, :]      # precomputed temb_proj(swish(temb)) for layer l
            g2 = jnp.maximum(cheb(g1, w2, b2), 0.0)
            outs[bi] = x1 + g2

    # ---- gconv_output, padded to OUT_PAD lanes for a dense (unmasked) store ----
    for bi in range(batch_tile):
        o_ref[bi] = cheb(outs[bi], go_w, go_b).astype(o_ref.dtype)


# ----------------------------- pallas_call wrapper -------------------------------------
def _default_batch_tile(bsz):
    """Whole batch in one grid step on single-TensorCore chips (v5e/v6e); split the batch
    across grid steps ("parallel" axis -> both TensorCores) on v7x."""
    kind = ""
    try:
        kind = jax.devices()[0].device_kind.lower()
    except Exception:
        pass
    if "v7" in kind or "7x" in kind:
        return max(1, (bsz + 1) // 2)
    return max(1, bsz)


@partial(jax.jit, static_argnames=("batch_tile", "use_lgn_matmul"))
def _gcndiff_forward_jit(slabs, x, mask, t, *, batch_tile, use_lgn_matmul):
    bsz, n, _ = x.shape

    # ---- XLA-side prologue: M=1 matmuls + sigmoid chains are pure latency in-kernel ----
    te = timestep_embedding(t, HID)                                           # (B, HID)
    h = jnp.dot(te, slabs['tm_w1']) + slabs['tm_b1']
    h = h * jax.nn.sigmoid(h)                                                 # SiLU
    temb = jnp.dot(h, slabs['tm_w2']) + slabs['tm_b2']                        # (B, EMD)
    stemb = temb * jax.nn.sigmoid(temb)                                       # swish(temb)
    tproj = jnp.einsum('be,leh->blh', stemb, slabs['Wp']) + slabs['bp'][None]  # (B, L, HID)

    # additive attention-mask bias (computed once; broadcast over heads & queries in-kernel)
    mbias = jnp.where(mask == 0.0, -1e9, 0.0).astype(jnp.float32)             # (B, 1, N)

    grid = (bsz // batch_tile,)
    kernel = partial(_gcndiff_fused_kernel, n_head=N_HEAD, n_layers=L_LAYERS,
                     batch_tile=batch_tile, use_lgn_matmul=use_lgn_matmul)
    out_pad = pl.pallas_call(
        kernel,
        out_shape=jax.ShapeDtypeStruct((bsz, n, OUT_PAD), jnp.float32),
        grid=grid,
        in_specs=[
            pl.BlockSpec((batch_tile, n, COORD_IN), lambda g: (g, 0, 0)),          # x
            pl.BlockSpec((batch_tile, 1, n), lambda g: (g, 0, 0)),                 # mask bias
            pl.BlockSpec((batch_tile, L_LAYERS, HID), lambda g: (g, 0, 0)),        # temb proj
            pl.BlockSpec((GLOB_ROWS, OUT_PAD), lambda g: (0, 0)),                  # global slab
            pl.BlockSpec((L_LAYERS, LA_ROWS, LA_COLS), lambda g: (0, 0, 0)),       # layer slab A
            pl.BlockSpec((L_LAYERS, LB_ROWS, HID), lambda g: (0, 0, 0)),           # layer slab B
        ],
        out_specs=pl.BlockSpec((batch_tile, n, OUT_PAD), lambda g: (g, 0, 0)),
        compiler_params=pltpu.CompilerParams(dimension_semantics=("parallel",)),
    )(x, mbias, tproj, slabs['glob'], slabs['layA'], slabs['layB'])
    return out_pad[:, :, :COORD_OUT]


def gcndiff_forward(slabs, x, mask, t, use_lgn_matmul=True, batch_tile=None):
    bsz = x.shape[0]
    if batch_tile is None:
        batch_tile = _default_batch_tile(bsz)
    batch_tile = min(max(int(batch_tile), 1), bsz)
    while bsz % batch_tile:                       # keep the grid exact
        batch_tile -= 1
    return _gcndiff_forward_jit(slabs, x, mask, t,
                                batch_tile=int(batch_tile),
                                use_lgn_matmul=bool(use_lgn_matmul))


# ----------------------------- parameters & packing ------------------------------------
def init_params(key):
    keys = iter(jax.random.split(key, 32))
    w = lambda shape, s=0.1: s * jax.random.normal(next(keys), shape, jnp.float32)
    z = lambda shape: jnp.zeros(shape, jnp.float32)
    o = lambda shape: jnp.ones(shape, jnp.float32)
    L = L_LAYERS
    p = {}
    p['A_hat'] = jnp.eye(N_PTS, dtype=jnp.float32)     # GraphNet learnable adjacency (init = I)
    p['tm_w1'] = w((HID, EMD)); p['tm_b1'] = z((EMD,))
    p['tm_w2'] = w((EMD, EMD)); p['tm_b2'] = z((EMD,))
    p['gc_in_W'] = w((K_CHEB, COORD_IN, HID)); p['gc_in_b'] = z((HID,))
    p['gc_out_W'] = w((K_CHEB, HID, COORD_OUT)); p['gc_out_b'] = z((COORD_OUT,))
    p['ln1_a'] = o((L, HID)); p['ln1_b'] = z((L, HID))
    p['wq'] = w((L, HID, HID)); p['bq'] = z((L, HID))
    p['wk'] = w((L, HID, HID)); p['bk'] = z((L, HID))
    p['wv'] = w((L, HID, HID)); p['bv'] = z((L, HID))
    p['wo'] = w((L, HID, HID)); p['bo'] = z((L, HID))
    p['ln2_a'] = o((L, HID)); p['ln2_b'] = z((L, HID))
    p['f1w'] = w((L, HID, 2 * HID)); p['f1b'] = z((L, 2 * HID))
    p['f2w'] = w((L, 2 * HID, HID)); p['f2b'] = z((L, HID))
    p['W1'] = w((L, K_CHEB, HID, HID)); p['b1'] = z((L, HID))
    p['W2'] = w((L, K_CHEB, HID, HID)); p['b2'] = z((L, HID))
    p['Wp'] = w((L, EMD, HID)); p['bp'] = z((L, HID))
    return p


def pack_params(params, adj):
    """Pack the module weights into a few dense slabs for the fused kernel.

    Returns (slabs, use_lgn_matmul). The GraphNet Laplacian is always recomputed from the
    (possibly trained) A_hat; the identity shortcut (skip the L_gn matmuls, fold the scalar
    into f1w/f2w) is only taken when A_hat is exactly the identity.
    """
    L = L_LAYERS
    npf = lambda k: np.asarray(params[k], dtype=np.float32)

    # --- GraphNet Laplacian from the learnable adjacency A_hat ---
    a_hat = npf('A_hat')
    d_hat = (a_hat.sum(axis=0) + 1e-5) ** (-0.5)
    l_gn = d_hat[:, None] * a_hat * d_hat[None, :]
    use_lgn_matmul = not np.array_equal(a_hat, np.eye(N_PTS, dtype=np.float32))
    lgn_scale = 1.0 if use_lgn_matmul else float(l_gn[0, 0])

    # --- global slab: Chebyshev basis, L_gn, gconv_input, gconv_output (lane-padded) ---
    glob = np.zeros((GLOB_ROWS, OUT_PAD), np.float32)
    glob[TV0:TV0 + K_CHEB * N_PTS, :N_PTS] = cheb_polynomials(adj).reshape(K_CHEB * N_PTS, N_PTS)
    glob[LGN0:LGN0 + N_PTS, :N_PTS] = l_gn
    glob[GCIN_W0:GCIN_W0 + K_CHEB * COORD_IN, :HID] = npf('gc_in_W').reshape(K_CHEB * COORD_IN, HID)
    glob[GCIN_B, :HID] = npf('gc_in_b')
    go_w = np.zeros((K_CHEB, HID, OUT_PAD), np.float32)
    go_w[:, :, :COORD_OUT] = npf('gc_out_W')
    glob[GCOUT_W0:GCOUT_W0 + K_CHEB * HID, :] = go_w.reshape(K_CHEB * HID, OUT_PAD)
    glob[GCOUT_B, :COORD_OUT] = npf('gc_out_b')

    # --- per-layer slab A (3*HID lanes): fused QKV weight, GraphNet fc1, bias/LN vectors ---
    la = np.zeros((L, LA_ROWS, LA_COLS), np.float32)
    la[:, LA_QKV0:LA_QKV0 + HID, :] = np.concatenate([npf('wq'), npf('wk'), npf('wv')], axis=-1)
    la[:, LA_F1W0:LA_F1W0 + HID, :2 * HID] = lgn_scale * npf('f1w')
    la[:, VR_LN1A, :HID] = npf('ln1_a')
    la[:, VR_LN1B, :HID] = npf('ln1_b')
    la[:, VR_BQKV, :] = np.concatenate([npf('bq'), npf('bk'), npf('bv')], axis=-1)
    la[:, VR_BO, :HID] = npf('bo')
    la[:, VR_LN2A, :HID] = npf('ln2_a')
    la[:, VR_LN2B, :HID] = npf('ln2_b')
    la[:, VR_F1B, :2 * HID] = npf('f1b')
    la[:, VR_F2B, :HID] = npf('f2b')
    la[:, VR_B1, :HID] = npf('b1')
    la[:, VR_B2, :HID] = npf('b2')

    # --- per-layer slab B (HID lanes): attention out-proj, GraphNet fc2, ResCheb W1/W2 ---
    lb = np.zeros((L, LB_ROWS, HID), np.float32)
    lb[:, LB_WO0:LB_WO0 + HID, :] = npf('wo')
    lb[:, LB_F2W0:LB_F2W0 + 2 * HID, :] = lgn_scale * npf('f2w')
    lb[:, LB_W1:LB_W1 + K_CHEB * HID, :] = npf('W1').reshape(L, K_CHEB * HID, HID)
    lb[:, LB_W2:LB_W2 + K_CHEB * HID, :] = npf('W2').reshape(L, K_CHEB * HID, HID)

    slabs = dict(glob=jnp.asarray(glob), layA=jnp.asarray(la), layB=jnp.asarray(lb),
                 tm_w1=params['tm_w1'], tm_b1=params['tm_b1'],
                 tm_w2=params['tm_w2'], tm_b2=params['tm_b2'],
                 Wp=params['Wp'], bp=params['bp'])
    return slabs, use_lgn_matmul


# ----------------------------- main -----------------------------------------------------
if __name__ == "__main__":
    key = jax.random.PRNGKey(0)
    k_p, k_x = jax.random.split(key, 2)

    # simple symmetric chain adjacency with self-loops (keeps the Laplacian well defined)
    adj = np.eye(N_PTS, dtype=np.float32)
    idx = np.arange(N_PTS - 1)
    adj[idx, idx + 1] = 1.0
    adj[idx + 1, idx] = 1.0

    params = init_params(k_p)
    slabs, use_lgn_matmul = pack_params(params, adj)

    x = jax.random.normal(k_x, (B, N_PTS, COORD_IN), jnp.float32)
    mask = jnp.ones((B, 1, N_PTS), jnp.float32)     # all joints visible
    t = jnp.array([7.0, 231.0], jnp.float32)        # diffusion timesteps

    out = gcndiff_forward(slabs, x, mask, t, use_lgn_matmul=use_lgn_matmul)
    jax.block_until_ready(out)
    assert out.shape == (B, N_PTS, COORD_OUT), out.shape
    assert bool(jnp.all(jnp.isfinite(out)))
    print("KERNEL_OK")
</pallas_src>

<mosaic_0001>
module attributes {stable_mosaic.version = 11 : i64} {
  func.func @_gcndiff_fused_kernel(%arg0: i32, %arg1: memref<2x16x3xf32, #tpu.memory_space<vmem>>, %arg2: memref<2x1x16xf32, #tpu.memory_space<vmem>>, %arg3: memref<2x2x32xf32, #tpu.memory_space<vmem>>, %arg4: memref<171x128xf32, #tpu.memory_space<vmem>>, %arg5: memref<2x74x96xf32, #tpu.memory_space<vmem>>, %arg6: memref<2x288x32xf32, #tpu.memory_space<vmem>>, %arg7: memref<2x16x128xf32, #tpu.memory_space<vmem>>) attributes {dimension_semantics = [#tpu.dimension_semantics<parallel>], iteration_bounds = array<i64: 1>, scalar_prefetch = 0 : i64, scratch_operands = 0 : i64, tpu.core_type = #tpu.core_type<tc>, window_params = [{transform_indices = @transform_0, window_bounds = array<i64: 2, 16, 3>}, {transform_indices = @transform_1, window_bounds = array<i64: 2, 1, 16>}, {transform_indices = @transform_2, window_bounds = array<i64: 2, 2, 32>}, {pipeline_mode = #tpu.pipeline_mode<synchronous>, transform_indices = @transform_3, window_bounds = array<i64: 171, 128>}, {pipeline_mode = #tpu.pipeline_mode<synchronous>, transform_indices = @transform_4, window_bounds = array<i64: 2, 74, 96>}, {pipeline_mode = #tpu.pipeline_mode<synchronous>, transform_indices = @transform_5, window_bounds = array<i64: 2, 288, 32>}, {transform_indices = @transform_6, window_bounds = array<i64: 2, 16, 128>}]} {
    %c0 = arith.constant 0 : index
    %c0_0 = arith.constant 0 : index
    %0 = vector.load %arg4[%c0, %c0_0] : memref<171x128xf32, #tpu.memory_space<vmem>>, vector<48x16xf32>
    %1 = arith.truncf %0 : vector<48x16xf32> to vector<48x16xbf16>
    %c64 = arith.constant 64 : index
    %c0_1 = arith.constant 0 : index
    %2 = vector.load %arg4[%c64, %c0_1] : memref<171x128xf32, #tpu.memory_space<vmem>>, vector<9x32xf32>
    %3 = arith.truncf %2 : vector<9x32xf32> to vector<9x32xbf16>
    %c73 = arith.constant 73 : index
    %c0_2 = arith.constant 0 : index
    %4 = vector.load %arg4[%c73, %c0_2] : memref<171x128xf32, #tpu.memory_space<vmem>>, vector<1x32xf32>
    %c74 = arith.constant 74 : index
    %c0_3 = arith.constant 0 : index
    %5 = vector.load %arg4[%c74, %c0_3] : memref<171x128xf32, #tpu.memory_space<vmem>>, vector<96x128xf32>
    %6 = arith.truncf %5 : vector<96x128xf32> to vector<96x128xbf16>
    %c170 = arith.constant 170 : index
    %c0_4 = arith.constant 0 : index
    %7 = vector.load %arg4[%c170, %c0_4] : memref<171x128xf32, #tpu.memory_space<vmem>>, vector<1x128xf32>
    %c0_5 = arith.constant 0 : index
    %c0_6 = arith.constant 0 : index
    %c0_7 = arith.constant 0 : index
    %8 = vector.load %arg1[%c0_5, %c0_6, %c0_7] : memref<2x16x3xf32, #tpu.memory_space<vmem>>, vector<1x16x3xf32>
    %9 = vector.shape_cast %8 : vector<1x16x3xf32> to vector<16x3xf32>
    %10 = arith.truncf %9 : vector<16x3xf32> to vector<16x3xbf16>
    %cst = arith.constant dense<0.000000e+00> : vector<48x3xf32>
    %11 = tpu.matmul %1, %10, %cst {dimension_numbers = #tpu.dot_dimension_numbers<[1], [0], [0], [1], [0, 0, 1, 1], [], []>} : vector<48x16xbf16>, vector<16x3xbf16>, vector<48x3xf32> -> vector<48x3xf32>
    %12 = vector.extract_strided_slice %11 {offsets = [0, 0], sizes = [16, 3], strides = [1, 1]} : vector<48x3xf32> to vector<16x3xf32>
    %13 = vector.extract_strided_slice %11 {offsets = [16, 0], sizes = [16, 3], strides = [1, 1]} : vector<48x3xf32> to vector<16x3xf32>
    %14 = vector.extract_strided_slice %11 {offsets = [32, 0], sizes = [16, 3], strides = [1, 1]} : vector<48x3xf32> to vector<16x3xf32>
    %15 = tpu.concatenate %12, %13, %14 in 1 : vector<16x3xf32>, vector<16x3xf32>, vector<16x3xf32> -> vector<16x9xf32>
    %16 = arith.truncf %15 : vector<16x9xf32> to vector<16x9xbf16>
    %cst_8 = arith.constant dense<0.000000e+00> : vector<16x32xf32>
    %17 = tpu.matmul %16, %3, %cst_8 {dimension_numbers = #tpu.dot_dimension_numbers<[1], [0], [0], [1], [0, 0, 1, 1], [], []>} : vector<16x9xbf16>, vector<9x32xbf16>, vector<16x32xf32> -> vector<16x32xf32>
    %18 = vector.broadcast %4 : vector<1x32xf32> to vector<16x32xf32>
    %19 = arith.addf %17, %18 : vector<16x32xf32>
    %c0_9 = arith.constant 0 : index
    %c0_10 = arith.constant 0 : index
    %c0_11 = arith.constant 0 : index
    %20 = vector.load %arg2[%c0_9, %c0_10, %c0_11] : memref<2x1x16xf32, #tpu.memory_space<vmem>>, vector<1x1x16xf32>
    %21 = vector.shape_cast %20 : vector<1x1x16xf32> to vector<1x16xf32>
    %c1 = arith.constant 1 : index
    %c0_12 = arith.constant 0 : index
    %c0_13 = arith.constant 0 : index
    %22 = vector.load %arg1[%c1, %c0_12, %c0_13] : memref<2x16x3xf32, #tpu.memory_space<vmem>>, vector<1x16x3xf32>
    %23 = vector.shape_cast %22 : vector<1x16x3xf32> to vector<16x3xf32>
    %24 = arith.truncf %23 : vector<16x3xf32> to vector<16x3xbf16>
    %cst_14 = arith.constant dense<0.000000e+00> : vector<48x3xf32>
    %25 = tpu.matmul %1, %24, %cst_14 {dimension_numbers = #tpu.dot_dimension_numbers<[1], [0], [0], [1], [0, 0, 1, 1], [], []>} : vector<48x16xbf16>, vector<16x3xbf16>, vector<48x3xf32> -> vector<48x3xf32>
    %26 = vector.extract_strided_slice %25 {offsets = [0, 0], sizes = [16, 3], strides = [1, 1]} : vector<48x3xf32> to vector<16x3xf32>
    %27 = vector.extract_strided_slice %25 {offsets = [16, 0], sizes = [16, 3], strides = [1, 1]} : vector<48x3xf32> to vector<16x3xf32>
    %28 = vector.extract_strided_slice %25 {offsets = [32, 0], sizes = [16, 3], strides = [1, 1]} : vector<48x3xf32> to vector<16x3xf32>
    %29 = tpu.concatenate %26, %27, %28 in 1 : vector<16x3xf32>, vector<16x3xf32>, vector<16x3xf32> -> vector<16x9xf32>
    %30 = arith.truncf %29 : vector<16x9xf32> to vector<16x9xbf16>
    %cst_15 = arith.constant dense<0.000000e+00> : vector<16x32xf32>
    %31 = tpu.matmul %30, %3, %cst_15 {dimension_numbers = #tpu.dot_dimension_numbers<[1], [0], [0], [1], [0, 0, 1, 1], [], []>} : vector<16x9xbf16>, vector<9x32xbf16>, vector<16x32xf32> -> vector<16x32xf32>
    %32 = vector.broadcast %4 : vector<1x32xf32> to vector<16x32xf32>
    %33 = arith.addf %31, %32 : vector<16x32xf32>
    %c1_16 = arith.constant 1 : index
    %c0_17 = arith.constant 0 : index
    %c0_18 = arith.constant 0 : index
    %34 = vector.load %arg2[%c1_16, %c0_17, %c0_18] : memref<2x1x16xf32, #tpu.memory_space<vmem>>, vector<1x1x16xf32>
    %35 = vector.shape_cast %34 : vector<1x1x16xf32> to vector<1x16xf32>
    %c0_19 = arith.constant 0 : index
    %c0_20 = arith.constant 0 : index
    %c0_21 = arith.constant 0 : index
    %36 = vector.load %arg5[%c0_19, %c0_20, %c0_21] : memref<2x74x96xf32, #tpu.memory_space<vmem>>, vector<1x32x96xf32>
    %37 = vector.shape_cast %36 : vector<1x32x96xf32> to vector<32x96xf32>
    %38 = arith.truncf %37 : vector<32x96xf32> to vector<32x96xbf16>
    %c0_22 = arith.constant 0 : index
    %c32 = arith.constant 32 : index
    %c0_23 = arith.constant 0 : index
    %39 = vector.load %arg5[%c0_22, %c32, %c0_23] : memref<2x74x96xf32, #tpu.memory_space<vmem>>, vector<1x32x64xf32>
    %40 = vector.shape_cast %39 : vector<1x32x64xf32> to vector<32x64xf32>
    %41 = arith.truncf %40 : vector<32x64xf32> to vector<32x64xbf16>
    %c0_24 = arith.constant 0 : index
    %c64_25 = arith.constant 64 : index
    %c0_26 = arith.constant 0 : index
    %42 = vector.load %arg5[%c0_24, %c64_25, %c0_26] : memref<2x74x96xf32, #tpu.memory_space<vmem>>, vector<1x1x32xf32>
    %43 = vector.shape_cast %42 : vector<1x1x32xf32> to vector<1x32xf32>
    %c0_27 = arith.constant 0 : index
    %c65 = arith.constant 65 : index
    %c0_28 = arith.constant 0 : index
    %44 = vector.load %arg5[%c0_27, %c65, %c0_28] : memref<2x74x96xf32, #tpu.memory_space<vmem>>, vector<1x1x32xf32>
    %45 = vector.shape_cast %44 : vector<1x1x32xf32> to vector<1x32xf32>
    %c0_29 = arith.constant 0 : index
    %c66 = arith.constant 66 : index
    %c0_30 = arith.constant 0 : index
    %46 = vector.load %arg5[%c0_29, %c66, %c0_30] : memref<2x74x96xf32, #tpu.memory_space<vmem>>, vector<1x1x96xf32>
    %47 = vector.shape_cast %46 : vector<1x1x96xf32> to vector<1x96xf32>
    %c0_31 = arith.constant 0 : index
    %c67 = arith.constant 67 : index
    %c0_32 = arith.constant 0 : index
    %48 = vector.load %arg5[%c0_31, %c67, %c0_32] : memref<2x74x96xf32, #tpu.memory_space<vmem>>, vector<1x1x32xf32>
    %49 = vector.shape_cast %48 : vector<1x1x32xf32> to vector<1x32xf32>
    %c0_33 = arith.constant 0 : index
    %c68 = arith.constant 68 : index
    %c0_34 = arith.constant 0 : index
    %50 = vector.load %arg5[%c0_33, %c68, %c0_34] : memref<2x74x96xf32, #tpu.memory_space<vmem>>, vector<1x1x32xf32>
    %51 = vector.shape_cast %50 : vector<1x1x32xf32> to vector<1x32xf32>
    %c0_35 = arith.constant 0 : index
    %c69 = arith.constant 69 : index
    %c0_36 = arith.constant 0 : index
    %52 = vector.load %arg5[%c0_35, %c69, %c0_36] : memref<2x74x96xf32, #tpu.memory_space<vmem>>, vector<1x1x32xf32>
    %53 = vector.shape_cast %52 : vector<1x1x32xf32> to vector<1x32xf32>
    %c0_37 = arith.constant 0 : index
    %c70 = arith.constant 70 : index
    %c0_38 = arith.constant 0 : index
    %54 = vector.load %arg5[%c0_37, %c70, %c0_38] : memref<2x74x96xf32, #tpu.memory_space<vmem>>, vector<1x1x64xf32>
    %55 = vector.shape_cast %54 : vector<1x1x64xf32> to vector<1x64xf32>
    %c0_39 = arith.constant 0 : index
    %c71 = arith.constant 71 : index
    %c0_40 = arith.constant 0 : index
    %56 = vector.load %arg5[%c0_39, %c71, %c0_40] : memref<2x74x96xf32, #tpu.memory_space<vmem>>, vector<1x1x32xf32>
    %57 = vector.shape_cast %56 : vector<1x1x32xf32> to vector<1x32xf32>
    %c0_41 = arith.constant 0 : index
    %c72 = arith.constant 72 : index
    %c0_42 = arith.constant 0 : index
    %58 = vector.load %arg5[%c0_41, %c72, %c0_42] : memref<2x74x96xf32, #tpu.memory_space<vmem>>, vector<1x1x32xf32>
    %59 = vector.shape_cast %58 : vector<1x1x32xf32> to vector<1x32xf32>
    %c0_43 = arith.constant 0 : index
    %c73_44 = arith.constant 73 : index
    %c0_45 = arith.constant 0 : index
    %60 = vector.load %arg5[%c0_43, %c73_44, %c0_45] : memref<2x74x96xf32, #tpu.memory_space<vmem>>, vector<1x1x32xf32>
    %61 = vector.shape_cast %60 : vector<1x1x32xf32> to vector<1x32xf32>
    %c0_46 = arith.constant 0 : index
    %c0_47 = arith.constant 0 : index
    %c0_48 = arith.constant 0 : index
    %62 = vector.load %arg6[%c0_46, %c0_47, %c0_48] : memref<2x288x32xf32, #tpu.memory_space<vmem>>, vector<1x32x32xf32>
    %63 = vector.shape_cast %62 : vector<1x32x32xf32> to vector<32x32xf32>
    %64 = arith.truncf %63 : vector<32x32xf32> to vector<32x32xbf16>
    %c0_49 = arith.constant 0 : index
    %c32_50 = arith.constant 32 : index
    %c0_51 = arith.constant 0 : index
    %65 = vector.load %arg6[%c0_49, %c32_50, %c0_51] : memref<2x288x32xf32, #tpu.memory_space<vmem>>, vector<1x64x32xf32>
    %66 = vector.shape_cast %65 : vector<1x64x32xf32> to vector<64x32xf32>
    %67 = arith.truncf %66 : vector<64x32xf32> to vector<64x32xbf16>
    %c0_52 = arith.constant 0 : index
    %c96 = arith.constant 96 : index
    %c0_53 = arith.constant 0 : index
    %68 = vector.load %arg6[%c0_52, %c96, %c0_53] : memref<2x288x32xf32, #tpu.memory_space<vmem>>, vector<1x96x32xf32>
    %69 = vector.shape_cast %68 : vector<1x96x32xf32> to vector<96x32xf32>
    %70 = arith.truncf %69 : vector<96x32xf32> to vector<96x32xbf16>
    %c0_54 = arith.constant 0 : index
    %c192 = arith.constant 192 : index
    %c0_55 = arith.constant 0 : index
    %71 = vector.load %arg6[%c0_54, %c192, %c0_55] : memref<2x288x32xf32, #tpu.memory_space<vmem>>, vector<1x96x32xf32>
    %72 = vector.shape_cast %71 : vector<1x96x32xf32> to vector<96x32xf32>
    %73 = arith.truncf %72 : vector<96x32xf32> to vector<96x32xbf16>
    %cst_56 = arith.constant dense<0.000000e+00> : vector<16xf32>
    %74 = vector.multi_reduction <add>, %19, %cst_56 [1] : vector<16x32xf32> to vector<16xf32>
    %75 = vector.shape_cast %74 : vector<16xf32> to vector<16x1xf32>
    %cst_57 = arith.constant 3.200000e+01 : f32
    %76 = vector.broadcast %cst_57 : f32 to vector<16x1xf32>
    %77 = arith.divf %75, %76 : vector<16x1xf32>
    %78 = vector.broadcast %77 : vector<16x1xf32> to vector<16x32xf32>
    %79 = arith.subf %19, %78 : vector<16x32xf32>
    %80 = arith.mulf %79, %79 : vector<16x32xf32>
    %cst_58 = arith.constant dense<0.000000e+00> : vector<16xf32>
    %81 = vector.multi_reduction <add>, %80, %cst_58 [1] : vector<16x32xf32> to vector<16xf32>
    %82 = vector.shape_cast %81 : vector<16xf32> to vector<16x1xf32>
    %cst_59 = arith.constant 3.100000e+01 : f32
    %83 = vector.broadcast %cst_59 : f32 to vector<16x1xf32>
    %84 = arith.divf %82, %83 : vector<16x1xf32>
    %85 = math.sqrt %84 : vector<16x1xf32>
    %cst_60 = arith.constant 9.99999997E-7 : f32
    %86 = vector.broadcast %cst_60 : f32 to vector<16x1xf32>
    %87 = arith.addf %85, %86 : vector<16x1xf32>
    %88 = tpu.reciprocal %87 {approx = true} : vector<16x1xf32> -> vector<16x1xf32>
    %89 = vector.broadcast %77 : vector<16x1xf32> to vector<16x32xf32>
    %90 = arith.subf %19, %89 : vector<16x32xf32>
    %91 = vector.broadcast %43 : vector<1x32xf32> to vector<16x32xf32>
    %92 = arith.mulf %91, %90 : vector<16x32xf32>
    %93 = vector.broadcast %88 : vector<16x1xf32> to vector<16x32xf32>
    %94 = arith.mulf %92, %93 : vector<16x32xf32>
    %95 = vector.broadcast %45 : vector<1x32xf32> to vector<16x32xf32>
    %96 = arith.addf %94, %95 : vector<16x32xf32>
    %97 = arith.truncf %96 : vector<16x32xf32> to vector<16x32xbf16>
    %cst_61 = arith.constant dense<0.000000e+00> : vector<16x96xf32>
    %98 = tpu.matmul %97, %38, %cst_61 {dimension_numbers = #tpu.dot_dimension_numbers<[1], [0], [0], [1], [0, 0, 1, 1], [], []>} : vector<16x32xbf16>, vector<32x96xbf16>, vector<16x96xf32> -> vector<16x96xf32>
    %99 = vector.broadcast %47 : vector<1x96xf32> to vector<16x96xf32>
    %100 = arith.addf %98, %99 : vector<16x96xf32>
    %101 = vector.extract_strided_slice %100 {offsets = [0, 0], sizes = [16, 8], strides = [1, 1]} : vector<16x96xf32> to vector<16x8xf32>
    %102 = vector.extract_strided_slice %100 {offsets = [0, 8], sizes = [16, 8], strides = [1, 1]} : vector<16x96xf32> to vector<16x8xf32>
    %103 = vector.extract_strided_slice %100 {offsets = [0, 16], sizes = [16, 8], strides = [1, 1]} : vector<16x96xf32> to vector<16x8xf32>
    %104 = vector.extract_strided_slice %100 {offsets = [0, 24], sizes = [16, 8], strides = [1, 1]} : vector<16x96xf32> to vector<16x8xf32>
    %105 = vector.shape_cast %101 : vector<16x8xf32> to vector<1x16x8xf32>
    %106 = vector.shape_cast %102 : vector<16x8xf32> to vector<1x16x8xf32>
    %107 = vector.shape_cast %103 : vector<16x8xf32> to vector<1x16x8xf32>
    %108 = vector.shape_cast %104 : vector<16x8xf32> to vector<1x16x8xf32>
    %109 = tpu.concatenate %105, %106, %107, %108 in 0 : vector<1x16x8xf32>, vector<1x16x8xf32>, vector<1x16x8xf32>, vector<1x16x8xf32> -> vector<4x16x8xf32>
    %110 = vector.extract_strided_slice %100 {offsets = [0, 32], sizes = [16, 8], strides = [1, 1]} : vector<16x96xf32> to vector<16x8xf32>
    %111 = vector.extract_strided_slice %100 {offsets = [0, 40], sizes = [16, 8], strides = [1, 1]} : vector<16x96xf32> to vector<16x8xf32>
    %112 = vector.extract_strided_slice %100 {offsets = [0, 48], sizes = [16, 8], strides = [1, 1]} : vector<16x96xf32> to vector<16x8xf32>
    %113 = vector.extract_strided_slice %100 {offsets = [0, 56], sizes = [16, 8], strides = [1, 1]} : vector<16x96xf32> to vector<16x8xf32>
    %114 = vector.shape_cast %110 : vector<16x8xf32> to vector<1x16x8xf32>
    %115 = vector.shape_cast %111 : vector<16x8xf32> to vector<1x16x8xf32>
    %116 = vector.shape_cast %112 : vector<16x8xf32> to vector<1x16x8xf32>
    %117 = vector.shape_cast %113 : vector<16x8xf32> to vector<1x16x8xf32>
    %118 = tpu.concatenate %114, %115, %116, %117 in 0 : vector<1x16x8xf32>, vector<1x16x8xf32>, vector<1x16x8xf32>, vector<1x16x8xf32> -> vector<4x16x8xf32>
    %119 = vector.extract_strided_slice %100 {offsets = [0, 64], sizes = [16, 8], strides = [1, 1]} : vector<16x96xf32> to vector<16x8xf32>
    %120 = vector.extract_strided_slice %100 {offsets = [0, 72], sizes = [16, 8], strides = [1, 1]} : vector<16x96xf32> to vector<16x8xf32>
    %121 = vector.extract_strided_slice %100 {offsets = [0, 80], sizes = [16, 8], strides = [1, 1]} : vector<16x96xf32> to vector<16x8xf32>
    %122 = vector.extract_strided_slice %100 {offsets = [0, 88], sizes = [16, 8], strides = [1, 1]} : vector<16x96xf32> to vector<16x8xf32>
    %123 = vector.shape_cast %119 : vector<16x8xf32> to vector<1x16x8xf32>
    %124 = vector.shape_cast %120 : vector<16x8xf32> to vector<1x16x8xf32>
    %125 = vector.shape_cast %121 : vector<16x8xf32> to vector<1x16x8xf32>
    %126 = vector.shape_cast %122 : vector<16x8xf32> to vector<1x16x8xf32>
    %127 = tpu.concatenate %123, %124, %125, %126 in 0 : vector<1x16x8xf32>, vector<1x16x8xf32>, vector<1x16x8xf32>, vector<1x16x8xf32> -> vector<4x16x8xf32>
    %128 = arith.truncf %109 : vector<4x16x8xf32> to vector<4x16x8xbf16>
    %129 = arith.truncf %118 : vector<4x16x8xf32> to vector<4x16x8xbf16>
    "tpu.trace_start"() <{level = 10 : i32, message = "hqd,hkd->hqk"}> : () -> ()
    %cst_62 = arith.constant dense<0.000000e+00> : vector<4x16x16xf32>
    %130 = tpu.matmul %128, %129, %cst_62 {dimension_numbers = #tpu.dot_dimension_numbers<[2], [2], [1], [1], [0, 0, 0, 1, 1, 1], [0], [0]>} : vector<4x16x8xbf16>, vector<4x16x8xbf16>, vector<4x16x16xf32> -> vector<4x16x16xf32>
    "tpu.trace_stop"() : () -> ()
    %cst_63 = arith.constant 0.353553385 : f32
    %131 = vector.broadcast %cst_63 : f32 to vector<4x16x16xf32>
    %132 = arith.mulf %130, %131 : vector<4x16x16xf32>
    %133 = vector.shape_cast %21 : vector<1x16xf32> to vector<1x1x16xf32>
    %134 = vector.broadcast %133 : vector<1x1x16xf32> to vector<4x16x16xf32>
    %135 = arith.addf %132, %134 : vector<4x16x16xf32>
    %cst_64 = arith.constant dense<0xFF800000> : vector<4x16xf32>
    %136 = vector.multi_reduction <maximumf>, %135, %cst_64 [2] : vector<4x16x16xf32> to vector<4x16xf32>
    %137 = vector.shape_cast %136 : vector<4x16xf32> to vector<4x16x1xf32>
    %138 = vector.broadcast %137 : vector<4x16x1xf32> to vector<4x16x16xf32>
    %139 = arith.subf %135, %138 : vector<4x16x16xf32>
    %140 = math.exp %139 : vector<4x16x16xf32>
    %cst_65 = arith.constant dense<0.000000e+00> : vector<4x16xf32>
    %141 = vector.multi_reduction <add>, %140, %cst_65 [2] : vector<4x16x16xf32> to vector<4x16xf32>
    %142 = vector.shape_cast %141 : vector<4x16xf32> to vector<4x16x1xf32>
    %143 = tpu.reciprocal %142 {approx = true} : vector<4x16x1xf32> -> vector<4x16x1xf32>
    %144 = vector.broadcast %143 : vector<4x16x1xf32> to vector<4x16x16xf32>
    %145 = arith.mulf %140, %144 : vector<4x16x16xf32>
    %146 = arith.truncf %145 : vector<4x16x16xf32> to vector<4x16x16xbf16>
    %147 = arith.truncf %127 : vector<4x16x8xf32> to vector<4x16x8xbf16>
    "tpu.trace_start"() <{level = 10 : i32, message = "hqk,hkd->hqd"}> : () -> ()
    %cst_66 = arith.constant dense<0.000000e+00> : vector<4x16x8xf32>
    %148 = tpu.matmul %146, %147, %cst_66 {dimension_numbers = #tpu.dot_dimension_numbers<[2], [1], [1], [2], [0, 0, 0, 1, 1, 2], [0], [0]>} : vector<4x16x16xbf16>, vector<4x16x8xbf16>, vector<4x16x8xf32> -> vector<4x16x8xf32>
    "tpu.trace_stop"() : () -> ()
    %149 = vector.extract_strided_slice %148 {offsets = [0, 0, 0], sizes = [1, 16, 8], strides = [1, 1, 1]} : vector<4x16x8xf32> to vector<1x16x8xf32>
    %150 = vector.shape_cast %149 : vector<1x16x8xf32> to vector<16x8xf32>
    %151 = vector.extract_strided_slice %148 {offsets = [1, 0, 0], sizes = [1, 16, 8], strides = [1, 1, 1]} : vector<4x16x8xf32> to vector<1x16x8xf32>
    %152 = vector.shape_cast %151 : vector<1x16x8xf32> to vector<16x8xf32>
    %153 = vector.extract_strided_slice %148 {offsets = [2, 0, 0], sizes = [1, 16, 8], strides = [1, 1, 1]} : vector<4x16x8xf32> to vector<1x16x8xf32>
    %154 = vector.shape_cast %153 : vector<1x16x8xf32> to vector<16x8xf32>
    %155 = vector.extract_strided_slice %148 {offsets = [3, 0, 0], sizes = [1, 16, 8], strides = [1, 1, 1]} : vector<4x16x8xf32> to vector<1x16x8xf32>
    %156 = vector.shape_cast %155 : vector<1x16x8xf32> to vector<16x8xf32>
    %157 = tpu.concatenate %150, %152, %154, %156 in 1 : vector<16x8xf32>, vector<16x8xf32>, vector<16x8xf32>, vector<16x8xf32> -> vector<16x32xf32>
    %158 = arith.truncf %157 : vector<16x32xf32> to vector<16x32xbf16>
    %cst_67 = arith.constant dense<0.000000e+00> : vector<16x32xf32>
    %159 = tpu.matmul %158, %64, %cst_67 {dimension_numbers = #tpu.dot_dimension_numbers<[1], [0], [0], [1], [0, 0, 1, 1], [], []>} : vector<16x32xbf16>, vector<32x32xbf16>, vector<16x32xf32> -> vector<16x32xf32>
    %160 = vector.broadcast %49 : vector<1x32xf32> to vector<16x32xf32>
    %161 = arith.addf %159, %160 : vector<16x32xf32>
    %162 = arith.addf %19, %161 : vector<16x32xf32>
    %cst_68 = arith.constant dense<0.000000e+00> : vector<16xf32>
    %163 = vector.multi_reduction <add>, %162, %cst_68 [1] : vector<16x32xf32> to vector<16xf32>
    %164 = vector.shape_cast %163 : vector<16xf32> to vector<16x1xf32>
    %cst_69 = arith.constant 3.200000e+01 : f32
    %165 = vector.broadcast %cst_69 : f32 to vector<16x1xf32>
    %166 = arith.divf %164, %165 : vector<16x1xf32>
    %167 = vector.broadcast %166 : vector<16x1xf32> to vector<16x32xf32>
    %168 = arith.subf %162, %167 : vector<16x32xf32>
    %169 = arith.mulf %168, %168 : vector<16x32xf32>
    %cst_70 = arith.constant dense<0.000000e+00> : vector<16xf32>
    %170 = vector.multi_reduction <add>, %169, %cst_70 [1] : vector<16x32xf32> to vector<16xf32>
    %171 = vector.shape_cast %170 : vector<16xf32> to vector<16x1xf32>
    %cst_71 = arith.constant 3.100000e+01 : f32
    %172 = vector.broadcast %cst_71 : f32 to vector<16x1xf32>
    %173 = arith.divf %171, %172 : vector<16x1xf32>
    %174 = math.sqrt %173 : vector<16x1xf32>
    %cst_72 = arith.constant 9.99999997E-7 : f32
    %175 = vector.broadcast %cst_72 : f32 to vector<16x1xf32>
    %176 = arith.addf %174, %175 : vector<16x1xf32>
    %177 = tpu.reciprocal %176 {approx = true} : vector<16x1xf32> -> vector<16x1xf32>
    %178 = vector.broadcast %166 : vector<16x1xf32> to vector<16x32xf32>
    %179 = arith.subf %162, %178 : vector<16x32xf32>
    %180 = vector.broadcast %51 : vector<1x32xf32> to vector<16x32xf32>
    %181 = arith.mulf %180, %179 : vector<16x32xf32>
    %182 = vector.broadcast %177 : vector<16x1xf32> to vector<16x32xf32>
    %183 = arith.mulf %181, %182 : vector<16x32xf32>
    %184 = vector.broadcast %53 : vector<1x32xf32> to vector<16x32xf32>
    %185 = arith.addf %183, %184 : vector<16x32xf32>
    %186 = arith.truncf %185 : vector<16x32xf32> to vector<16x32xbf16>
    %cst_73 = arith.constant dense<0.000000e+00> : vector<16x64xf32>
    %187 = tpu.matmul %186, %41, %cst_73 {dimension_numbers = #tpu.dot_dimension_numbers<[1], [0], [0], [1], [0, 0, 1, 1], [], []>} : vector<16x32xbf16>, vector<32x64xbf16>, vector<16x64xf32> -> vector<16x64xf32>
    %188 = vector.broadcast %55 : vector<1x64xf32> to vector<16x64xf32>
    %189 = arith.addf %187, %188 : vector<16x64xf32>
    %cst_74 = arith.constant 0.000000e+00 : f32
    %190 = vector.broadcast %cst_74 : f32 to vector<16x64xf32>
    %191 = arith.maximumf %189, %190 : vector<16x64xf32>
    %192 = arith.truncf %191 : vector<16x64xf32> to vector<16x64xbf16>
    %cst_75 = arith.constant dense<0.000000e+00> : vector<16x32xf32>
    %193 = tpu.matmul %192, %67, %cst_75 {dimension_numbers = #tpu.dot_dimension_numbers<[1], [0], [0], [1], [0, 0, 1, 1], [], []>} : vector<16x64xbf16>, vector<64x32xbf16>, vector<16x32xf32> -> vector<16x32xf32>
    %194 = vector.broadcast %57 : vector<1x32xf32> to vector<16x32xf32>
    %195 = arith.addf %193, %194 : vector<16x32xf32>
    %196 = arith.addf %162, %195 : vector<16x32xf32>
    %197 = arith.truncf %196 : vector<16x32xf32> to vector<16x32xbf16>
    %cst_76 = arith.constant dense<0.000000e+00> : vector<48x32xf32>
    %198 = tpu.matmul %1, %197, %cst_76 {dimension_numbers = #tpu.dot_dimension_numbers<[1], [0], [0], [1], [0, 0, 1, 1], [], []>} : vector<48x16xbf16>, vector<16x32xbf16>, vector<48x32xf32> -> vector<48x32xf32>
    %199 = vector.extract_strided_slice %198 {offsets = [0, 0], sizes = [16, 32], strides = [1, 1]} : vector<48x32xf32> to vector<16x32xf32>
    %200 = vector.extract_strided_slice %198 {offsets = [16, 0], sizes = [16, 32], strides = [1, 1]} : vector<48x32xf32> to vector<16x32xf32>
    %201 = vector.extract_strided_slice %198 {offsets = [32, 0], sizes = [16, 32], strides = [1, 1]} : vector<48x32xf32> to vector<16x32xf32>
    %202 = tpu.concatenate %199, %200, %201 in 1 : vector<16x32xf32>, vector<16x32xf32>, vector<16x32xf32> -> vector<16x96xf32>
    %203 = arith.truncf %202 : vector<16x96xf32> to vector<16x96xbf16>
    %cst_77 = arith.constant dense<0.000000e+00> : vector<16x32xf32>
    %204 = tpu.matmul %203, %70, %cst_77 {dimension_numbers = #tpu.dot_dimension_numbers<[1], [0], [0], [1], [0, 0, 1, 1], [], []>} : vector<16x96xbf16>, vector<96x32xbf16>, vector<16x32xf32> -> vector<16x32xf32>
    %205 = vector.broadcast %59 : vector<1x32xf32> to vector<16x32xf32>
    %206 = arith.addf %204, %205 : vector<16x32xf32>
    %cst_78 = arith.constant 0.000000e+00 : f32
    %207 = vector.broadcast %cst_78 : f32 to vector<16x32xf32>
    %208 = arith.maximumf %206, %207 : vector<16x32xf32>
    %c0_79 = arith.constant 0 : index
    %c0_80 = arith.constant 0 : index
    %c0_81 = arith.constant 0 : index
    %209 = vector.load %arg3[%c0_79, %c0_80, %c0_81] : memref<2x2x32xf32, #tpu.memory_space<vmem>>, vector<1x1x32xf32>
    %210 = vector.shape_cast %209 : vector<1x1x32xf32> to vector<1x32xf32>
    %211 = vector.broadcast %210 : vector<1x32xf32> to vector<16x32xf32>
    %212 = arith.addf %208, %211 : vector<16x32xf32>
    %213 = arith.truncf %212 : vector<16x32xf32> to vector<16x32xbf16>
    %cst_82 = arith.constant dense<0.000000e+00> : vector<48x32xf32>
    %214 = tpu.matmul %1, %213, %cst_82 {dimension_numbers = #tpu.dot_dimension_numbers<[1], [0], [0], [1], [0, 0, 1, 1], [], []>} : vector<48x16xbf16>, vector<16x32xbf16>, vector<48x32xf32> -> vector<48x32xf32>
    %215 = vector.extract_strided_slice %214 {offsets = [0, 0], sizes = [16, 32], strides = [1, 1]} : vector<48x32xf32> to vector<16x32xf32>
    %216 = vector.extract_strided_slice %214 {offsets = [16, 0], sizes = [16, 32], strides = [1, 1]} : vector<48x32xf32> to vector<16x32xf32>
    %217 = vector.extract_strided_slice %214 {offsets = [32, 0], sizes = [16, 32], strides = [1, 1]} : vector<48x32xf32> to vector<16x32xf32>
    %218 = tpu.concatenate %215, %216, %217 in 1 : vector<16x32xf32>, vector<16x32xf32>, vector<16x32xf32> -> vector<16x96xf32>
    %219 = arith.truncf %218 : vector<16x96xf32> to vector<16x96xbf16>
    %cst_83 = arith.constant dense<0.000000e+00> : vector<16x32xf32>
    %220 = tpu.matmul %219, %73, %cst_83 {dimension_numbers = #tpu.dot_dimension_numbers<[1], [0], [0], [1], [0, 0, 1, 1], [], []>} : vector<16x96xbf16>, vector<96x32xbf16>, vector<16x32xf32> -> vector<16x32xf32>
    %221 = vector.broadcast %61 : vector<1x32xf32> to vector<16x32xf32>
    %222 = arith.addf %220, %221 : vector<16x32xf32>
    %cst_84 = arith.constant 0.000000e+00 : f32
    %223 = vector.broadcast %cst_84 : f32 to vector<16x32xf32>
    %224 = arith.maximumf %222, %223 : vector<16x32xf32>
    %225 = arith.addf %196, %224 : vector<16x32xf32>
    %cst_85 = arith.constant dense<0.000000e+00> : vector<16xf32>
    %226 = vector.multi_reduction <add>, %33, %cst_85 [1] : vector<16x32xf32> to vector<16xf32>
    %227 = vector.shape_cast %226 : vector<16xf32> to vector<16x1xf32>
    %cst_86 = arith.constant 3.200000e+01 : f32
    %228 = vector.broadcast %cst_86 : f32 to vector<16x1xf32>
    %229 = arith.divf %227, %228 : vector<16x1xf32>
    %230 = vector.broadcast %229 : vector<16x1xf32> to vector<16x32xf32>
    %231 = arith.subf %33, %230 : vector<16x32xf32>
    %232 = arith.mulf %231, %231 : vector<16x32xf32>
    %cst_87 = arith.constant dense<0.000000e+00> : vector<16xf32>
    %233 = vector.multi_reduction <add>, %232, %cst_87 [1] : vector<16x32xf32> to vector<16xf32>
    %234 = vector.shape_cast %233 : vector<16xf32> to vector<16x1xf32>
    %cst_88 = arith.constant 3.100000e+01 : f32
    %235 = vector.broadcast %cst_88 : f32 to vector<16x1xf32>
    %236 = arith.divf %234, %235 : vector<16x1xf32>
    %237 = math.sqrt %236 : vector<16x1xf32>
    %cst_89 = arith.constant 9.99999997E-7 : f32
    %238 = vector.broadcast %cst_89 : f32 to vector<16x1xf32>
    %239 = arith.addf %237, %238 : vector<16x1xf32>
    %240 = tpu.reciprocal %239 {approx = true} : vector<16x1xf32> -> vector<16x1xf32>
    %241 = vector.broadcast %229 : vector<16x1xf32> to vector<16x32xf32>
    %242 = arith.subf %33, %241 : vector<16x32xf32>
    %243 = vector.broadcast %43 : vector<1x32xf32> to vector<16x32xf32>
    %244 = arith.mulf %243, %242 : vector<16x32xf32>
    %245 = vector.broadcast %240 : vector<16x1xf32> to vector<16x32xf32>
    %246 = arith.mulf %244, %245 : vector<16x32xf32>
    %247 = vector.broadcast %45 : vector<1x32xf32> to vector<16x32xf32>
    %248 = arith.addf %246, %247 : vector<16x32xf32>
    %249 = arith.truncf %248 : vector<16x32xf32> to vector<16x32xbf16>
    %cst_90 = arith.constant dense<0.000000e+00> : vector<16x96xf32>
    %250 = tpu.matmul %249, %38, %cst_90 {dimension_numbers = #tpu.dot_dimension_numbers<[1], [0], [0], [1], [0, 0, 1, 1], [], []>} : vector<16x32xbf16>, vector<32x96xbf16>, vector<16x96xf32> -> vector<16x96xf32>
    %251 = vector.broadcast %47 : vector<1x96xf32> to vector<16x96xf32>
    %252 = arith.addf %250, %251 : vector<16x96xf32>
    %253 = vector.extract_strided_slice %252 {offsets = [0, 0], sizes = [16, 8], strides = [1, 1]} : vector<16x96xf32> to vector<16x8xf32>
    %254 = vector.extract_strided_slice %252 {offsets = [0, 8], sizes = [16, 8], strides = [1, 1]} : vector<16x96xf32> to vector<16x8xf32>
    %255 = vector.extract_strided_slice %252 {offsets = [0, 16], sizes = [16, 8], strides = [1, 1]} : vector<16x96xf32> to vector<16x8xf32>
    %256 = vector.extract_strided_slice %252 {offsets = [0, 24], sizes = [16, 8], strides = [1, 1]} : vector<16x96xf32> to vector<16x8xf32>
    %257 = vector.shape_cast %253 : vector<16x8xf32> to vector<1x16x8xf32>
    %258 = vector.shape_cast %254 : vector<16x8xf32> to vector<1x16x8xf32>
    %259 = vector.shape_cast %255 : vector<16x8xf32> to vector<1x16x8xf32>
    %260 = vector.shape_cast %256 : vector<16x8xf32> to vector<1x16x8xf32>
    %261 = tpu.concatenate %257, %258, %259, %260 in 0 : vector<1x16x8xf32>, vector<1x16x8xf32>, vector<1x16x8xf32>, vector<1x16x8xf32> -> vector<4x16x8xf32>
    %262 = vector.extract_strided_slice %252 {offsets = [0, 32], sizes = [16, 8], strides = [1, 1]} : vector<16x96xf32> to vector<16x8xf32>
    %263 = vector.extract_strided_slice %252 {offsets = [0, 40], sizes = [16, 8], strides = [1, 1]} : vector<16x96xf32> to vector<16x8xf32>
    %264 = vector.extract_strided_slice %252 {offsets = [0, 48], sizes = [16, 8], strides = [1, 1]} : vector<16x96xf32> to vector<16x8xf32>
    %265 = vector.extract_strided_slice %252 {offsets = [0, 56], sizes = [16, 8], strides = [1, 1]} : vector<16x96xf32> to vector<16x8xf32>
    %266 = vector.shape_cast %262 : vector<16x8xf32> to vector<1x16x8xf32>
    %267 = vector.shape_cast %263 : vector<16x8xf32> to vector<1x16x8xf32>
    %268 = vector.shape_cast %264 : vector<16x8xf32> to vector<1x16x8xf32>
    %269 = vector.shape_cast %265 : vector<16x8xf32> to vector<1x16x8xf32>
    %270 = tpu.concatenate %266, %267, %268, %269 in 0 : vector<1x16x8xf32>, vector<1x16x8xf32>, vector<1x16x8xf32>, vector<1x16x8xf32> -> vector<4x16x8xf32>
    %271 = vector.extract_strided_slice %252 {offsets = [0, 64], sizes = [16, 8], strides = [1, 1]} : vector<16x96xf32> to vector<16x8xf32>
    %272 = vector.extract_strided_slice %252 {offsets = [0, 72], sizes = [16, 8], strides = [1, 1]} : vector<16x96xf32> to vector<16x8xf32>
    %273 = vector.extract_strided_slice %252 {offsets = [0, 80], sizes = [16, 8], strides = [1, 1]} : vector<16x96xf32> to vector<16x8xf32>
    %274 = vector.extract_strided_slice %252 {offsets = [0, 88], sizes = [16, 8], strides = [1, 1]} : vector<16x96xf32> to vector<16x8xf32>
    %275 = vector.shape_cast %271 : vector<16x8xf32> to vector<1x16x8xf32>
    %276 = vector.shape_cast %272 : vector<16x8xf32> to vector<1x16x8xf32>
    %277 = vector.shape_cast %273 : vector<16x8xf32> to vector<1x16x8xf32>
    %278 = vector.shape_cast %274 : vector<16x8xf32> to vector<1x16x8xf32>
    %279 = tpu.concatenate %275, %276, %277, %278 in 0 : vector<1x16x8xf32>, vector<1x16x8xf32>, vector<1x16x8xf32>, vector<1x16x8xf32> -> vector<4x16x8xf32>
    %280 = arith.truncf %261 : vector<4x16x8xf32> to vector<4x16x8xbf16>
    %281 = arith.truncf %270 : vector<4x16x8xf32> to vector<4x16x8xbf16>
    "tpu.trace_start"() <{level = 10 : i32, message = "hqd,hkd->hqk"}> : () -> ()
    %cst_91 = arith.constant dense<0.000000e+00> : vector<4x16x16xf32>
    %282 = tpu.matmul %280, %281, %cst_91 {dimension_numbers = #tpu.dot_dimension_numbers<[2], [2], [1], [1], [0, 0, 0, 1, 1, 1], [0], [0]>} : vector<4x16x8xbf16>, vector<4x16x8xbf16>, vector<4x16x16xf32> -> vector<4x16x16xf32>
    "tpu.trace_stop"() : () -> ()
    %cst_92 = arith.constant 0.353553385 : f32
    %283 = vector.broadcast %cst_92 : f32 to vector<4x16x16xf32>
    %284 = arith.mulf %282, %283 : vector<4x16x16xf32>
    %285 = vector.shape_cast %35 : vector<1x16xf32> to vector<1x1x16xf32>
    %286 = vector.broadcast %285 : vector<1x1x16xf32> to vector<4x16x16xf32>
    %287 = arith.addf %284, %286 : vector<4x16x16xf32>
    %cst_93 = arith.constant dense<0xFF800000> : vector<4x16xf32>
    %288 = vector.multi_reduction <maximumf>, %287, %cst_93 [2] : vector<4x16x16xf32> to vector<4x16xf32>
    %289 = vector.shape_cast %288 : vector<4x16xf32> to vector<4x16x1xf32>
    %290 = vector.broadcast %289 : vector<4x16x1xf32> to vector<4x16x16xf32>
    %291 = arith.subf %287, %290 : vector<4x16x16xf32>
    %292 = math.exp %291 : vector<4x16x16xf32>
    %cst_94 = arith.constant dense<0.000000e+00> : vector<4x16xf32>
    %293 = vector.multi_reduction <add>, %292, %cst_94 [2] : vector<4x16x16xf32> to vector<4x16xf32>
    %294 = vector.shape_cast %293 : vector<4x16xf32> to vector<4x16x1xf32>
    %295 = tpu.reciprocal %294 {approx = true} : vector<4x16x1xf32> -> vector<4x16x1xf32>
    %296 = vector.broadcast %295 : vector<4x16x1xf32> to vector<4x16x16xf32>
    %297 = arith.mulf %292, %296 : vector<4x16x16xf32>
    %298 = arith.truncf %297 : vector<4x16x16xf32> to vector<4x16x16xbf16>
    %299 = arith.truncf %279 : vector<4x16x8xf32> to vector<4x16x8xbf16>
    "tpu.trace_start"() <{level = 10 : i32, message = "hqk,hkd->hqd"}> : () -> ()
    %cst_95 = arith.constant dense<0.000000e+00> : vector<4x16x8xf32>
    %300 = tpu.matmul %298, %299, %cst_95 {dimension_numbers = #tpu.dot_dimension_numbers<[2], [1], [1], [2], [0, 0, 0, 1, 1, 2], [0], [0]>} : vector<4x16x16xbf16>, vector<4x16x8xbf16>, vector<4x16x8xf32> -> vector<4x16x8xf32>
    "tpu.trace_stop"() : () -> ()
    %301 = vector.extract_strided_slice %300 {offsets = [0, 0, 0], sizes = [1, 16, 8], strides = [1, 1, 1]} : vector<4x16x8xf32> to vector<1x16x8xf32>
    %302 = vector.shape_cast %301 : vector<1x16x8xf32> to vector<16x8xf32>
    %303 = vector.extract_strided_slice %300 {offsets = [1, 0, 0], sizes = [1, 16, 8], strides = [1, 1, 1]} : vector<4x16x8xf32> to vector<1x16x8xf32>
    %304 = vector.shape_cast %303 : vector<1x16x8xf32> to vector<16x8xf32>
    %305 = vector.extract_strided_slice %300 {offsets = [2, 0, 0], sizes = [1, 16, 8], strides = [1, 1, 1]} : vector<4x16x8xf32> to vector<1x16x8xf32>
    %306 = vector.shape_cast %305 : vector<1x16x8xf32> to vector<16x8xf32>
    %307 = vector.extract_strided_slice %300 {offsets = [3, 0, 0], sizes = [1, 16, 8], strides = [1, 1, 1]} : vector<4x16x8xf32> to vector<1x16x8xf32>
    %308 = vector.shape_cast %307 : vector<1x16x8xf32> to vector<16x8xf32>
    %309 = tpu.concatenate %302, %304, %306, %308 in 1 : vector<16x8xf32>, vector<16x8xf32>, vector<16x8xf32>, vector<16x8xf32> -> vector<16x32xf32>
    %310 = arith.truncf %309 : vector<16x32xf32> to vector<16x32xbf16>
    %cst_96 = arith.constant dense<0.000000e+00> : vector<16x32xf32>
    %311 = tpu.matmul %310, %64, %cst_96 {dimension_numbers = #tpu.dot_dimension_numbers<[1], [0], [0], [1], [0, 0, 1, 1], [], []>} : vector<16x32xbf16>, vector<32x32xbf16>, vector<16x32xf32> -> vector<16x32xf32>
    %312 = vector.broadcast %49 : vector<1x32xf32> to vector<16x32xf32>
    %313 = arith.addf %311, %312 : vector<16x32xf32>
    %314 = arith.addf %33, %313 : vector<16x32xf32>
    %cst_97 = arith.constant dense<0.000000e+00> : vector<16xf32>
    %315 = vector.multi_reduction <add>, %314, %cst_97 [1] : vector<16x32xf32> to vector<16xf32>
    %316 = vector.shape_cast %315 : vector<16xf32> to vector<16x1xf32>
    %cst_98 = arith.constant 3.200000e+01 : f32
    %317 = vector.broadcast %cst_98 : f32 to vector<16x1xf32>
    %318 = arith.divf %316, %317 : vector<16x1xf32>
    %319 = vector.broadcast %318 : vector<16x1xf32> to vector<16x32xf32>
    %320 = arith.subf %314, %319 : vector<16x32xf32>
    %321 = arith.mulf %320, %320 : vector<16x32xf32>
    %cst_99 = arith.constant dense<0.000000e+00> : vector<16xf32>
    %322 = vector.multi_reduction <add>, %321, %cst_99 [1] : vector<16x32xf32> to vector<16xf32>
    %323 = vector.shape_cast %322 : vector<16xf32> to vector<16x1xf32>
    %cst_100 = arith.constant 3.100000e+01 : f32
    %324 = vector.broadcast %cst_100 : f32 to vector<16x1xf32>
    %325 = arith.divf %323, %324 : vector<16x1xf32>
    %326 = math.sqrt %325 : vector<16x1xf32>
    %cst_101 = arith.constant 9.99999997E-7 : f32
    %327 = vector.broadcast %cst_101 : f32 to vector<16x1xf32>
    %328 = arith.addf %326, %327 : vector<16x1xf32>
    %329 = tpu.reciprocal %328 {approx = true} : vector<16x1xf32> -> vector<16x1xf32>
    %330 = vector.broadcast %318 : vector<16x1xf32> to vector<16x32xf32>
    %331 = arith.subf %314, %330 : vector<16x32xf32>
    %332 = vector.broadcast %51 : vector<1x32xf32> to vector<16x32xf32>
    %333 = arith.mulf %332, %331 : vector<16x32xf32>
    %334 = vector.broadcast %329 : vector<16x1xf32> to vector<16x32xf32>
    %335 = arith.mulf %333, %334 : vector<16x32xf32>
    %336 = vector.broadcast %53 : vector<1x32xf32> to vector<16x32xf32>
    %337 = arith.addf %335, %336 : vector<16x32xf32>
    %338 = arith.truncf %337 : vector<16x32xf32> to vector<16x32xbf16>
    %cst_102 = arith.constant dense<0.000000e+00> : vector<16x64xf32>
    %339 = tpu.matmul %338, %41, %cst_102 {dimension_numbers = #tpu.dot_dimension_numbers<[1], [0], [0], [1], [0, 0, 1, 1], [], []>} : vector<16x32xbf16>, vector<32x64xbf16>, vector<16x64xf32> -> vector<16x64xf32>
    %340 = vector.broadcast %55 : vector<1x64xf32> to vector<16x64xf32>
    %341 = arith.addf %339, %340 : vector<16x64xf32>
    %cst_103 = arith.constant 0.000000e+00 : f32
    %342 = vector.broadcast %cst_103 : f32 to vector<16x64xf32>
    %343 = arith.maximumf %341, %342 : vector<16x64xf32>
    %344 = arith.truncf %343 : vector<16x64xf32> to vector<16x64xbf16>
    %cst_104 = arith.constant dense<0.000000e+00> : vector<16x32xf32>
    %345 = tpu.matmul %344, %67, %cst_104 {dimension_numbers = #tpu.dot_dimension_numbers<[1], [0], [0], [1], [0, 0, 1, 1], [], []>} : vector<16x64xbf16>, vector<64x32xbf16>, vector<16x32xf32> -> vector<16x32xf32>
    %346 = vector.broadcast %57 : vector<1x32xf32> to vector<16x32xf32>
    %347 = arith.addf %345, %346 : vector<16x32xf32>
    %348 = arith.addf %314, %347 : vector<16x32xf32>
    %349 = arith.truncf %348 : vector<16x32xf32> to vector<16x32xbf16>
    %cst_105 = arith.constant dense<0.000000e+00> : vector<48x32xf32>
    %350 = tpu.matmul %1, %349, %cst_105 {dimension_numbers = #tpu.dot_dimension_numbers<[1], [0], [0], [1], [0, 0, 1, 1], [], []>} : vector<48x16xbf16>, vector<16x32xbf16>, vector<48x32xf32> -> vector<48x32xf32>
    %351 = vector.extract_strided_slice %350 {offsets = [0, 0], sizes = [16, 32], strides = [1, 1]} : vector<48x32xf32> to vector<16x32xf32>
    %352 = vector.extract_strided_slice %350 {offsets = [16, 0], sizes = [16, 32], strides = [1, 1]} : vector<48x32xf32> to vector<16x32xf32>
    %353 = vector.extract_strided_slice %350 {offsets = [32, 0], sizes = [16, 32], strides = [1, 1]} : vector<48x32xf32> to vector<16x32xf32>
    %354 = tpu.concatenate %351, %352, %353 in 1 : vector<16x32xf32>, vector<16x32xf32>, vector<16x32xf32> -> vector<16x96xf32>
    %355 = arith.truncf %354 : vector<16x96xf32> to vector<16x96xbf16>
    %cst_106 = arith.constant dense<0.000000e+00> : vector<16x32xf32>
    %356 = tpu.matmul %355, %70, %cst_106 {dimension_numbers = #tpu.dot_dimension_numbers<[1], [0], [0], [1], [0, 0, 1, 1], [], []>} : vector<16x96xbf16>, vector<96x32xbf16>, vector<16x32xf32> -> vector<16x32xf32>
    %357 = vector.broadcast %59 : vector<1x32xf32> to vector<16x32xf32>
    %358 = arith.addf %356, %357 : vector<16x32xf32>
    %cst_107 = arith.constant 0.000000e+00 : f32
    %359 = vector.broadcast %cst_107 : f32 to vector<16x32xf32>
    %360 = arith.maximumf %358, %359 : vector<16x32xf32>
    %c1_108 = arith.constant 1 : index
    %c0_109 = arith.constant 0 : index
    %c0_110 = arith.constant 0 : index
    %361 = vector.load %arg3[%c1_108, %c0_109, %c0_110] : memref<2x2x32xf32, #tpu.memory_space<vmem>>, vector<1x1x32xf32>
    %362 = vector.shape_cast %361 : vector<1x1x32xf32> to vector<1x32xf32>
    %363 = vector.broadcast %362 : vector<1x32xf32> to vector<16x32xf32>
    %364 = arith.addf %360, %363 : vector<16x32xf32>
    %365 = arith.truncf %364 : vector<16x32xf32> to vector<16x32xbf16>
    %cst_111 = arith.constant dense<0.000000e+00> : vector<48x32xf32>
    %366 = tpu.matmul %1, %365, %cst_111 {dimension_numbers = #tpu.dot_dimension_numbers<[1], [0], [0], [1], [0, 0, 1, 1], [], []>} : vector<48x16xbf16>, vector<16x32xbf16>, vector<48x32xf32> -> vector<48x32xf32>
    %367 = vector.extract_strided_slice %366 {offsets = [0, 0], sizes = [16, 32], strides = [1, 1]} : vector<48x32xf32> to vector<16x32xf32>
    %368 = vector.extract_strided_slice %366 {offsets = [16, 0], sizes = [16, 32], strides = [1, 1]} : vector<48x32xf32> to vector<16x32xf32>
    %369 = vector.extract_strided_slice %366 {offsets = [32, 0], sizes = [16, 32], strides = [1, 1]} : vector<48x32xf32> to vector<16x32xf32>
    %370 = tpu.concatenate %367, %368, %369 in 1 : vector<16x32xf32>, vector<16x32xf32>, vector<16x32xf32> -> vector<16x96xf32>
    %371 = arith.truncf %370 : vector<16x96xf32> to vector<16x96xbf16>
    %cst_112 = arith.constant dense<0.000000e+00> : vector<16x32xf32>
    %372 = tpu.matmul %371, %73, %cst_112 {dimension_numbers = #tpu.dot_dimension_numbers<[1], [0], [0], [1], [0, 0, 1, 1], [], []>} : vector<16x96xbf16>, vector<96x32xbf16>, vector<16x32xf32> -> vector<16x32xf32>
    %373 = vector.broadcast %61 : vector<1x32xf32> to vector<16x32xf32>
    %374 = arith.addf %372, %373 : vector<16x32xf32>
    %cst_113 = arith.constant 0.000000e+00 : f32
    %375 = vector.broadcast %cst_113 : f32 to vector<16x32xf32>
    %376 = arith.maximumf %374, %375 : vector<16x32xf32>
    %377 = arith.addf %348, %376 : vector<16x32xf32>
    %c1_114 = arith.constant 1 : index
    %c0_115 = arith.constant 0 : index
    %c0_116 = arith.constant 0 : index
    %378 = vector.load %arg5[%c1_114, %c0_115, %c0_116] : memref<2x74x96xf32, #tpu.memory_space<vmem>>, vector<1x32x96xf32>
    %379 = vector.shape_cast %378 : vector<1x32x96xf32> to vector<32x96xf32>
    %380 = arith.truncf %379 : vector<32x96xf32> to vector<32x96xbf16>
    %c1_117 = arith.constant 1 : index
    %c32_118 = arith.constant 32 : index
    %c0_119 = arith.constant 0 : index
    %381 = vector.load %arg5[%c1_117, %c32_118, %c0_119] : memref<2x74x96xf32, #tpu.memory_space<vmem>>, vector<1x32x64xf32>
    %382 = vector.shape_cast %381 : vector<1x32x64xf32> to vector<32x64xf32>
    %383 = arith.truncf %382 : vector<32x64xf32> to vector<32x64xbf16>
    %c1_120 = arith.constant 1 : index
    %c64_121 = arith.constant 64 : index
    %c0_122 = arith.constant 0 : index
    %384 = vector.load %arg5[%c1_120, %c64_121, %c0_122] : memref<2x74x96xf32, #tpu.memory_space<vmem>>, vector<1x1x32xf32>
    %385 = vector.shape_cast %384 : vector<1x1x32xf32> to vector<1x32xf32>
    %c1_123 = arith.constant 1 : index
    %c65_124 = arith.constant 65 : index
    %c0_125 = arith.constant 0 : index
    %386 = vector.load %arg5[%c1_123, %c65_124, %c0_125] : memref<2x74x96xf32, #tpu.memory_space<vmem>>, vector<1x1x32xf32>
    %387 = vector.shape_cast %386 : vector<1x1x32xf32> to vector<1x32xf32>
    %c1_126 = arith.constant 1 : index
    %c66_127 = arith.constant 66 : index
    %c0_128 = arith.constant 0 : index
    %388 = vector.load %arg5[%c1_126, %c66_127, %c0_128] : memref<2x74x96xf32, #tpu.memory_space<vmem>>, vector<1x1x96xf32>
    %389 = vector.shape_cast %388 : vector<1x1x96xf32> to vector<1x96xf32>
    %c1_129 = arith.constant 1 : index
    %c67_130 = arith.constant 67 : index
    %c0_131 = arith.constant 0 : index
    %390 = vector.load %arg5[%c1_129, %c67_130, %c0_131] : memref<2x74x96xf32, #tpu.memory_space<vmem>>, vector<1x1x32xf32>
    %391 = vector.shape_cast %390 : vector<1x1x32xf32> to vector<1x32xf32>
    %c1_132 = arith.constant 1 : index
    %c68_133 = arith.constant 68 : index
    %c0_134 = arith.constant 0 : index
    %392 = vector.load %arg5[%c1_132, %c68_133, %c0_134] : memref<2x74x96xf32, #tpu.memory_space<vmem>>, vector<1x1x32xf32>
    %393 = vector.shape_cast %392 : vector<1x1x32xf32> to vector<1x32xf32>
    %c1_135 = arith.constant 1 : index
    %c69_136 = arith.constant 69 : index
    %c0_137 = arith.constant 0 : index
    %394 = vector.load %arg5[%c1_135, %c69_136, %c0_137] : memref<2x74x96xf32, #tpu.memory_space<vmem>>, vector<1x1x32xf32>
    %395 = vector.shape_cast %394 : vector<1x1x32xf32> to vector<1x32xf32>
    %c1_138 = arith.constant 1 : index
    %c70_139 = arith.constant 70 : index
    %c0_140 = arith.constant 0 : index
    %396 = vector.load %arg5[%c1_138, %c70_139, %c0_140] : memref<2x74x96xf32, #tpu.memory_space<vmem>>, vector<1x1x64xf32>
    %397 = vector.shape_cast %396 : vector<1x1x64xf32> to vector<1x64xf32>
    %c1_141 = arith.constant 1 : index
    %c71_142 = arith.constant 71 : index
    %c0_143 = arith.constant 0 : index
    %398 = vector.load %arg5[%c1_141, %c71_142, %c0_143] : memref<2x74x96xf32, #tpu.memory_space<vmem>>, vector<1x1x32xf32>
    %399 = vector.shape_cast %398 : vector<1x1x32xf32> to vector<1x32xf32>
    %c1_144 = arith.constant 1 : index
    %c72_145 = arith.constant 72 : index
    %c0_146 = arith.constant 0 : index
    %400 = vector.load %arg5[%c1_144, %c72_145, %c0_146] : memref<2x74x96xf32, #tpu.memory_space<vmem>>, vector<1x1x32xf32>
    %401 = vector.shape_cast %400 : vector<1x1x32xf32> to vector<1x32xf32>
    %c1_147 = arith.constant 1 : index
    %c73_148 = arith.constant 73 : index
    %c0_149 = arith.constant 0 : index
    %402 = vector.load %arg5[%c1_147, %c73_148, %c0_149] : memref<2x74x96xf32, #tpu.memory_space<vmem>>, vector<1x1x32xf32>
    %403 = vector.shape_cast %402 : vector<1x1x32xf32> to vector<1x32xf32>
    %c1_150 = arith.constant 1 : index
    %c0_151 = arith.constant 0 : index
    %c0_152 = arith.constant 0 : index
    %404 = vector.load %arg6[%c1_150, %c0_151, %c0_152] : memref<2x288x32xf32, #tpu.memory_space<vmem>>, vector<1x32x32xf32>
    %405 = vector.shape_cast %404 : vector<1x32x32xf32> to vector<32x32xf32>
    %406 = arith.truncf %405 : vector<32x32xf32> to vector<32x32xbf16>
    %c1_153 = arith.constant 1 : index
    %c32_154 = arith.constant 32 : index
    %c0_155 = arith.constant 0 : index
    %407 = vector.load %arg6[%c1_153, %c32_154, %c0_155] : memref<2x288x32xf32, #tpu.memory_space<vmem>>, vector<1x64x32xf32>
    %408 = vector.shape_cast %407 : vector<1x64x32xf32> to vector<64x32xf32>
    %409 = arith.truncf %408 : vector<64x32xf32> to vector<64x32xbf16>
    %c1_156 = arith.constant 1 : index
    %c96_157 = arith.constant 96 : index
    %c0_158 = arith.constant 0 : index
    %410 = vector.load %arg6[%c1_156, %c96_157, %c0_158] : memref<2x288x32xf32, #tpu.memory_space<vmem>>, vector<1x96x32xf32>
    %411 = vector.shape_cast %410 : vector<1x96x32xf32> to vector<96x32xf32>
    %412 = arith.truncf %411 : vector<96x32xf32> to vector<96x32xbf16>
    %c1_159 = arith.constant 1 : index
    %c192_160 = arith.constant 192 : index
    %c0_161 = arith.constant 0 : index
    %413 = vector.load %arg6[%c1_159, %c192_160, %c0_161] : memref<2x288x32xf32, #tpu.memory_space<vmem>>, vector<1x96x32xf32>
    %414 = vector.shape_cast %413 : vector<1x96x32xf32> to vector<96x32xf32>
    %415 = arith.truncf %414 : vector<96x32xf32> to vector<96x32xbf16>
    %cst_162 = arith.constant dense<0.000000e+00> : vector<16xf32>
    %416 = vector.multi_reduction <add>, %225, %cst_162 [1] : vector<16x32xf32> to vector<16xf32>
    %417 = vector.shape_cast %416 : vector<16xf32> to vector<16x1xf32>
    %cst_163 = arith.constant 3.200000e+01 : f32
    %418 = vector.broadcast %cst_163 : f32 to vector<16x1xf32>
    %419 = arith.divf %417, %418 : vector<16x1xf32>
    %420 = vector.broadcast %419 : vector<16x1xf32> to vector<16x32xf32>
    %421 = arith.subf %225, %420 : vector<16x32xf32>
    %422 = arith.mulf %421, %421 : vector<16x32xf32>
    %cst_164 = arith.constant dense<0.000000e+00> : vector<16xf32>
    %423 = vector.multi_reduction <add>, %422, %cst_164 [1] : vector<16x32xf32> to vector<16xf32>
    %424 = vector.shape_cast %423 : vector<16xf32> to vector<16x1xf32>
    %cst_165 = arith.constant 3.100000e+01 : f32
    %425 = vector.broadcast %cst_165 : f32 to vector<16x1xf32>
    %426 = arith.divf %424, %425 : vector<16x1xf32>
    %427 = math.sqrt %426 : vector<16x1xf32>
    %cst_166 = arith.constant 9.99999997E-7 : f32
    %428 = vector.broadcast %cst_166 : f32 to vector<16x1xf32>
    %429 = arith.addf %427, %428 : vector<16x1xf32>
    %430 = tpu.reciprocal %429 {approx = true} : vector<16x1xf32> -> vector<16x1xf32>
    %431 = vector.broadcast %419 : vector<16x1xf32> to vector<16x32xf32>
    %432 = arith.subf %225, %431 : vector<16x32xf32>
    %433 = vector.broadcast %385 : vector<1x32xf32> to vector<16x32xf32>
    %434 = arith.mulf %433, %432 : vector<16x32xf32>
    %435 = vector.broadcast %430 : vector<16x1xf32> to vector<16x32xf32>
    %436 = arith.mulf %434, %435 : vector<16x32xf32>
    %437 = vector.broadcast %387 : vector<1x32xf32> to vector<16x32xf32>
    %438 = arith.addf %436, %437 : vector<16x32xf32>
    %439 = arith.truncf %438 : vector<16x32xf32> to vector<16x32xbf16>
    %cst_167 = arith.constant dense<0.000000e+00> : vector<16x96xf32>
    %440 = tpu.matmul %439, %380, %cst_167 {dimension_numbers = #tpu.dot_dimension_numbers<[1], [0], [0], [1], [0, 0, 1, 1], [], []>} : vector<16x32xbf16>, vector<32x96xbf16>, vector<16x96xf32> -> vector<16x96xf32>
    %441 = vector.broadcast %389 : vector<1x96xf32> to vector<16x96xf32>
    %442 = arith.addf %440, %441 : vector<16x96xf32>
    %443 = vector.extract_strided_slice %442 {offsets = [0, 0], sizes = [16, 8], strides = [1, 1]} : vector<16x96xf32> to vector<16x8xf32>
    %444 = vector.extract_strided_slice %442 {offsets = [0, 8], sizes = [16, 8], strides = [1, 1]} : vector<16x96xf32> to vector<16x8xf32>
    %445 = vector.extract_strided_slice %442 {offsets = [0, 16], sizes = [16, 8], strides = [1, 1]} : vector<16x96xf32> to vector<16x8xf32>
    %446 = vector.extract_strided_slice %442 {offsets = [0, 24], sizes = [16, 8], strides = [1, 1]} : vector<16x96xf32> to vector<16x8xf32>
    %447 = vector.shape_cast %443 : vector<16x8xf32> to vector<1x16x8xf32>
    %448 = vector.shape_cast %444 : vector<16x8xf32> to vector<1x16x8xf32>
    %449 = vector.shape_cast %445 : vector<16x8xf32> to vector<1x16x8xf32>
    %450 = vector.shape_cast %446 : vector<16x8xf32> to vector<1x16x8xf32>
    %451 = tpu.concatenate %447, %448, %449, %450 in 0 : vector<1x16x8xf32>, vector<1x16x8xf32>, vector<1x16x8xf32>, vector<1x16x8xf32> -> vector<4x16x8xf32>
    %452 = vector.extract_strided_slice %442 {offsets = [0, 32], sizes = [16, 8], strides = [1, 1]} : vector<16x96xf32> to vector<16x8xf32>
    %453 = vector.extract_strided_slice %442 {offsets = [0, 40], sizes = [16, 8], strides = [1, 1]} : vector<16x96xf32> to vector<16x8xf32>
    %454 = vector.extract_strided_slice %442 {offsets = [0, 48], sizes = [16, 8], strides = [1, 1]} : vector<16x96xf32> to vector<16x8xf32>
    %455 = vector.extract_strided_slice %442 {offsets = [0, 56], sizes = [16, 8], strides = [1, 1]} : vector<16x96xf32> to vector<16x8xf32>
    %456 = vector.shape_cast %452 : vector<16x8xf32> to vector<1x16x8xf32>
    %457 = vector.shape_cast %453 : vector<16x8xf32> to vector<1x16x8xf32>
    %458 = vector.shape_cast %454 : vector<16x8xf32> to vector<1x16x8xf32>
    %459 = vector.shape_cast %455 : vector<16x8xf32> to vector<1x16x8xf32>
    %460 = tpu.concatenate %456, %457, %458, %459 in 0 : vector<1x16x8xf32>, vector<1x16x8xf32>, vector<1x16x8xf32>, vector<1x16x8xf32> -> vector<4x16x8xf32>
    %461 = vector.extract_strided_slice %442 {offsets = [0, 64], sizes = [16, 8], strides = [1, 1]} : vector<16x96xf32> to vector<16x8xf32>
    %462 = vector.extract_strided_slice %442 {offsets = [0, 72], sizes = [16, 8], strides = [1, 1]} : vector<16x96xf32> to vector<16x8xf32>
    %463 = vector.extract_strided_slice %442 {offsets = [0, 80], sizes = [16, 8], strides = [1, 1]} : vector<16x96xf32> to vector<16x8xf32>
    %464 = vector.extract_strided_slice %442 {offsets = [0, 88], sizes = [16, 8], strides = [1, 1]} : vector<16x96xf32> to vector<16x8xf32>
    %465 = vector.shape_cast %461 : vector<16x8xf32> to vector<1x16x8xf32>
    %466 = vector.shape_cast %462 : vector<16x8xf32> to vector<1x16x8xf32>
    %467 = vector.shape_cast %463 : vector<16x8xf32> to vector<1x16x8xf32>
    %468 = vector.shape_cast %464 : vector<16x8xf32> to vector<1x16x8xf32>
    %469 = tpu.concatenate %465, %466, %467, %468 in 0 : vector<1x16x8xf32>, vector<1x16x8xf32>, vector<1x16x8xf32>, vector<1x16x8xf32> -> vector<4x16x8xf32>
    %470 = arith.truncf %451 : vector<4x16x8xf32> to vector<4x16x8xbf16>
    %471 = arith.truncf %460 : vector<4x16x8xf32> to vector<4x16x8xbf16>
    "tpu.trace_start"() <{level = 10 : i32, message = "hqd,hkd->hqk"}> : () -> ()
    %cst_168 = arith.constant dense<0.000000e+00> : vector<4x16x16xf32>
    %472 = tpu.matmul %470, %471, %cst_168 {dimension_numbers = #tpu.dot_dimension_numbers<[2], [2], [1], [1], [0, 0, 0, 1, 1, 1], [0], [0]>} : vector<4x16x8xbf16>, vector<4x16x8xbf16>, vector<4x16x16xf32> -> vector<4x16x16xf32>
    "tpu.trace_stop"() : () -> ()
    %cst_169 = arith.constant 0.353553385 : f32
    %473 = vector.broadcast %cst_169 : f32 to vector<4x16x16xf32>
    %474 = arith.mulf %472, %473 : vector<4x16x16xf32>
    %475 = vector.shape_cast %21 : vector<1x16xf32> to vector<1x1x16xf32>
    %476 = vector.broadcast %475 : vector<1x1x16xf32> to vector<4x16x16xf32>
    %477 = arith.addf %474, %476 : vector<4x16x16xf32>
    %cst_170 = arith.constant dense<0xFF800000> : vector<4x16xf32>
    %478 = vector.multi_reduction <maximumf>, %477, %cst_170 [2] : vector<4x16x16xf32> to vector<4x16xf32>
    %479 = vector.shape_cast %478 : vector<4x16xf32> to vector<4x16x1xf32>
    %480 = vector.broadcast %479 : vector<4x16x1xf32> to vector<4x16x16xf32>
    %481 = arith.subf %477, %480 : vector<4x16x16xf32>
    %482 = math.exp %481 : vector<4x16x16xf32>
    %cst_171 = arith.constant dense<0.000000e+00> : vector<4x16xf32>
    %483 = vector.multi_reduction <add>, %482, %cst_171 [2] : vector<4x16x16xf32> to vector<4x16xf32>
    %484 = vector.shape_cast %483 : vector<4x16xf32> to vector<4x16x1xf32>
    %485 = tpu.reciprocal %484 {approx = true} : vector<4x16x1xf32> -> vector<4x16x1xf32>
    %486 = vector.broadcast %485 : vector<4x16x1xf32> to vector<4x16x16xf32>
    %487 = arith.mulf %482, %486 : vector<4x16x16xf32>
    %488 = arith.truncf %487 : vector<4x16x16xf32> to vector<4x16x16xbf16>
    %489 = arith.truncf %469 : vector<4x16x8xf32> to vector<4x16x8xbf16>
    "tpu.trace_start"() <{level = 10 : i32, message = "hqk,hkd->hqd"}> : () -> ()
    %cst_172 = arith.constant dense<0.000000e+00> : vector<4x16x8xf32>
    %490 = tpu.matmul %488, %489, %cst_172 {dimension_numbers = #tpu.dot_dimension_numbers<[2], [1], [1], [2], [0, 0, 0, 1, 1, 2], [0], [0]>} : vector<4x16x16xbf16>, vector<4x16x8xbf16>, vector<4x16x8xf32> -> vector<4x16x8xf32>
    "tpu.trace_stop"() : () -> ()
    %491 = vector.extract_strided_slice %490 {offsets = [0, 0, 0], sizes = [1, 16, 8], strides = [1, 1, 1]} : vector<4x16x8xf32> to vector<1x16x8xf32>
    %492 = vector.shape_cast %491 : vector<1x16x8xf32> to vector<16x8xf32>
    %493 = vector.extract_strided_slice %490 {offsets = [1, 0, 0], sizes = [1, 16, 8], strides = [1, 1, 1]} : vector<4x16x8xf32> to vector<1x16x8xf32>
    %494 = vector.shape_cast %493 : vector<1x16x8xf32> to vector<16x8xf32>
    %495 = vector.extract_strided_slice %490 {offsets = [2, 0, 0], sizes = [1, 16, 8], strides = [1, 1, 1]} : vector<4x16x8xf32> to vector<1x16x8xf32>
    %496 = vector.shape_cast %495 : vector<1x16x8xf32> to vector<16x8xf32>
    %497 = vector.extract_strided_slice %490 {offsets = [3, 0, 0], sizes = [1, 16, 8], strides = [1, 1, 1]} : vector<4x16x8xf32> to vector<1x16x8xf32>
    %498 = vector.shape_cast %497 : vector<1x16x8xf32> to vector<16x8xf32>
    %499 = tpu.concatenate %492, %494, %496, %498 in 1 : vector<16x8xf32>, vector<16x8xf32>, vector<16x8xf32>, vector<16x8xf32> -> vector<16x32xf32>
    %500 = arith.truncf %499 : vector<16x32xf32> to vector<16x32xbf16>
    %cst_173 = arith.constant dense<0.000000e+00> : vector<16x32xf32>
    %501 = tpu.matmul %500, %406, %cst_173 {dimension_numbers = #tpu.dot_dimension_numbers<[1], [0], [0], [1], [0, 0, 1, 1], [], []>} : vector<16x32xbf16>, vector<32x32xbf16>, vector<16x32xf32> -> vector<16x32xf32>
    %502 = vector.broadcast %391 : vector<1x32xf32> to vector<16x32xf32>
    %503 = arith.addf %501, %502 : vector<16x32xf32>
    %504 = arith.addf %225, %503 : vector<16x32xf32>
    %cst_174 = arith.constant dense<0.000000e+00> : vector<16xf32>
    %505 = vector.multi_reduction <add>, %504, %cst_174 [1] : vector<16x32xf32> to vector<16xf32>
    %506 = vector.shape_cast %505 : vector<16xf32> to vector<16x1xf32>
    %cst_175 = arith.constant 3.200000e+01 : f32
    %507 = vector.broadcast %cst_175 : f32 to vector<16x1xf32>
    %508 = arith.divf %506, %507 : vector<16x1xf32>
    %509 = vector.broadcast %508 : vector<16x1xf32> to vector<16x32xf32>
    %510 = arith.subf %504, %509 : vector<16x32xf32>
    %511 = arith.mulf %510, %510 : vector<16x32xf32>
    %cst_176 = arith.constant dense<0.000000e+00> : vector<16xf32>
    %512 = vector.multi_reduction <add>, %511, %cst_176 [1] : vector<16x32xf32> to vector<16xf32>
    %513 = vector.shape_cast %512 : vector<16xf32> to vector<16x1xf32>
    %cst_177 = arith.constant 3.100000e+01 : f32
    %514 = vector.broadcast %cst_177 : f32 to vector<16x1xf32>
    %515 = arith.divf %513, %514 : vector<16x1xf32>
    %516 = math.sqrt %515 : vector<16x1xf32>
    %cst_178 = arith.constant 9.99999997E-7 : f32
    %517 = vector.broadcast %cst_178 : f32 to vector<16x1xf32>
    %518 = arith.addf %516, %517 : vector<16x1xf32>
    %519 = tpu.reciprocal %518 {approx = true} : vector<16x1xf32> -> vector<16x1xf32>
    %520 = vector.broadcast %508 : vector<16x1xf32> to vector<16x32xf32>
    %521 = arith.subf %504, %520 : vector<16x32xf32>
    %522 = vector.broadcast %393 : vector<1x32xf32> to vector<16x32xf32>
    %523 = arith.mulf %522, %521 : vector<16x32xf32>
    %524 = vector.broadcast %519 : vector<16x1xf32> to vector<16x32xf32>
    %525 = arith.mulf %523, %524 : vector<16x32xf32>
    %526 = vector.broadcast %395 : vector<1x32xf32> to vector<16x32xf32>
    %527 = arith.addf %525, %526 : vector<16x32xf32>
    %528 = arith.truncf %527 : vector<16x32xf32> to vector<16x32xbf16>
    %cst_179 = arith.constant dense<0.000000e+00> : vector<16x64xf32>
    %529 = tpu.matmul %528, %383, %cst_179 {dimension_numbers = #tpu.dot_dimension_numbers<[1], [0], [0], [1], [0, 0, 1, 1], [], []>} : vector<16x32xbf16>, vector<32x64xbf16>, vector<16x64xf32> -> vector<16x64xf32>
    %530 = vector.broadcast %397 : vector<1x64xf32> to vector<16x64xf32>
    %531 = arith.addf %529, %530 : vector<16x64xf32>
    %cst_180 = arith.constant 0.000000e+00 : f32
    %532 = vector.broadcast %cst_180 : f32 to vector<16x64xf32>
    %533 = arith.maximumf %531, %532 : vector<16x64xf32>
    %534 = arith.truncf %533 : vector<16x64xf32> to vector<16x64xbf16>
    %cst_181 = arith.constant dense<0.000000e+00> : vector<16x32xf32>
    %535 = tpu.matmul %534, %409, %cst_181 {dimension_numbers = #tpu.dot_dimension_numbers<[1], [0], [0], [1], [0, 0, 1, 1], [], []>} : vector<16x64xbf16>, vector<64x32xbf16>, vector<16x32xf32> -> vector<16x32xf32>
    %536 = vector.broadcast %399 : vector<1x32xf32> to vector<16x32xf32>
    %537 = arith.addf %535, %536 : vector<16x32xf32>
    %538 = arith.addf %504, %537 : vector<16x32xf32>
    %539 = arith.truncf %538 : vector<16x32xf32> to vector<16x32xbf16>
    %cst_182 = arith.constant dense<0.000000e+00> : vector<48x32xf32>
    %540 = tpu.matmul %1, %539, %cst_182 {dimension_numbers = #tpu.dot_dimension_numbers<[1], [0], [0], [1], [0, 0, 1, 1], [], []>} : vector<48x16xbf16>, vector<16x32xbf16>, vector<48x32xf32> -> vector<48x32xf32>
    %541 = vector.extract_strided_slice %540 {offsets = [0, 0], sizes = [16, 32], strides = [1, 1]} : vector<48x32xf32> to vector<16x32xf32>
    %542 = vector.extract_strided_slice %540 {offsets = [16, 0], sizes = [16, 32], strides = [1, 1]} : vector<48x32xf32> to vector<16x32xf32>
    %543 = vector.extract_strided_slice %540 {offsets = [32, 0], sizes = [16, 32], strides = [1, 1]} : vector<48x32xf32> to vector<16x32xf32>
    %544 = tpu.concatenate %541, %542, %543 in 1 : vector<16x32xf32>, vector<16x32xf32>, vector<16x32xf32> -> vector<16x96xf32>
    %545 = arith.truncf %544 : vector<16x96xf32> to vector<16x96xbf16>
    %cst_183 = arith.constant dense<0.000000e+00> : vector<16x32xf32>
    %546 = tpu.matmul %545, %412, %cst_183 {dimension_numbers = #tpu.dot_dimension_numbers<[1], [0], [0], [1], [0, 0, 1, 1], [], []>} : vector<16x96xbf16>, vector<96x32xbf16>, vector<16x32xf32> -> vector<16x32xf32>
    %547 = vector.broadcast %401 : vector<1x32xf32> to vector<16x32xf32>
    %548 = arith.addf %546, %547 : vector<16x32xf32>
    %cst_184 = arith.constant 0.000000e+00 : f32
    %549 = vector.broadcast %cst_184 : f32 to vector<16x32xf32>
    %550 = arith.maximumf %548, %549 : vector<16x32xf32>
    %c0_185 = arith.constant 0 : index
    %c1_186 = arith.constant 1 : index
    %c0_187 = arith.constant 0 : index
    %551 = vector.load %arg3[%c0_185, %c1_186, %c0_187] : memref<2x2x32xf32, #tpu.memory_space<vmem>>, vector<1x1x32xf32>
    %552 = vector.shape_cast %551 : vector<1x1x32xf32> to vector<1x32xf32>
    %553 = vector.broadcast %552 : vector<1x32xf32> to vector<16x32xf32>
    %554 = arith.addf %550, %553 : vector<16x32xf32>
    %555 = arith.truncf %554 : vector<16x32xf32> to vector<16x32xbf16>
    %cst_188 = arith.constant dense<0.000000e+00> : vector<48x32xf32>
    %556 = tpu.matmul %1, %555, %cst_188 {dimension_numbers = #tpu.dot_dimension_numbers<[1], [0], [0], [1], [0, 0, 1, 1], [], []>} : vector<48x16xbf16>, vector<16x32xbf16>, vector<48x32xf32> -> vector<48x32xf32>
    %557 = vector.extract_strided_slice %556 {offsets = [0, 0], sizes = [16, 32], strides = [1, 1]} : vector<48x32xf32> to vector<16x32xf32>
    %558 = vector.extract_strided_slice %556 {offsets = [16, 0], sizes = [16, 32], strides = [1, 1]} : vector<48x32xf32> to vector<16x32xf32>
    %559 = vector.extract_strided_slice %556 {offsets = [32, 0], sizes = [16, 32], strides = [1, 1]} : vector<48x32xf32> to vector<16x32xf32>
    %560 = tpu.concatenate %557, %558, %559 in 1 : vector<16x32xf32>, vector<16x32xf32>, vector<16x32xf32> -> vector<16x96xf32>
    %561 = arith.truncf %560 : vector<16x96xf32> to vector<16x96xbf16>
    %cst_189 = arith.constant dense<0.000000e+00> : vector<16x32xf32>
    %562 = tpu.matmul %561, %415, %cst_189 {dimension_numbers = #tpu.dot_dimension_numbers<[1], [0], [0], [1], [0, 0, 1, 1], [], []>} : vector<16x96xbf16>, vector<96x32xbf16>, vector<16x32xf32> -> vector<16x32xf32>
    %563 = vector.broadcast %403 : vector<1x32xf32> to vector<16x32xf32>
    %564 = arith.addf %562, %563 : vector<16x32xf32>
    %cst_190 = arith.constant 0.000000e+00 : f32
    %565 = vector.broadcast %cst_190 : f32 to vector<16x32xf32>
    %566 = arith.maximumf %564, %565 : vector<16x32xf32>
    %567 = arith.addf %538, %566 : vector<16x32xf32>
    %cst_191 = arith.constant dense<0.000000e+00> : vector<16xf32>
    %568 = vector.multi_reduction <add>, %377, %cst_191 [1] : vector<16x32xf32> to vector<16xf32>
    %569 = vector.shape_cast %568 : vector<16xf32> to vector<16x1xf32>
    %cst_192 = arith.constant 3.200000e+01 : f32
    %570 = vector.broadcast %cst_192 : f32 to vector<16x1xf32>
    %571 = arith.divf %569, %570 : vector<16x1xf32>
    %572 = vector.broadcast %571 : vector<16x1xf32> to vector<16x32xf32>
    %573 = arith.subf %377, %572 : vector<16x32xf32>
    %574 = arith.mulf %573, %573 : vector<16x32xf32>
    %cst_193 = arith.constant dense<0.000000e+00> : vector<16xf32>
    %575 = vector.multi_reduction <add>, %574, %cst_193 [1] : vector<16x32xf32> to vector<16xf32>
    %576 = vector.shape_cast %575 : vector<16xf32> to vector<16x1xf32>
    %cst_194 = arith.constant 3.100000e+01 : f32
    %577 = vector.broadcast %cst_194 : f32 to vector<16x1xf32>
    %578 = arith.divf %576, %577 : vector<16x1xf32>
    %579 = math.sqrt %578 : vector<16x1xf32>
    %cst_195 = arith.constant 9.99999997E-7 : f32
    %580 = vector.broadcast %cst_195 : f32 to vector<16x1xf32>
    %581 = arith.addf %579, %580 : vector<16x1xf32>
    %582 = tpu.reciprocal %581 {approx = true} : vector<16x1xf32> -> vector<16x1xf32>
    %583 = vector.broadcast %571 : vector<16x1xf32> to vector<16x32xf32>
    %584 = arith.subf %377, %583 : vector<16x32xf32>
    %585 = vector.broadcast %385 : vector<1x32xf32> to vector<16x32xf32>
    %586 = arith.mulf %585, %584 : vector<16x32xf32>
    %587 = vector.broadcast %582 : vector<16x1xf32> to vector<16x32xf32>
    %588 = arith.mulf %586, %587 : vector<16x32xf32>
    %589 = vector.broadcast %387 : vector<1x32xf32> to vector<16x32xf32>
    %590 = arith.addf %588, %589 : vector<16x32xf32>
    %591 = arith.truncf %590 : vector<16x32xf32> to vector<16x32xbf16>
    %cst_196 = arith.constant dense<0.000000e+00> : vector<16x96xf32>
    %592 = tpu.matmul %591, %380, %cst_196 {dimension_numbers = #tpu.dot_dimension_numbers<[1], [0], [0], [1], [0, 0, 1, 1], [], []>} : vector<16x32xbf16>, vector<32x96xbf16>, vector<16x96xf32> -> vector<16x96xf32>
    %593 = vector.broadcast %389 : vector<1x96xf32> to vector<16x96xf32>
    %594 = arith.addf %592, %593 : vector<16x96xf32>
    %595 = vector.extract_strided_slice %594 {offsets = [0, 0], sizes = [16, 8], strides = [1, 1]} : vector<16x96xf32> to vector<16x8xf32>
    %596 = vector.extract_strided_slice %594 {offsets = [0, 8], sizes = [16, 8], strides = [1, 1]} : vector<16x96xf32> to vector<16x8xf32>
    %597 = vector.extract_strided_slice %594 {offsets = [0, 16], sizes = [16, 8], strides = [1, 1]} : vector<16x96xf32> to vector<16x8xf32>
    %598 = vector.extract_strided_slice %594 {offsets = [0, 24], sizes = [16, 8], strides = [1, 1]} : vector<16x96xf32> to vector<16x8xf32>
    %599 = vector.shape_cast %595 : vector<16x8xf32> to vector<1x16x8xf32>
    %600 = vector.shape_cast %596 : vector<16x8xf32> to vector<1x16x8xf32>
    %601 = vector.shape_cast %597 : vector<16x8xf32> to vector<1x16x8xf32>
    %602 = vector.shape_cast %598 : vector<16x8xf32> to vector<1x16x8xf32>
    %603 = tpu.concatenate %599, %600, %601, %602 in 0 : vector<1x16x8xf32>, vector<1x16x8xf32>, vector<1x16x8xf32>, vector<1x16x8xf32> -> vector<4x16x8xf32>
    %604 = vector.extract_strided_slice %594 {offsets = [0, 32], sizes = [16, 8], strides = [1, 1]} : vector<16x96xf32> to vector<16x8xf32>
    %605 = vector.extract_strided_slice %594 {offsets = [0, 40], sizes = [16, 8], strides = [1, 1]} : vector<16x96xf32> to vector<16x8xf32>
    %606 = vector.extract_strided_slice %594 {offsets = [0, 48], sizes = [16, 8], strides = [1, 1]} : vector<16x96xf32> to vector<16x8xf32>
    %607 = vector.extract_strided_slice %594 {offsets = [0, 56], sizes = [16, 8], strides = [1, 1]} : vector<16x96xf32> to vector<16x8xf32>
    %608 = vector.shape_cast %604 : vector<16x8xf32> to vector<1x16x8xf32>
    %609 = vector.shape_cast %605 : vector<16x8xf32> to vector<1x16x8xf32>
    %610 = vector.shape_cast %606 : vector<16x8xf32> to vector<1x16x8xf32>
    %611 = vector.shape_cast %607 : vector<16x8xf32> to vector<1x16x8xf32>
    %612 = tpu.concatenate %608, %609, %610, %611 in 0 : vector<1x16x8xf32>, vector<1x16x8xf32>, vector<1x16x8xf32>, vector<1x16x8xf32> -> vector<4x16x8xf32>
    %613 = vector.extract_strided_slice %594 {offsets = [0, 64], sizes = [16, 8], strides = [1, 1]} : vector<16x96xf32> to vector<16x8xf32>
    %614 = vector.extract_strided_slice %594 {offsets = [0, 72], sizes = [16, 8], strides = [1, 1]} : vector<16x96xf32> to vector<16x8xf32>
    %615 = vector.extract_strided_slice %594 {offsets = [0, 80], sizes = [16, 8], strides = [1, 1]} : vector<16x96xf32> to vector<16x8xf32>
    %616 = vector.extract_strided_slice %594 {offsets = [0, 88], sizes = [16, 8], strides = [1, 1]} : vector<16x96xf32> to vector<16x8xf32>
    %617 = vector.shape_cast %613 : vector<16x8xf32> to vector<1x16x8xf32>
    %618 = vector.shape_cast %614 : vector<16x8xf32> to vector<1x16x8xf32>
    %619 = vector.shape_cast %615 : vector<16x8xf32> to vector<1x16x8xf32>
    %620 = vector.shape_cast %616 : vector<16x8xf32> to vector<1x16x8xf32>
    %621 = tpu.concatenate %617, %618, %619, %620 in 0 : vector<1x16x8xf32>, vector<1x16x8xf32>, vector<1x16x8xf32>, vector<1x16x8xf32> -> vector<4x16x8xf32>
    %622 = arith.truncf %603 : vector<4x16x8xf32> to vector<4x16x8xbf16>
    %623 = arith.truncf %612 : vector<4x16x8xf32> to vector<4x16x8xbf16>
    "tpu.trace_start"() <{level = 10 : i32, message = "hqd,hkd->hqk"}> : () -> ()
    %cst_197 = arith.constant dense<0.000000e+00> : vector<4x16x16xf32>
    %624 = tpu.matmul %622, %623, %cst_197 {dimension_numbers = #tpu.dot_dimension_numbers<[2], [2], [1], [1], [0, 0, 0, 1, 1, 1], [0], [0]>} : vector<4x16x8xbf16>, vector<4x16x8xbf16>, vector<4x16x16xf32> -> vector<4x16x16xf32>
    "tpu.trace_stop"() : () -> ()
    %cst_198 = arith.constant 0.353553385 : f32
    %625 = vector.broadcast %cst_198 : f32 to vector<4x16x16xf32>
    %626 = arith.mulf %624, %625 : vector<4x16x16xf32>
    %627 = vector.shape_cast %35 : vector<1x16xf32> to vector<1x1x16xf32>
    %628 = vector.broadcast %627 : vector<1x1x16xf32> to vector<4x16x16xf32>
    %629 = arith.addf %626, %628 : vector<4x16x16xf32>
    %cst_199 = arith.constant dense<0xFF800000> : vector<4x16xf32>
    %630 = vector.multi_reduction <maximumf>, %629, %cst_199 [2] : vector<4x16x16xf32> to vector<4x16xf32>
    %631 = vector.shape_cast %630 : vector<4x16xf32> to vector<4x16x1xf32>
    %632 = vector.broadcast %631 : vector<4x16x1xf32> to vector<4x16x16xf32>
    %633 = arith.subf %629, %632 : vector<4x16x16xf32>
    %634 = math.exp %633 : vector<4x16x16xf32>
    %cst_200 = arith.constant dense<0.000000e+00> : vector<4x16xf32>
    %635 = vector.multi_reduction <add>, %634, %cst_200 [2] : vector<4x16x16xf32> to vector<4x16xf32>
    %636 = vector.shape_cast %635 : vector<4x16xf32> to vector<4x16x1xf32>
    %637 = tpu.reciprocal %636 {approx = true} : vector<4x16x1xf32> -> vector<4x16x1xf32>
    %638 = vector.broadcast %637 : vector<4x16x1xf32> to vector<4x16x16xf32>
    %639 = arith.mulf %634, %638 : vector<4x16x16xf32>
    %640 = arith.truncf %639 : vector<4x16x16xf32> to vector<4x16x16xbf16>
    %641 = arith.truncf %621 : vector<4x16x8xf32> to vector<4x16x8xbf16>
    "tpu.trace_start"() <{level = 10 : i32, message = "hqk,hkd->hqd"}> : () -> ()
    %cst_201 = arith.constant dense<0.000000e+00> : vector<4x16x8xf32>
    %642 = tpu.matmul %640, %641, %cst_201 {dimension_numbers = #tpu.dot_dimension_numbers<[2], [1], [1], [2], [0, 0, 0, 1, 1, 2], [0], [0]>} : vector<4x16x16xbf16>, vector<4x16x8xbf16>, vector<4x16x8xf32> -> vector<4x16x8xf32>
    "tpu.trace_stop"() : () -> ()
    %643 = vector.extract_strided_slice %642 {offsets = [0, 0, 0], sizes = [1, 16, 8], strides = [1, 1, 1]} : vector<4x16x8xf32> to vector<1x16x8xf32>
    %644 = vector.shape_cast %643 : vector<1x16x8xf32> to vector<16x8xf32>
    %645 = vector.extract_strided_slice %642 {offsets = [1, 0, 0], sizes = [1, 16, 8], strides = [1, 1, 1]} : vector<4x16x8xf32> to vector<1x16x8xf32>
    %646 = vector.shape_cast %645 : vector<1x16x8xf32> to vector<16x8xf32>
    %647 = vector.extract_strided_slice %642 {offsets = [2, 0, 0], sizes = [1, 16, 8], strides = [1, 1, 1]} : vector<4x16x8xf32> to vector<1x16x8xf32>
    %648 = vector.shape_cast %647 : vector<1x16x8xf32> to vector<16x8xf32>
    %649 = vector.extract_strided_slice %642 {offsets = [3, 0, 0], sizes = [1, 16, 8], strides = [1, 1, 1]} : vector<4x16x8xf32> to vector<1x16x8xf32>
    %650 = vector.shape_cast %649 : vector<1x16x8xf32> to vector<16x8xf32>
    %651 = tpu.concatenate %644, %646, %648, %650 in 1 : vector<16x8xf32>, vector<16x8xf32>, vector<16x8xf32>, vector<16x8xf32> -> vector<16x32xf32>
    %652 = arith.truncf %651 : vector<16x32xf32> to vector<16x32xbf16>
    %cst_202 = arith.constant dense<0.000000e+00> : vector<16x32xf32>
    %653 = tpu.matmul %652, %406, %cst_202 {dimension_numbers = #tpu.dot_dimension_numbers<[1], [0], [0], [1], [0, 0, 1, 1], [], []>} : vector<16x32xbf16>, vector<32x32xbf16>, vector<16x32xf32> -> vector<16x32xf32>
    %654 = vector.broadcast %391 : vector<1x32xf32> to vector<16x32xf32>
    %655 = arith.addf %653, %654 : vector<16x32xf32>
    %656 = arith.addf %377, %655 : vector<16x32xf32>
    %cst_203 = arith.constant dense<0.000000e+00> : vector<16xf32>
    %657 = vector.multi_reduction <add>, %656, %cst_203 [1] : vector<16x32xf32> to vector<16xf32>
    %658 = vector.shape_cast %657 : vector<16xf32> to vector<16x1xf32>
    %cst_204 = arith.constant 3.200000e+01 : f32
    %659 = vector.broadcast %cst_204 : f32 to vector<16x1xf32>
    %660 = arith.divf %658, %659 : vector<16x1xf32>
    %661 = vector.broadcast %660 : vector<16x1xf32> to vector<16x32xf32>
    %662 = arith.subf %656, %661 : vector<16x32xf32>
    %663 = arith.mulf %662, %662 : vector<16x32xf32>
    %cst_205 = arith.constant dense<0.000000e+00> : vector<16xf32>
    %664 = vector.multi_reduction <add>, %663, %cst_205 [1] : vector<16x32xf32> to vector<16xf32>
    %665 = vector.shape_cast %664 : vector<16xf32> to vector<16x1xf32>
    %cst_206 = arith.constant 3.100000e+01 : f32
    %666 = vector.broadcast %cst_206 : f32 to vector<16x1xf32>
    %667 = arith.divf %665, %666 : vector<16x1xf32>
    %668 = math.sqrt %667 : vector<16x1xf32>
    %cst_207 = arith.constant 9.99999997E-7 : f32
    %669 = vector.broadcast %cst_207 : f32 to vector<16x1xf32>
    %670 = arith.addf %668, %669 : vector<16x1xf32>
    %671 = tpu.reciprocal %670 {approx = true} : vector<16x1xf32> -> vector<16x1xf32>
    %672 = vector.broadcast %660 : vector<16x1xf32> to vector<16x32xf32>
    %673 = arith.subf %656, %672 : vector<16x32xf32>
    %674 = vector.broadcast %393 : vector<1x32xf32> to vector<16x32xf32>
    %675 = arith.mulf %674, %673 : vector<16x32xf32>
    %676 = vector.broadcast %671 : vector<16x1xf32> to vector<16x32xf32>
    %677 = arith.mulf %675, %676 : vector<16x32xf32>
    %678 = vector.broadcast %395 : vector<1x32xf32> to vector<16x32xf32>
    %679 = arith.addf %677, %678 : vector<16x32xf32>
    %680 = arith.truncf %679 : vector<16x32xf32> to vector<16x32xbf16>
    %cst_208 = arith.constant dense<0.000000e+00> : vector<16x64xf32>
    %681 = tpu.matmul %680, %383, %cst_208 {dimension_numbers = #tpu.dot_dimension_numbers<[1], [0], [0], [1], [0, 0, 1, 1], [], []>} : vector<16x32xbf16>, vector<32x64xbf16>, vector<16x64xf32> -> vector<16x64xf32>
    %682 = vector.broadcast %397 : vector<1x64xf32> to vector<16x64xf32>
    %683 = arith.addf %681, %682 : vector<16x64xf32>
    %cst_209 = arith.constant 0.000000e+00 : f32
    %684 = vector.broadcast %cst_209 : f32 to vector<16x64xf32>
    %685 = arith.maximumf %683, %684 : vector<16x64xf32>
    %686 = arith.truncf %685 : vector<16x64xf32> to vector<16x64xbf16>
    %cst_210 = arith.constant dense<0.000000e+00> : vector<16x32xf32>
    %687 = tpu.matmul %686, %409, %cst_210 {dimension_numbers = #tpu.dot_dimension_numbers<[1], [0], [0], [1], [0, 0, 1, 1], [], []>} : vector<16x64xbf16>, vector<64x32xbf16>, vector<16x32xf32> -> vector<16x32xf32>
    %688 = vector.broadcast %399 : vector<1x32xf32> to vector<16x32xf32>
    %689 = arith.addf %687, %688 : vector<16x32xf32>
    %690 = arith.addf %656, %689 : vector<16x32xf32>
    %691 = arith.truncf %690 : vector<16x32xf32> to vector<16x32xbf16>
    %cst_211 = arith.constant dense<0.000000e+00> : vector<48x32xf32>
    %692 = tpu.matmul %1, %691, %cst_211 {dimension_numbers = #tpu.dot_dimension_numbers<[1], [0], [0], [1], [0, 0, 1, 1], [], []>} : vector<48x16xbf16>, vector<16x32xbf16>, vector<48x32xf32> -> vector<48x32xf32>
    %693 = vector.extract_strided_slice %692 {offsets = [0, 0], sizes = [16, 32], strides = [1, 1]} : vector<48x32xf32> to vector<16x32xf32>
    %694 = vector.extract_strided_slice %692 {offsets = [16, 0], sizes = [16, 32], strides = [1, 1]} : vector<48x32xf32> to vector<16x32xf32>
    %695 = vector.extract_strided_slice %692 {offsets = [32, 0], sizes = [16, 32], strides = [1, 1]} : vector<48x32xf32> to vector<16x32xf32>
    %696 = tpu.concatenate %693, %694, %695 in 1 : vector<16x32xf32>, vector<16x32xf32>, vector<16x32xf32> -> vector<16x96xf32>
    %697 = arith.truncf %696 : vector<16x96xf32> to vector<16x96xbf16>
    %cst_212 = arith.constant dense<0.000000e+00> : vector<16x32xf32>
    %698 = tpu.matmul %697, %412, %cst_212 {dimension_numbers = #tpu.dot_dimension_numbers<[1], [0], [0], [1], [0, 0, 1, 1], [], []>} : vector<16x96xbf16>, vector<96x32xbf16>, vector<16x32xf32> -> vector<16x32xf32>
    %699 = vector.broadcast %401 : vector<1x32xf32> to vector<16x32xf32>
    %700 = arith.addf %698, %699 : vector<16x32xf32>
    %cst_213 = arith.constant 0.000000e+00 : f32
    %701 = vector.broadcast %cst_213 : f32 to vector<16x32xf32>
    %702 = arith.maximumf %700, %701 : vector<16x32xf32>
    %c1_214 = arith.constant 1 : index
    %c1_215 = arith.constant 1 : index
    %c0_216 = arith.constant 0 : index
    %703 = vector.load %arg3[%c1_214, %c1_215, %c0_216] : memref<2x2x32xf32, #tpu.memory_space<vmem>>, vector<1x1x32xf32>
    %704 = vector.shape_cast %703 : vector<1x1x32xf32> to vector<1x32xf32>
    %705 = vector.broadcast %704 : vector<1x32xf32> to vector<16x32xf32>
    %706 = arith.addf %702, %705 : vector<16x32xf32>
    %707 = arith.truncf %706 : vector<16x32xf32> to vector<16x32xbf16>
    %cst_217 = arith.constant dense<0.000000e+00> : vector<48x32xf32>
    %708 = tpu.matmul %1, %707, %cst_217 {dimension_numbers = #tpu.dot_dimension_numbers<[1], [0], [0], [1], [0, 0, 1, 1], [], []>} : vector<48x16xbf16>, vector<16x32xbf16>, vector<48x32xf32> -> vector<48x32xf32>
    %709 = vector.extract_strided_slice %708 {offsets = [0, 0], sizes = [16, 32], strides = [1, 1]} : vector<48x32xf32> to vector<16x32xf32>
    %710 = vector.extract_strided_slice %708 {offsets = [16, 0], sizes = [16, 32], strides = [1, 1]} : vector<48x32xf32> to vector<16x32xf32>
    %711 = vector.extract_strided_slice %708 {offsets = [32, 0], sizes = [16, 32], strides = [1, 1]} : vector<48x32xf32> to vector<16x32xf32>
    %712 = tpu.concatenate %709, %710, %711 in 1 : vector<16x32xf32>, vector<16x32xf32>, vector<16x32xf32> -> vector<16x96xf32>
    %713 = arith.truncf %712 : vector<16x96xf32> to vector<16x96xbf16>
    %cst_218 = arith.constant dense<0.000000e+00> : vector<16x32xf32>
    %714 = tpu.matmul %713, %415, %cst_218 {dimension_numbers = #tpu.dot_dimension_numbers<[1], [0], [0], [1], [0, 0, 1, 1], [], []>} : vector<16x96xbf16>, vector<96x32xbf16>, vector<16x32xf32> -> vector<16x32xf32>
    %715 = vector.broadcast %403 : vector<1x32xf32> to vector<16x32xf32>
    %716 = arith.addf %714, %715 : vector<16x32xf32>
    %cst_219 = arith.constant 0.000000e+00 : f32
    %717 = vector.broadcast %cst_219 : f32 to vector<16x32xf32>
    %718 = arith.maximumf %716, %717 : vector<16x32xf32>
    %719 = arith.addf %690, %718 : vector<16x32xf32>
    %720 = arith.truncf %567 : vector<16x32xf32> to vector<16x32xbf16>
    %cst_220 = arith.constant dense<0.000000e+00> : vector<48x32xf32>
    %721 = tpu.matmul %1, %720, %cst_220 {dimension_numbers = #tpu.dot_dimension_numbers<[1], [0], [0], [1], [0, 0, 1, 1], [], []>} : vector<48x16xbf16>, vector<16x32xbf16>, vector<48x32xf32> -> vector<48x32xf32>
    %722 = vector.extract_strided_slice %721 {offsets = [0, 0], sizes = [16, 32], strides = [1, 1]} : vector<48x32xf32> to vector<16x32xf32>
    %723 = vector.extract_strided_slice %721 {offsets = [16, 0], sizes = [16, 32], strides = [1, 1]} : vector<48x32xf32> to vector<16x32xf32>
    %724 = vector.extract_strided_slice %721 {offsets = [32, 0], sizes = [16, 32], strides = [1, 1]} : vector<48x32xf32> to vector<16x32xf32>
    %725 = tpu.concatenate %722, %723, %724 in 1 : vector<16x32xf32>, vector<16x32xf32>, vector<16x32xf32> -> vector<16x96xf32>
    %726 = arith.truncf %725 : vector<16x96xf32> to vector<16x96xbf16>
    %cst_221 = arith.constant dense<0.000000e+00> : vector<16x128xf32>
    %727 = tpu.matmul %726, %6, %cst_221 {dimension_numbers = #tpu.dot_dimension_numbers<[1], [0], [0], [1], [0, 0, 1, 1], [], []>} : vector<16x96xbf16>, vector<96x128xbf16>, vector<16x128xf32> -> vector<16x128xf32>
    %728 = vector.broadcast %7 : vector<1x128xf32> to vector<16x128xf32>
    %729 = arith.addf %727, %728 : vector<16x128xf32>
    %c0_222 = arith.constant 0 : index
    %c0_223 = arith.constant 0 : index
    %c0_224 = arith.constant 0 : index
    %730 = vector.load %arg7[%c0_222, %c0_223, %c0_224] : memref<2x16x128xf32, #tpu.memory_space<vmem>>, vector<1x16x128xf32>
    %731 = vector.shape_cast %730 : vector<1x16x128xf32> to vector<16x128xf32>
    %732 = vector.shape_cast %729 : vector<16x128xf32> to vector<1x16x128xf32>
    tpu.vector_store %arg7[%c0_222, %c0_223, %c0_224], %732 {strides = array<i32>} : memref<2x16x128xf32, #tpu.memory_space<vmem>>, vector<1x16x128xf32>,
    %733 = arith.truncf %719 : vector<16x32xf32> to vector<16x32xbf16>
    %cst_225 = arith.constant dense<0.000000e+00> : vector<48x32xf32>
    %734 = tpu.matmul %1, %733, %cst_225 {dimension_numbers = #tpu.dot_dimension_numbers<[1], [0], [0], [1], [0, 0, 1, 1], [], []>} : vector<48x16xbf16>, vector<16x32xbf16>, vector<48x32xf32> -> vector<48x32xf32>
    %735 = vector.extract_strided_slice %734 {offsets = [0, 0], sizes = [16, 32], strides = [1, 1]} : vector<48x32xf32> to vector<16x32xf32>
    %736 = vector.extract_strided_slice %734 {offsets = [16, 0], sizes = [16, 32], strides = [1, 1]} : vector<48x32xf32> to vector<16x32xf32>
    %737 = vector.extract_strided_slice %734 {offsets = [32, 0], sizes = [16, 32], strides = [1, 1]} : vector<48x32xf32> to vector<16x32xf32>
    %738 = tpu.concatenate %735, %736, %737 in 1 : vector<16x32xf32>, vector<16x32xf32>, vector<16x32xf32> -> vector<16x96xf32>
    %739 = arith.truncf %738 : vector<16x96xf32> to vector<16x96xbf16>
    %cst_226 = arith.constant dense<0.000000e+00> : vector<16x128xf32>
    %740 = tpu.matmul %739, %6, %cst_226 {dimension_numbers = #tpu.dot_dimension_numbers<[1], [0], [0], [1], [0, 0, 1, 1], [], []>} : vector<16x96xbf16>, vector<96x128xbf16>, vector<16x128xf32> -> vector<16x128xf32>
    %741 = vector.broadcast %7 : vector<1x128xf32> to vector<16x128xf32>
    %742 = arith.addf %740, %741 : vector<16x128xf32>
    %c1_227 = arith.constant 1 : index
    %c0_228 = arith.constant 0 : index
    %c0_229 = arith.constant 0 : index
    %743 = vector.load %arg7[%c1_227, %c0_228, %c0_229] : memref<2x16x128xf32, #tpu.memory_space<vmem>>, vector<1x16x128xf32>
    %744 = vector.shape_cast %743 : vector<1x16x128xf32> to vector<16x128xf32>
    %745 = vector.shape_cast %742 : vector<16x128xf32> to vector<1x16x128xf32>
    tpu.vector_store %arg7[%c1_227, %c0_228, %c0_229], %745 {strides = array<i32>} : memref<2x16x128xf32, #tpu.memory_space<vmem>>, vector<1x16x128xf32>,
    return
  }
  func.func @transform_0(%arg0: i32) -> (i32, i32, i32) {
    %c0_i32 = arith.constant 0 : i32
    %c0_i32_0 = arith.constant 0 : i32
    %c0_i32_1 = arith.constant 0 : i32
    return %arg0, %c0_i32, %c0_i32_0 : i32, i32, i32
  }
  func.func @transform_1(%arg0: i32) -> (i32, i32, i32) {
    %c0_i32 = arith.constant 0 : i32
    %c0_i32_0 = arith.constant 0 : i32
    %c0_i32_1 = arith.constant 0 : i32
    return %arg0, %c0_i32, %c0_i32_0 : i32, i32, i32
  }
  func.func @transform_2(%arg0: i32) -> (i32, i32, i32) {
    %c0_i32 = arith.constant 0 : i32
    %c0_i32_0 = arith.constant 0 : i32
    %c0_i32_1 = arith.constant 0 : i32
    return %arg0, %c0_i32, %c0_i32_0 : i32, i32, i32
  }
  func.func @transform_3(%arg0: i32) -> (i32, i32) {
    %c0_i32 = arith.constant 0 : i32
    %c0_i32_0 = arith.constant 0 : i32
    %c0_i32_1 = arith.constant 0 : i32
    return %c0_i32, %c0_i32_0 : i32, i32
  }
  func.func @transform_4(%arg0: i32) -> (i32, i32, i32) {
    %c0_i32 = arith.constant 0 : i32
    %c0_i32_0 = arith.constant 0 : i32
    %c0_i32_1 = arith.constant 0 : i32
    %c0_i32_2 = arith.constant 0 : i32
    return %c0_i32, %c0_i32_0, %c0_i32_1 : i32, i32, i32
  }
  func.func @transform_5(%arg0: i32) -> (i32, i32, i32) {
    %c0_i32 = arith.constant 0 : i32
    %c0_i32_0 = arith.constant 0 : i32
    %c0_i32_1 = arith.constant 0 : i32
    %c0_i32_2 = arith.constant 0 : i32
    return %c0_i32, %c0_i32_0, %c0_i32_1 : i32, i32, i32
  }
  func.func @transform_6(%arg0: i32) -> (i32, i32, i32) {
    %c0_i32 = arith.constant 0 : i32
    %c0_i32_0 = arith.constant 0 : i32
    %c0_i32_1 = arith.constant 0 : i32
    return %arg0, %c0_i32, %c0_i32_0 : i32, i32, i32
  }
}

</mosaic_0001>

<bundles_post_ra>
// kernel: _gcndiff_forward_jit.1
= control target key start
LH: loop header
LB: loop body
LE: loop exit
PB: predicated region body
PF: predicated region fallthrough
CT: control target
= control target key end

     0   :  { %v6752_v0 = vmov 0.0   ;;  %vm6753_vm0 = vmmov 0   ;;  %vm59_vm1 = vcmask 130048   ;;  %vm157_vm2 = vcmask 1043456   ;;  %s6755_s17 = smov 3   ;;  %s6756_s18 = smov 6   ;;  %s8493_s0 = inlined_call_operand.vmem [shape: f32[2,16,3], index: 0, kind: input, shape index: {}]   ;;  %s8494_s3 = inlined_call_operand.vmem [shape: f32[171,128], index: 3, kind: input, shape index: {}]   ;;  %s8495_s4 = inlined_call_operand.vmem [shape: f32[2,74,96], index: 4, kind: input, shape index: {}]   ;;  %s8496_s1 = inlined_call_operand.vmem [shape: f32[2,1,16], index: 1, kind: input, shape index: {}]   ;;  %s8497_s5 = inlined_call_operand.vmem [shape: f32[2,288,32], index: 5, kind: input, shape index: {}]   ;;  %s8498_s2 = inlined_call_operand.vmem [shape: f32[2,2,32], index: 2, kind: input, shape index: {}]   ;;  %s8499_s6 = inlined_call_operand.vmem [shape: f32[2,16,128], index: 6, kind: output, shape index: {}]  }
   0x1   :  { %5606 = vmatprep.subr.bf16.mxu0 %v6752_v0  ;;  %v56_v1 = vld [vmem:[%s8493_s0] sm:$0xff]  ;;  %v57_v2 = vld [vmem:[%s8493_s0 + $0x8] sm:$0xff]  ;;  %5608 = vmatprep.mubr.msk.bf16.mxu0 %vm6753_vm0, %v6752_v0  ;;  %v26_v10 = vld [vmem:[%s8494_s3 + $0x10] sm:$0xff]  ;;  %vm158_vm3 = vcmask 1044480   ;;  %v6754_v22 = vmov 65535   ;;  %vm142_vm4 = vcmask 23552  }
   0x2   :  { %v24_v3 = vld [vmem:[%s8494_s3] sm:$0xff]  ;;  %v58_v4 = vpack.c.bf16 %v57_v2, %v56_v1  ;;  %v25_v5 = vld [vmem:[%s8494_s3 + $0x8] sm:$0xff]  ;;  %6282 = vmatprep.subr.bf16.mxu1 %v6752_v0  ;;  %5616 = vmatprep.mubr.msk.bf16.mxu1 %vm6753_vm0, %v6752_v0  ;;  %v27_v11 = vld [vmem:[%s8494_s3 + $0x18] sm:$0xff]  ;;  %v159_v23 = vsel %vm157_vm2, 4294967295, %v6754_v22  ;;  %vm145_vm5 = vcmask 48128   ;;  %vm153_vm6 = vcmask 72704  }
   0x3   :  { %v28_v6 = vld [vmem:[%s8494_s3 + $0x20] sm:$0xff]  ;;  %v29_v7 = vld [vmem:[%s8494_s3 + $0x28] sm:$0xff]  ;;  %v6825_v8 = vpack.c.bf16 %v25_v5, %v24_v3  ;;  %v6845_v12 = vpack.c.bf16 %v27_v11, %v26_v10  ;;  %v160_v24 = vsel %vm158_vm3, %v159_v23, 0  ;;  %v5184_v38 = vld [vmem:[%s8493_s0 + $0x10] sm:$0xff]  ;;  %vm410_vm7 = vcmask 261120   ;;  %s6757_s14 = smov 104  }
   0x4   :  { %v6827_v9 = vpack.c.bf16 %v29_v7, %v28_v6  ;;  %5607 = vmatpush3.bf16.msra.mxu0 %v58_v4  ;;  %6283 = vmatpush3.bf16.msra.mxu1 %v58_v4  ;;  %v33_v17 = vld [vmem:[%s8494_s3 + $0x40] sm:$0xff]  ;;  %v34_v18 = vld [vmem:[%s8494_s3 + $0x48] sm:$0x1]  ;;  %v5185_v39 = vld [vmem:[%s8493_s0 + $0x18] sm:$0xff]  ;;  %s6758_s15 = smov 120   ;;  %s6759_s16 = smov 112  }
   0x5   :  { %5620 = vmatprep.subr.bf16.mxu1 %v6752_v0  ;;  %5640 = vmatprep.subr.bf16.mxu0 %v6752_v0  ;;  %v35_v21 = vpack.c.bf16 %v34_v18, %v33_v17  ;;  %v209_v46 = vpack.c.bf16 %v5185_v39, %v5184_v38  ;;  %v5182_v48 = vld [vmem:[%s8494_s3 + $0x49] ss:$0 sm:$0xff]  ;;  %vm541_vm12 = vcmask 64512   ;;  %s6761_s20 = smov 64   ;;  %s6762_s28 = smov 8   ;;  %vm1069_vm13 = vcmask 195584  }
   0x6   :  { %s6763_s29 = smov 16   ;;  %s6764_s30 = smov 24  }
   0x7   :  { %5609 = vmatmul.mubr.msk.bf16.vlgmr.msra.gmra.mxu0 %vm59_vm1, %v6825_v8  ;;  %5617 = vmatmul.mubr.msk.bf16.vlgmr.msra.gmra.mxu1 %vm59_vm1, %v6827_v9  ;;  %v162_v27 = vand.u32 %v160_v24, %v35_v21 }
   0x8   :  { %5612 = vmatprep.mubr.msk.bf16.mxu0 %vm6753_vm0, %v6752_v0  ;;  %5622 = vmatprep.mubr.msk.bf16.mxu1 %vm6753_vm0, %v6752_v0 }
   0x9   :  { %5621 = vmatpush3.bf16.msra.mxu1 %v162_v27  ;;  %5641 = vmatpush3.bf16.msra.mxu0 %v162_v27 }
   0xa   :  { %5626 = vmatprep.subr.bf16.mxu1 %v6752_v0  ;;  %5646 = vmatprep.subr.bf16.mxu0 %v6752_v0 }
   0xf   :  { %5613 = vmatmul.mubr.msk.bf16.gmra.mxu0 %vm59_vm1, %v6845_v12 }
  0x10   :  { %5642 = vmatprep.mubr.msk.bf16.mxu0 %vm6753_vm0, %v6752_v0 }
  0xc7   :  { %v103_v13 = vpop.f32.mrf.mxu0  ;;  %v119_v14 = vpop.f32.mrf.mxu1 }
  0xc9   :  { %v5610_v15 = vpop.f32.mrf.mxu0  ;;  %v5618_v16 = vpop.f32.mrf.mxu1 }
  0xcb   :  { %v106_v19 = vpop.f32.mrf.mxu0  ;;  %v122_v20 = vpop.f32.mrf.mxu1 }
  0xcc   :  { %v6303_v33 = vpack.i.bf16 %v122_v20, %v119_v14 }
  0xcd   :  { %v5611_v25 = vpop.f32.mrf.mxu0  ;;  %v5619_v26 = vpop.f32.mrf.mxu1 }
  0xcf   :  { %v111_v28 = vpop.f32.mrf.mxu0 }
  0xd1   :  { %v5614_v29 = vpop.f32.mrf.mxu0 }
  0xd2   :  { %v336_v29 = vld [vmem:[%s8495_s4 + $0x10] sm:$0xff] }
  0xd3   :  { %v114_v30 = vpop.f32.mrf.mxu0 }
  0xd4   :  { %v6298_v31 = vpack.i.bf16 %v114_v30, %v111_v28  ;;  %v337_v30 = vld [vmem:[%s8495_s4 + $0x18] sm:$0xff] }
  0xd5   :  { %v5615_v32 = vpop.f32.mrf.mxu0 }
  0xd6   :  { %6299 = vrot.lane.b32.xlu0 %v6298_v31, %s6755_s17 }
  0xda   :  { %6304 = vrot.lane.b32.xlu0 %v6303_v33, %s6756_s18 }
 0x148   :  { %v6300_v34 = vpop.permute.xlu0 %6299 }
 0x149   :  { %v6302_v35 = vunpack.i.h.bf16 %v6300_v34  ;;  %v6301_v36 = vunpack.i.l.bf16 %v6300_v34 }
 0x14b   :  { %v144_v42 = vsel %vm142_vm4, %v106_v19, %v6302_v35  ;;  %v143_v43 = vsel %vm142_vm4, %v103_v13, %v6301_v36 }
 0x14c   :  { %v6305_v37 = vpop.permute.xlu0 %6304 }
 0x14d   :  { %v6307_v40 = vunpack.i.h.bf16 %v6305_v37  ;;  %v6306_v41 = vunpack.i.l.bf16 %v6305_v37  ;;  %v6914_v37 = vpack.c.bf16 %v337_v30, %v336_v29 }
 0x14f   :  { %v146_v44 = vsel %vm145_vm5, %v143_v43, %v6306_v41  ;;  %v147_v45 = vsel %vm145_vm5, %v144_v42, %v6307_v40  ;;  %v334_v40 = vld [vmem:[%s8495_s4] sm:$0xff]  ;;  %v335_v41 = vld [vmem:[%s8495_s4 + $0x8] sm:$0xff] }
 0x150   :  { %v148_v47 = vpack.c.bf16 %v147_v45, %v146_v44  ;;  %v6924_v45 = vpack.c.bf16 %v335_v41, %v334_v40 }
 0x152   :  { %5623 = vmatmul.mubr.msk.bf16.vlgmr.msra.gmra.mxu1 %vm153_vm6, %v148_v47 }
 0x153   :  { %5627 = vmatpush3.bf16.msra.mxu1 %v209_v46  ;;  %5628 = vmatprep.mubr.msk.bf16.mxu1 %vm6753_vm0, %v6752_v0 }
 0x154   :  { %5654 = vmatprep.subr.bf16.mxu1 %v6752_v0 }
 0x15a   :  { %5629 = vmatmul.mubr.msk.bf16.vlgmr.msra.gmra.mxu1 %vm59_vm1, %v6825_v8 }
 0x15b   :  { %5632 = vmatprep.mubr.msk.bf16.mxu1 %vm6753_vm0, %v6752_v0 }
 0x162   :  { %5633 = vmatmul.mubr.msk.bf16.gmra.mxu1 %vm59_vm1, %v6845_v12 }
 0x163   :  { %5636 = vmatprep.mubr.msk.bf16.mxu1 %vm6753_vm0, %v6752_v0 }
 0x16a   :  { %5637 = vmatmul.mubr.msk.bf16.gmra.mxu1 %vm59_vm1, %v6827_v9 }
 0x16b   :  { %5656 = vmatprep.mubr.msk.bf16.mxu1 %vm6753_vm0, %v6752_v0 }
 0x212   :  { %v198_v49 = vpop.f32.mrf.mxu1 }
 0x213   :  { %v6890_v50 = vadd.f32 %v5182_v48, %v198_v49 }
 0x214   :  { %v5624_v51 = vpop.f32.mrf.mxu1 }
 0x215   :  { %v411_v52 = vsel %vm410_vm7, %v6890_v50, 0.0 }
 0x216   :  { %412 = vadd.xlane.f32.xlu1 %v411_v52  ;;  %v201_v53 = vpop.f32.mrf.mxu1 }
 0x217   :  { %v6894_v54 = vadd.f32 %v5182_v48, %v201_v53 }
 0x218   :  { %v5625_v55 = vpop.f32.mrf.mxu1 }
 0x219   :  { %v414_v56 = vsel %vm410_vm7, %v6894_v54, 0.0 }
 0x21a   :  { %415 = vadd.xlane.f32.xlu1 %v414_v56  ;;  %v244_v57 = vpop.f32.mrf.mxu1  ;;  %v5191_v56 = vld [vmem:[%s8495_s4 + $0x40] ss:$0 sm:$0xff] }
 0x21c   :  { %v5630_v58 = vpop.f32.mrf.mxu1 }
 0x21e   :  { %v247_v59 = vpop.f32.mrf.mxu1 }
 0x220   :  { %v5631_v60 = vpop.f32.mrf.mxu1 }
 0x222   :  { %v252_v61 = vpop.f32.mrf.mxu1 }
 0x224   :  { %v5634_v62 = vpop.f32.mrf.mxu1 }
 0x225   :  { %v5192_v62 = vld [vmem:[%s8495_s4 + $0x41] ss:$0 sm:$0xff] }
 0x226   :  { %v255_v63 = vpop.f32.mrf.mxu1 }
 0x227   :  { %v6308_v1 = vpack.i.bf16 %v255_v63, %v252_v61 }
 0x228   :  { %v5635_v2 = vpop.f32.mrf.mxu1 }
 0x22a   :  { %v260_v3 = vpop.f32.mrf.mxu1 }
 0x22c   :  { %v5638_v4 = vpop.f32.mrf.mxu1 }
 0x22e   :  { %v263_v5 = vpop.f32.mrf.mxu1 }
 0x22f   :  { %v6313_v6 = vpack.i.bf16 %v263_v5, %v260_v3 }
 0x230   :  { %v5639_v7 = vpop.f32.mrf.mxu1 }
 0x29f   :  { %v413_v10 = vpop.xlane.xlu1 %412 }
 0x2a0   :  { %v418_v11 = vmul.f32 0.03125, %v413_v10 }
 0x2a2   :  { %v420_v13 = vsub.f32 %v6890_v50, %v418_v11  ;;  %v5193_v11 = vld [vmem:[%s8495_s4 + $0x42] ss:$0 sm:$0xff] }
 0x2a3   :  { %v416_v14 = vpop.xlane.xlu1 %415 }
 0x2a4   :  { %v419_v15 = vmul.f32 0.03125, %v416_v14  ;;  %v422_v16 = vmul.f32 %v420_v13, %v420_v13  ;;  %v455_v58 = vmul.f32 %v5191_v56, %v420_v13 }
 0x2a6   :  { %v421_v17 = vsub.f32 %v6894_v54, %v419_v15  ;;  %v424_v18 = vsel %vm410_vm7, %v422_v16, 0.0 }
 0x2a7   :  { %425 = vadd.xlane.f32.xlu0 %v424_v18 }
 0x2a8   :  { %v423_v19 = vmul.f32 %v421_v17, %v421_v17 }
 0x2aa   :  { %v427_v20 = vsel %vm410_vm7, %v423_v19, 0.0 }
 0x2ab   :  { %428 = vadd.xlane.f32.xlu1 %v427_v20 }
 0x2bc   :  { %6309 = vrot.lane.b32.xlu1 %v6308_v1, %s6755_s17  ;;  %s6760_s17 = smov 96  }
 0x2c0   :  { %6314 = vrot.lane.b32.xlu1 %v6313_v6, %s6756_s18  ;;  %s6765_s18 = smov 32  }
 0x330   :  { %v426_v21 = vpop.xlane.xlu0 %425 }
 0x331   :  { %v431_v22 = vmul.f32 0.032258064, %v426_v21 }
 0x333   :  { %6538 = vrsqrt.f32 %v431_v22  ;;  %vm435_vm8 = vcmp.eq.f32.partialorder %v431_v22, inf  ;;  %v438_v43 = vand.u32 2147483648, %v431_v22  ;;  %vm437_vm9 = vcmp.eq.f32.partialorder %v431_v22, 0.0 }
 0x334   :  { %v429_v23 = vpop.xlane.xlu1 %428 }
 0x335   :  { %v432_v24 = vmul.f32 0.032258064, %v429_v23 }
 0x337   :  { %6540 = vrsqrt.f32 %v432_v24  ;;  %vm442_vm10 = vcmp.eq.f32.partialorder %v432_v24, inf  ;;  %v445_v51 = vand.u32 2147483648, %v432_v24  ;;  %vm444_vm11 = vcmp.eq.f32.partialorder %v432_v24, 0.0 }
 0x338   :  { %v6310_v25 = vpop.permute.xlu1 %6309 }
 0x339   :  { %v6312_v26 = vunpack.i.h.bf16 %v6310_v25  ;;  %v6311_v27 = vunpack.i.l.bf16 %v6310_v25 }
 0x33b   :  { %v284_v33 = vsel %vm142_vm4, %v247_v59, %v6312_v26  ;;  %v283_v34 = vsel %vm142_vm4, %v244_v57, %v6311_v27  ;;  %v456_v59 = vmul.f32 %v5191_v56, %v421_v17  ;;  %vm1231_vm4 = vcmask 523264  }
 0x33c   :  { %v6315_v28 = vpop.permute.xlu1 %6314 }
 0x33d   :  { %v6317_v31 = vunpack.i.h.bf16 %v6315_v28  ;;  %v6316_v32 = vunpack.i.l.bf16 %v6315_v28 }
 0x33f   :  { %v286_v35 = vsel %vm145_vm5, %v284_v33, %v6317_v31  ;;  %v285_v36 = vsel %vm145_vm5, %v283_v34, %v6316_v32  ;;  %vm1361_vm5 = vcmask 785408  }
 0x340   :  { %v6539_v38 = vpop.eup %6538  ;;  %v287_v39 = vpack.c.bf16 %v286_v35, %v285_v36 }
 0x341   :  { %v434_v42 = vmul.f32 %v6539_v38, %v431_v22 }
 0x342   :  { %5643 = vmatmul.mubr.msk.bf16.vlgmr.msra.gmra.mxu0 %vm153_vm6, %v287_v39 }
 0x343   :  { %v436_v44 = vsel %vm435_vm8, %v431_v22, %v434_v42  ;;  %5647 = vmatpush3.bf16.msra.mxu0 %v6914_v37  ;;  %5650 = vmatprep.mubr.msk.bf16.mxu0 %vm6753_vm0, %v6752_v0  ;;  %v5199_v42 = vld [vmem:[%s8496_s1] ss:$0 sm:$0xff] }
 0x344   :  { %v6541_v46 = vpop.eup %6540  ;;  %v439_v47 = vsel %vm437_vm9, %v438_v43, %v436_v44  ;;  %5648 = vmatprep.subr.bf16.mxu0 %v6752_v0 }
 0x345   :  { %v447_v48 = vadd.f32 1e-06, %v439_v47  ;;  %v441_v49 = vmul.f32 %v6541_v46, %v432_v24 }
 0x347   :  { %6542 = vrcp.f32 %v447_v48  ;;  %v443_v52 = vsel %vm442_vm10, %v432_v24, %v441_v49  ;;  %5649 = vmatpush3.bf16.msra.mxu0 %v6924_v45 }
 0x348   :  { %v446_v53 = vsel %vm444_vm11, %v445_v51, %v443_v52  ;;  %5660 = vmatprep.subr.bf16.mxu0 %v6752_v0 }
 0x349   :  { %v448_v55 = vadd.f32 1e-06, %v446_v53 }
 0x34b   :  { %6544 = vrcp.f32 %v448_v55 }
 0x354   :  { %v6543_v57 = vpop.eup %6542 }
 0x355   :  { %v457_v60 = vmul.f32 %v6543_v57, %v455_v58 }
 0x357   :  { %v463_v1 = vadd.f32 %v5192_v62, %v457_v60 }
 0x358   :  { %v6545_v61 = vpop.eup %6544 }
 0x359   :  { %v458_v63 = vmul.f32 %v6545_v61, %v456_v59 }
 0x35b   :  { %v464_v2 = vadd.f32 %v5192_v62, %v458_v63 }
 0x35d   :  { %v465_v3 = vpack.c.bf16 %v464_v2, %v463_v1 }
 0x35f   :  { %5651 = vmatmul.mubr.msk.bf16.vlgmr.msra.gmra.mxu0 %vm410_vm7, %v465_v3 }
 0x360   :  { %5662 = vmatprep.mubr.msk.bf16.mxu0 %vm6753_vm0, %v6752_v0 }
 0x402   :  { %v6940_v4 = vpop.f32.mrf.mxu0 }
 0x404   :  { %v5644_v5 = vpop.f32.mrf.mxu0 }
 0x406   :  { %v6942_v6 = vpop.f32.mrf.mxu0 }
 0x408   :  { %v5645_v7 = vpop.f32.mrf.mxu0 }
 0x41f   :  { %v507_v10 = vpop.f32.mrf.mxu0 }
 0x420   :  { %v508_v15 = vadd.f32 %v5193_v11, %v507_v10 }
 0x421   :  { %v5652_v13 = vpop.f32.mrf.mxu0 }
 0x423   :  { %v510_v14 = vpop.f32.mrf.mxu0 }
 0x424   :  { %v511_v16 = vadd.f32 %v5193_v11, %v510_v14 }
 0x425   :  { %v5653_v17 = vpop.f32.mrf.mxu0 }
 0x426   :  { %v6328_v18 = vpack.i.bf16 %v511_v16, %v508_v15  ;;  %v6950_v19 = vpack.c.bf16 %v511_v16, %v508_v15 }
 0x428   :  { %6329 = vrot.lane.b32.xlu0 %v6328_v18, %s6757_s14  ;;  %6319 = vrot.lane.b32.xlu1 %v6328_v18, %s6758_s15 }
 0x42c   :  { %6324 = vrot.lane.b32.xlu1 %v6328_v18, %s6759_s16 }
 0x430   :  { %539 = vrot.lane.b32.xlu1 %v6950_v19, %s6760_s17 }
 0x49a   :  { %v6320_v20 = vpop.permute.xlu1 %6319  ;;  %v6330_v24 = vpop.permute.xlu0 %6329 }
 0x49b   :  { %v6322_v21 = vunpack.i.h.bf16 %v6320_v20  ;;  %v6321_v22 = vunpack.i.l.bf16 %v6320_v20  ;;  %v6332_v28 = vunpack.i.h.bf16 %v6330_v24  ;;  %v6331_v29 = vunpack.i.l.bf16 %v6330_v24 }
 0x49d   :  { %v6954_v23 = vpack.c.bf16 %v6322_v21, %v6321_v22  ;;  %v6963_v33 = vpack.c.bf16 %v6332_v28, %v6331_v29 }
 0x49e   :  { %v6325_v25 = vpop.permute.xlu1 %6324 }
 0x49f   :  { %v6327_v26 = vunpack.i.h.bf16 %v6325_v25  ;;  %v6326_v27 = vunpack.i.l.bf16 %v6325_v25  ;;  %590 = vrot.lane.b32.xlu1 %v6954_v23, %s6760_s17 }
 0x4a1   :  { %v6958_v30 = vpack.c.bf16 %v6327_v26, %v6326_v27 }
 0x4a2   :  { %v540_v31 = vpop.permute.xlu1 %539 }
 0x4a3   :  { %v546_v32 = vsel %vm541_vm12, %v540_v31, 0  ;;  %640 = vrot.lane.b32.xlu1 %v6958_v30, %s6760_s17 }
 0x4a4   :  { %5655 = vmatpush3.bf16.xpose.msra.mxu1 %v546_v32 }
 0x4a5   :  { %5666 = vmatprep.subr.bf16.mxu1 %v6752_v0 }
 0x4a7   :  { %690 = vrot.lane.b32.xlu1 %v6963_v33, %s6760_s17 }
 0x4ab   :  { %5657 = vmatmul.mubr.msk.bf16.vlgmr.msra.gmra.mxu1 %vm541_vm12, %v6950_v19 }
 0x4ac   :  { %5668 = vmatprep.mubr.msk.bf16.mxu1 %vm6753_vm0, %v6752_v0 }
 0x511   :  { %v591_v34 = vpop.permute.xlu1 %590 }
 0x512   :  { %v596_v35 = vsel %vm541_vm12, %v591_v34, 0 }
 0x513   :  { %5661 = vmatpush3.bf16.xpose.msra.mxu0 %v596_v35 }
 0x514   :  { %5672 = vmatprep.subr.bf16.mxu0 %v6752_v0 }
 0x515   :  { %v641_v36 = vpop.permute.xlu1 %640 }
 0x516   :  { %v646_v38 = vsel %vm541_vm12, %v641_v36, 0 }
 0x517   :  { %5667 = vmatpush3.bf16.xpose.msra.mxu1 %v646_v38 }
 0x518   :  { %5678 = vmatprep.subr.bf16.mxu1 %v6752_v0 }
 0x519   :  { %v691_v39 = vpop.permute.xlu1 %690 }
 0x51a   :  { %v696_v40 = vsel %vm541_vm12, %v691_v39, 0  ;;  %5663 = vmatmul.mubr.msk.bf16.vlgmr.msra.gmra.mxu0 %vm541_vm12, %v6954_v23 }
 0x51b   :  { %5673 = vmatpush3.bf16.xpose.msra.mxu0 %v696_v40  ;;  %5674 = vmatprep.mubr.msk.bf16.mxu0 %vm6753_vm0, %v6752_v0 }
 0x51c   :  { %5684 = vmatprep.subr.bf16.mxu0 %v6752_v0 }
 0x51e   :  { %5669 = vmatmul.mubr.msk.bf16.vlgmr.msra.gmra.mxu1 %vm541_vm12, %v6958_v30 }
 0x51f   :  { %5680 = vmatprep.mubr.msk.bf16.mxu1 %vm6753_vm0, %v6752_v0 }
 0x522   :  { %5675 = vmatmul.mubr.msk.bf16.vlgmr.msra.gmra.mxu0 %vm541_vm12, %v6963_v33 }
 0x523   :  { %5686 = vmatprep.mubr.msk.bf16.mxu0 %vm6753_vm0, %v6752_v0 }
 0x56b   :  { %v582_v41 = vpop.f32.mrf.mxu1 }
 0x56c   :  { %v739_v43 = vmul.f32 0.35355338, %v582_v41 }
 0x56d   :  { %v5658_v44 = vpop.f32.mrf.mxu1 }
 0x56e   :  { %v753_v46 = vadd.f32 %v5199_v42, %v739_v43 }
 0x56f   :  { %v585_v47 = vpop.f32.mrf.mxu1 }
 0x570   :  { %v740_v48 = vmul.f32 0.35355338, %v585_v47  ;;  %v761_v49 = vsel %vm59_vm1, %v753_v46, -inf }
 0x571   :  { %762 = vmax.xlane.f32.xlu1 %v761_v49  ;;  %v5659_v51 = vpop.f32.mrf.mxu1 }
 0x572   :  { %v754_v52 = vadd.f32 %v5199_v42, %v740_v48 }
 0x574   :  { %v764_v53 = vsel %vm59_vm1, %v754_v52, -inf }
 0x575   :  { %765 = vmax.xlane.f32.xlu0 %v764_v53 }
 0x5da   :  { %v632_v55 = vpop.f32.mrf.mxu0 }
 0x5db   :  { %v741_v56 = vmul.f32 0.35355338, %v632_v55 }
 0x5dc   :  { %v5664_v57 = vpop.f32.mrf.mxu0 }
 0x5dd   :  { %v755_v58 = vadd.f32 %v5199_v42, %v741_v56 }
 0x5de   :  { %v635_v59 = vpop.f32.mrf.mxu0  ;;  %v682_v60 = vpop.f32.mrf.mxu1 }
 0x5df   :  { %v742_v61 = vmul.f32 0.35355338, %v635_v59  ;;  %v743_v62 = vmul.f32 0.35355338, %v682_v60  ;;  %v767_v63 = vsel %vm59_vm1, %v755_v58, -inf }
 0x5e0   :  { %v5670_v1 = vpop.f32.mrf.mxu1  ;;  %768 = vmax.xlane.f32.xlu0 %v767_v63  ;;  %v5665_v2 = vpop.f32.mrf.mxu0 }
 0x5e1   :  { %v757_v3 = vadd.f32 %v5199_v42, %v743_v62  ;;  %v756_v5 = vadd.f32 %v5199_v42, %v742_v61 }
 0x5e2   :  { %v685_v7 = vpop.f32.mrf.mxu1  ;;  %v732_v10 = vpop.f32.mrf.mxu0 }
 0x5e3   :  { %v744_v11 = vmul.f32 0.35355338, %v685_v7  ;;  %v745_v13 = vmul.f32 0.35355338, %v732_v10  ;;  %v773_v14 = vsel %vm59_vm1, %v757_v3, -inf  ;;  %v770_v15 = vsel %vm59_vm1, %v756_v5, -inf }
 0x5e4   :  { %v5671_v16 = vpop.f32.mrf.mxu1  ;;  %774 = vmax.xlane.f32.xlu0 %v773_v14  ;;  %771 = vmax.xlane.f32.xlu1 %v770_v15  ;;  %v5676_v17 = vpop.f32.mrf.mxu0 }
 0x5e5   :  { %v758_v18 = vadd.f32 %v5199_v42, %v744_v11  ;;  %v759_v20 = vadd.f32 %v5199_v42, %v745_v13 }
 0x5e6   :  { %v735_v21 = vpop.f32.mrf.mxu0 }
 0x5e7   :  { %v746_v22 = vmul.f32 0.35355338, %v735_v21  ;;  %v776_v24 = vsel %vm59_vm1, %v758_v18, -inf  ;;  %v779_v25 = vsel %vm59_vm1, %v759_v20, -inf }
 0x5e8   :  { %777 = vmax.xlane.f32.xlu1 %v776_v24  ;;  %780 = vmax.xlane.f32.xlu0 %v779_v25  ;;  %v5677_v26 = vpop.f32.mrf.mxu0 }
 0x5e9   :  { %v760_v27 = vadd.f32 %v5199_v42, %v746_v22 }
 0x5eb   :  { %v782_v28 = vsel %vm59_vm1, %v760_v27, -inf }
 0x5ec   :  { %783 = vmax.xlane.f32.xlu1 %v782_v28 }
 0x5fa   :  { %v763_v29 = vpop.xlane.xlu1 %762 }
 0x5fb   :  { %v785_v31 = vsub.f32 %v753_v46, %v763_v29 }
 0x5fd   :  { %900 = vrot.lane.b32.xlu1 %v6954_v23, %s6761_s20  ;;  %v793_v34 = vmul.f32 1.442695, %v785_v31 }
 0x5fe   :  { %853 = vrot.lane.b32.xlu0 %v6950_v19, %s6761_s20  ;;  %v766_v32 = vpop.xlane.xlu0 %765 }
 0x5ff   :  { %v786_v35 = vsub.f32 %v754_v52, %v766_v32  ;;  %6546 = vpow2.f32 %v793_v34 }
 0x601   :  { %v795_v36 = vmul.f32 1.442695, %v786_v35 }
 0x603   :  { %6548 = vpow2.f32 %v795_v36 }
 0x60c   :  { %v6547_v38 = vpop.eup %6546 }
 0x60d   :  { %v809_v39 = vsel %vm59_vm1, %v6547_v38, 0.0 }
 0x610   :  { %v6549_v40 = vpop.eup %6548 }
 0x611   :  { %v812_v41 = vsel %vm59_vm1, %v6549_v40, 0.0 }
 0x61d   :  { %810 = vadd.xlane.f32.xlu0 %v809_v39 }
 0x621   :  { %813 = vadd.xlane.f32.xlu1 %v812_v41 }
 0x669   :  { %v769_v23 = vpop.xlane.xlu0 %768 }
 0x66a   :  { %v787_v42 = vsub.f32 %v755_v58, %v769_v23 }
 0x66c   :  { %v797_v43 = vmul.f32 1.442695, %v787_v42 }
 0x66d   :  { %v775_v19 = vpop.xlane.xlu0 %774  ;;  %v772_v44 = vpop.xlane.xlu1 %771 }
 0x66e   :  { %6550 = vpow2.f32 %v797_v43  ;;  %v789_v46 = vsub.f32 %v757_v3, %v775_v19  ;;  %v788_v47 = vsub.f32 %v756_v5, %v772_v44 }
 0x670   :  { %v801_v48 = vmul.f32 1.442695, %v789_v46  ;;  %v799_v49 = vmul.f32 1.442695, %v788_v47 }
 0x671   :  { %v778_v51 = vpop.xlane.xlu1 %777  ;;  %v781_v52 = vpop.xlane.xlu0 %780 }
 0x672   :  { %6552 = vpow2.f32 %v801_v48  ;;  %v790_v53 = vsub.f32 %v758_v18, %v778_v51  ;;  %v791_v55 = vsub.f32 %v759_v20, %v781_v52 }
 0x673   :  { %6554 = vpow2.f32 %v799_v49 }
 0x674   :  { %v803_v56 = vmul.f32 1.442695, %v790_v53  ;;  %v805_v57 = vmul.f32 1.442695, %v791_v55  ;;  %v358_v55 = vld [vmem:[%s8497_s5 + $0x10] sm:$0xff] }
 0x675   :  { %v854_v59 = vpop.permute.xlu0 %853  ;;  %v784_v60 = vpop.xlane.xlu1 %783 }
 0x676   :  { %6556 = vpow2.f32 %v803_v56  ;;  %v792_v58 = vsub.f32 %v760_v27, %v784_v60  ;;  %5679 = vmatpush3.bf16.msra.mxu1 %v854_v59  ;;  %v359_v56 = vld [vmem:[%s8497_s5 + $0x18] sm:$0xff] }
 0x677   :  { %6558 = vpow2.f32 %v805_v57  ;;  %5690 = vmatprep.subr.bf16.mxu1 %v6752_v0  ;;  %v7039_v57 = vpack.c.bf16 %v359_v56, %v358_v55 }
 0x678   :  { %v807_v61 = vmul.f32 1.442695, %v792_v58  ;;  %v356_v58 = vld [vmem:[%s8497_s5] sm:$0xff] }
 0x679   :  { %v901_v62 = vpop.permute.xlu1 %900 }
 0x67a   :  { %6560 = vpow2.f32 %v807_v61  ;;  %5685 = vmatpush3.bf16.msra.mxu0 %v901_v62  ;;  %v357_v61 = vld [vmem:[%s8497_s5 + $0x8] sm:$0xff] }
 0x67b   :  { %v6551_v63 = vpop.eup %6550  ;;  %5696 = vmatprep.subr.bf16.mxu0 %v6752_v0  ;;  %v7049_v62 = vpack.c.bf16 %v357_v61, %v356_v58  ;;  %v340_v58 = vld [vmem:[%s8495_s4 + $0x20] sm:$0xff] }
 0x67c   :  { %v815_v1 = vsel %vm59_vm1, %v6551_v63, 0.0 }
 0x67d   :  { %816 = vadd.xlane.f32.xlu0 %v815_v1 }
 0x67f   :  { %v6553_v2 = vpop.eup %6552 }
 0x680   :  { %v6555_v3 = vpop.eup %6554  ;;  %v821_v5 = vsel %vm59_vm1, %v6553_v2, 0.0 }
 0x681   :  { %822 = vadd.xlane.f32.xlu0 %v821_v5  ;;  %v818_v7 = vsel %vm59_vm1, %v6555_v3, 0.0 }
 0x682   :  { %819 = vadd.xlane.f32.xlu1 %v818_v7 }
 0x683   :  { %v6557_v10 = vpop.eup %6556 }
 0x684   :  { %v6559_v11 = vpop.eup %6558  ;;  %v824_v13 = vsel %vm59_vm1, %v6557_v10, 0.0 }
 0x685   :  { %v827_v14 = vsel %vm59_vm1, %v6559_v11, 0.0 }
 0x686   :  { %828 = vadd.xlane.f32.xlu0 %v827_v14  ;;  %825 = vadd.xlane.f32.xlu1 %v824_v13 }
 0x687   :  { %v6561_v15 = vpop.eup %6560 }
 0x688   :  { %v830_v16 = vsel %vm59_vm1, %v6561_v15, 0.0 }
 0x68a   :  { %831 = vadd.xlane.f32.xlu1 %v830_v16 }
 0x69b   :  { %947 = vrot.lane.b32.xlu1 %v6958_v30, %s6761_s20 }
 0x69c   :  { %994 = vrot.lane.b32.xlu0 %v6963_v33, %s6761_s20 }
 0x6a6   :  { %v811_v17 = vpop.xlane.xlu0 %810 }
 0x6a7   :  { %6562 = vrcp.f32 %v811_v17 }
 0x6aa   :  { %v814_v18 = vpop.xlane.xlu1 %813 }
 0x6ab   :  { %6564 = vrcp.f32 %v814_v18 }
 0x6b4   :  { %v6563_v20 = vpop.eup %6562 }
 0x6b5   :  { %v841_v22 = vmul.f32 %v6563_v20, %v6547_v38 }
 0x6b8   :  { %v6565_v21 = vpop.eup %6564 }
 0x6b9   :  { %v842_v24 = vmul.f32 %v6565_v21, %v6549_v40 }
 0x6bb   :  { %v849_v25 = vpack.c.bf16 %v842_v24, %v841_v22 }
 0x6bd   :  { %5681 = vmatmul.mubr.msk.bf16.vlgmr.msra.gmra.mxu1 %vm59_vm1, %v849_v25 }
 0x6be   :  { %5692 = vmatprep.mubr.msk.bf16.mxu1 %vm6753_vm0, %v6752_v0 }
 0x706   :  { %v817_v26 = vpop.xlane.xlu0 %816 }
 0x707   :  { %6566 = vrcp.f32 %v817_v26 }
 0x70a   :  { %v823_v30 = vpop.xlane.xlu0 %822 }
 0x70b   :  { %v820_v27 = vpop.xlane.xlu1 %819 }
 0x70c   :  { %6568 = vrcp.f32 %v820_v27 }
 0x70d   :  { %6570 = vrcp.f32 %v823_v30 }
 0x70f   :  { %v829_v33 = vpop.xlane.xlu0 %828  ;;  %v826_v28 = vpop.xlane.xlu1 %825 }
 0x710   :  { %6572 = vrcp.f32 %v826_v28 }
 0x711   :  { %6574 = vrcp.f32 %v829_v33 }
 0x713   :  { %v832_v29 = vpop.xlane.xlu1 %831  ;;  %v995_v41 = vpop.permute.xlu0 %994 }
 0x714   :  { %6576 = vrcp.f32 %v832_v29  ;;  %v6567_v31 = vpop.eup %6566 }
 0x715   :  { %v843_v35 = vmul.f32 %v6567_v31, %v6551_v63 }
 0x717   :  { %v948_v32 = vpop.permute.xlu1 %947 }
 0x718   :  { %5691 = vmatpush3.bf16.msra.mxu1 %v948_v32 }
 0x719   :  { %v6569_v34 = vpop.eup %6568  ;;  %5702 = vmatprep.subr.bf16.mxu1 %v6752_v0 }
 0x71a   :  { %v844_v36 = vmul.f32 %v6569_v34, %v6555_v3  ;;  %v6571_v38 = vpop.eup %6570 }
 0x71b   :  { %v845_v42 = vmul.f32 %v6571_v38, %v6553_v2 }
 0x71c   :  { %v850_v39 = vpack.c.bf16 %v844_v36, %v843_v35  ;;  %v5204_v36 = vld [vmem:[%s8495_s4 + $0x43] ss:$0 sm:$0xff] }
 0x71d   :  { %v6573_v40 = vpop.eup %6572 }
 0x71e   :  { %5687 = vmatmul.mubr.msk.bf16.vlgmr.msra.gmra.mxu0 %vm59_vm1, %v850_v39  ;;  %v6575_v23 = vpop.eup %6574  ;;  %v846_v43 = vmul.f32 %v6573_v40, %v6557_v10 }
 0x71f   :  { %5697 = vmatpush3.bf16.msra.mxu0 %v995_v41  ;;  %5698 = vmatprep.mubr.msk.bf16.mxu0 %vm6753_vm0, %v6752_v0  ;;  %v847_v46 = vmul.f32 %v6575_v23, %v6559_v11 }
 0x720   :  { %5710 = vmatprep.subr.bf16.mxu0 %v6752_v0  ;;  %v851_v44 = vpack.c.bf16 %v846_v43, %v845_v42 }
 0x721   :  { %v6577_v19 = vpop.eup %6576 }
 0x722   :  { %v848_v47 = vmul.f32 %v6577_v19, %v6561_v15  ;;  %5693 = vmatmul.mubr.msk.bf16.vlgmr.msra.gmra.mxu1 %vm59_vm1, %v851_v44 }
 0x723   :  { %5706 = vmatprep.mubr.msk.bf16.mxu1 %vm6753_vm0, %v6752_v0  ;;  %5703 = vmatpush3.bf16.msra.mxu1 %v7039_v57 }
 0x724   :  { %v852_v48 = vpack.c.bf16 %v848_v47, %v847_v46  ;;  %5704 = vmatprep.subr.bf16.mxu1 %v6752_v0 }
 0x726   :  { %5699 = vmatmul.mubr.msk.bf16.vlgmr.msra.gmra.mxu0 %vm59_vm1, %v852_v48 }
 0x727   :  { %5714 = vmatprep.mubr.msk.bf16.mxu0 %vm6753_vm0, %v6752_v0  ;;  %5705 = vmatpush3.bf16.msra.mxu1 %v7049_v62 }
 0x728   :  { %5718 = vmatprep.subr.bf16.mxu1 %v6752_v0 }
 0x77d   :  { %v893_v49 = vpop.f32.mrf.mxu1 }
 0x77f   :  { %v5682_v51 = vpop.f32.mrf.mxu1 }
 0x781   :  { %v896_v52 = vpop.f32.mrf.mxu1 }
 0x783   :  { %v5683_v53 = vpop.f32.mrf.mxu1 }
 0x7de   :  { %v940_v59 = vpop.f32.mrf.mxu0 }
 0x7e0   :  { %v5688_v60 = vpop.f32.mrf.mxu0 }
 0x7e1   :  { %v343_v60 = vld [vmem:[%s8495_s4 + $0x38] sm:$0xff] }
 0x7e2   :  { %v943_v63 = vpop.f32.mrf.mxu0  ;;  %v987_v2 = vpop.f32.mrf.mxu1 }
 0x7e3   :  { %v6333_v1 = vpack.i.bf16 %v943_v63, %v940_v59  ;;  %v342_v59 = vld [vmem:[%s8495_s4 + $0x30] sm:$0xff]  ;;  %v341_v63 = vld [vmem:[%s8495_s4 + $0x28] sm:$0xff] }
 0x7e4   :  { %v5689_v3 = vpop.f32.mrf.mxu0  ;;  %v5694_v5 = vpop.f32.mrf.mxu1  ;;  %v7091_v61 = vpack.c.bf16 %v343_v60, %v342_v59 }
 0x7e5   :  { %6334 = vrot.lane.b32.xlu1 %v6333_v1, %s6762_s28  ;;  %v7097_v1 = vpack.c.bf16 %v341_v63, %v340_v58  ;;  %v369_v3 = vld [vmem:[%s8497_s5 + $0x58] sm:$0xff]  ;;  %v5210_v63 = vld [vmem:[%s8495_s4 + $0x47] ss:$0 sm:$0xff] }
 0x7e6   :  { %v1034_v7 = vpop.f32.mrf.mxu0  ;;  %v990_v10 = vpop.f32.mrf.mxu1  ;;  %5711 = vmatpush3.bf16.msra.mxu0 %v7091_v61 }
 0x7e7   :  { %v6338_v11 = vpack.i.bf16 %v990_v10, %v987_v2  ;;  %5712 = vmatprep.subr.bf16.mxu0 %v6752_v0  ;;  %v368_v2 = vld [vmem:[%s8497_s5 + $0x50] sm:$0xff] }
 0x7e8   :  { %v5700_v13 = vpop.f32.mrf.mxu0  ;;  %v5695_v14 = vpop.f32.mrf.mxu1  ;;  %v7108_v5 = vpack.c.bf16 %v369_v3, %v368_v2 }
 0x7e9   :  { %6339 = vrot.lane.b32.xlu0 %v6338_v11, %s6763_s29 }
 0x7ea   :  { %v1037_v15 = vpop.f32.mrf.mxu0  ;;  %5713 = vmatpush3.bf16.msra.mxu0 %v7097_v1 }
 0x7eb   :  { %v6343_v16 = vpack.i.bf16 %v1037_v15, %v1034_v7  ;;  %5730 = vmatprep.subr.bf16.mxu0 %v6752_v0 }
 0x7ec   :  { %v5701_v17 = vpop.f32.mrf.mxu0 }
 0x7ed   :  { %6344 = vrot.lane.b32.xlu1 %v6343_v16, %s6764_s30 }
 0x857   :  { %v6335_v18 = vpop.permute.xlu1 %6334 }
 0x858   :  { %v6337_v20 = vunpack.i.h.bf16 %v6335_v18  ;;  %v6336_v21 = vunpack.i.l.bf16 %v6335_v18 }
 0x85a   :  { %v1066_v30 = vsel %vm541_vm12, %v896_v52, %v6337_v20  ;;  %v1065_v27 = vsel %vm541_vm12, %v893_v49, %v6336_v21 }
 0x85b   :  { %v6340_v22 = vpop.permute.xlu0 %6339 }
 0x85c   :  { %v6342_v24 = vunpack.i.h.bf16 %v6340_v22  ;;  %v6341_v25 = vunpack.i.l.bf16 %v6340_v22 }
 0x85e   :  { %v1067_v29 = vsel %vm59_vm1, %v1065_v27, %v6341_v25  ;;  %v1068_v31 = vsel %vm59_vm1, %v1066_v30, %v6342_v24  ;;  %v5206_v27 = vld [vmem:[%s8495_s4 + $0x44] ss:$0 sm:$0xff] }
 0x85f   :  { %v6345_v26 = vpop.permute.xlu1 %6344 }
 0x860   :  { %v6347_v33 = vunpack.i.h.bf16 %v6345_v26  ;;  %v6346_v28 = vunpack.i.l.bf16 %v6345_v26 }
 0x862   :  { %v1071_v32 = vsel %vm1069_vm13, %v1068_v31, %v6347_v33  ;;  %v1070_v34 = vsel %vm1069_vm13, %v1067_v29, %v6346_v28 }
 0x863   :  { %v1072_v35 = vpack.c.bf16 %v1071_v32, %v1070_v34  ;;  %v5207_v34 = vld [vmem:[%s8495_s4 + $0x45] ss:$0 sm:$0xff] }
 0x865   :  { %5707 = vmatmul.mubr.msk.bf16.vlgmr.msra.gmra.mxu1 %vm410_vm7, %v1072_v35 }
 0x866   :  { %5726 = vmatprep.mubr.msk.bf16.mxu1 %vm6753_vm0, %v6752_v0  ;;  %5719 = vmatpush3.bf16.msra.mxu1 %v7108_v5 }
 0x867   :  { %5720 = vmatprep.subr.bf16.mxu1 %v6752_v0 }
 0x925   :  { %v1114_v38 = vpop.f32.mrf.mxu1 }
 0x926   :  { %v1115_v39 = vadd.f32 %v5204_v36, %v1114_v38 }
 0x927   :  { %v5708_v40 = vpop.f32.mrf.mxu1 }
 0x928   :  { %v7069_v41 = vadd.f32 %v1115_v39, %v6890_v50  ;;  %v366_v40 = vld [vmem:[%s8497_s5 + $0x40] sm:$0xff] }
 0x929   :  { %v1117_v23 = vpop.f32.mrf.mxu1 }
 0x92a   :  { %v1118_v42 = vadd.f32 %v5204_v36, %v1117_v23  ;;  %v1123_v43 = vsel %vm410_vm7, %v7069_v41, 0.0  ;;  %v367_v23 = vld [vmem:[%s8497_s5 + $0x48] sm:$0xff] }
 0x92b   :  { %1124 = vadd.xlane.f32.xlu0 %v1123_v43  ;;  %v5709_v19 = vpop.f32.mrf.mxu1  ;;  %v364_v43 = vld [vmem:[%s8497_s5 + $0x30] sm:$0xff] }
 0x92c   :  { %v7074_v44 = vadd.f32 %v1118_v42, %v6894_v54  ;;  %v7127_v42 = vpack.c.bf16 %v367_v23, %v366_v40  ;;  %v365_v19 = vld [vmem:[%s8497_s5 + $0x38] sm:$0xff]  ;;  %v375_v40 = vld [vmem:[%s8497_s5 + $0x68] sm:$0xff] }
 0x92e   :  { %v1126_v46 = vsel %vm410_vm7, %v7074_v44, 0.0  ;;  %5721 = vmatpush3.bf16.msra.mxu1 %v7127_v42 }
 0x92f   :  { %1127 = vadd.xlane.f32.xlu1 %v1126_v46  ;;  %5722 = vmatprep.subr.bf16.mxu1 %v6752_v0  ;;  %v7137_v46 = vpack.c.bf16 %v365_v19, %v364_v43 }
 0x932   :  { %5723 = vmatpush3.bf16.msra.mxu1 %v7137_v46 }
 0x933   :  { %5724 = vmatprep.subr.bf16.mxu1 %v6752_v0 }
 0x9b4   :  { %v1125_v47 = vpop.xlane.xlu0 %1124 }
 0x9b5   :  { %v1129_v48 = vmul.f32 0.03125, %v1125_v47  ;;  %v362_v47 = vld [vmem:[%s8497_s5 + $0x20] sm:$0xff] }
 0x9b7   :  { %v1131_v49 = vsub.f32 %v7069_v41, %v1129_v48  ;;  %v363_v48 = vld [vmem:[%s8497_s5 + $0x28] sm:$0xff] }
 0x9b8   :  { %v1128_v50 = vpop.xlane.xlu1 %1127 }
 0x9b9   :  { %v1130_v51 = vmul.f32 0.03125, %v1128_v50  ;;  %v1133_v52 = vmul.f32 %v1131_v49, %v1131_v49  ;;  %v1165_v28 = vmul.f32 %v5206_v27, %v1131_v49  ;;  %v7147_v49 = vpack.c.bf16 %v363_v48, %v362_v47  ;;  %v5208_v50 = vld [vmem:[%s8495_s4 + $0x46] ss:$0 sm:$0xff] }
 0x9bb   :  { %v1132_v53 = vsub.f32 %v7074_v44, %v1130_v51  ;;  %v1135_v55 = vsel %vm410_vm7, %v1133_v52, 0.0  ;;  %5725 = vmatpush3.bf16.msra.mxu1 %v7147_v49 }
 0x9bc   :  { %1136 = vadd.xlane.f32.xlu0 %v1135_v55  ;;  %5760 = vmatprep.subr.bf16.mxu1 %v6752_v0 }
 0x9bd   :  { %v1134_v56 = vmul.f32 %v1132_v53, %v1132_v53  ;;  %v1166_v29 = vmul.f32 %v5206_v27, %v1132_v53  ;;  %v378_v27 = vld [vmem:[%s8497_s5 + $0x80] sm:$0xff] }
 0x9bf   :  { %v1138_v54 = vsel %vm410_vm7, %v1134_v56, 0.0 }
 0x9c0   :  { %1139 = vadd.xlane.f32.xlu0 %v1138_v54 }
 0xa45   :  { %v1137_v7 = vpop.xlane.xlu0 %1136 }
 0xa46   :  { %v1141_v10 = vmul.f32 0.032258064, %v1137_v7 }
 0xa48   :  { %6578 = vrsqrt.f32 %v1141_v10  ;;  %vm1145_vm14 = vcmp.eq.f32.partialorder %v1141_v10, inf  ;;  %v1148_v16 = vand.u32 2147483648, %v1141_v10  ;;  %vm1147_vm15 = vcmp.eq.f32.partialorder %v1141_v10, 0.0 }
 0xa49   :  { %v1140_v11 = vpop.xlane.xlu0 %1139 }
 0xa4a   :  { %v1142_v13 = vmul.f32 0.032258064, %v1140_v11 }
 0xa4c   :  { %6580 = vrsqrt.f32 %v1142_v13  ;;  %vm1152_vm2 = vcmp.eq.f32.partialorder %v1142_v13, inf  ;;  %v1155_v24 = vand.u32 2147483648, %v1142_v13  ;;  %vm1154_vm3 = vcmp.eq.f32.partialorder %v1142_v13, 0.0 }
 0xa55   :  { %v6579_v14 = vpop.eup %6578 }
 0xa56   :  { %v1144_v15 = vmul.f32 %v6579_v14, %v1141_v10 }
 0xa58   :  { %v1146_v17 = vsel %vm1145_vm14, %v1141_v10, %v1144_v15 }
 0xa59   :  { %v6581_v18 = vpop.eup %6580  ;;  %v1149_v20 = vsel %vm1147_vm15, %v1148_v16, %v1146_v17  ;;  %v382_v17 = vld [vmem:[%s8497_s5 + $0xa0] sm:$0xff] }
 0xa5a   :  { %v1157_v21 = vadd.f32 1e-06, %v1149_v20  ;;  %v1151_v22 = vmul.f32 %v6581_v18, %v1142_v13  ;;  %v383_v20 = vld [vmem:[%s8497_s5 + $0xa8] sm:$0xff] }
 0xa5c   :  { %6582 = vrcp.f32 %v1157_v21  ;;  %v1153_v25 = vsel %vm1152_vm2, %v1142_v13, %v1151_v22  ;;  %v7196_v21 = vpack.c.bf16 %v383_v20, %v382_v17  ;;  %v380_v22 = vld [vmem:[%s8497_s5 + $0x90] sm:$0xff] }
 0xa5d   :  { %v1156_v26 = vsel %vm1154_vm3, %v1155_v24, %v1153_v25  ;;  %v381_v24 = vld [vmem:[%s8497_s5 + $0x98] sm:$0xff] }
 0xa5e   :  { %v1158_v30 = vadd.f32 1e-06, %v1156_v26  ;;  %v7206_v25 = vpack.c.bf16 %v381_v24, %v380_v22 }
 0xa60   :  { %6584 = vrcp.f32 %v1158_v30 }
 0xa69   :  { %v6583_v33 = vpop.eup %6582 }
 0xa6a   :  { %v1167_v31 = vmul.f32 %v6583_v33, %v1165_v28  ;;  %v379_v33 = vld [vmem:[%s8497_s5 + $0x88] sm:$0xff] }
 0xa6b   :  { %v7217_v28 = vpack.c.bf16 %v379_v33, %v378_v27 }
 0xa6c   :  { %v1173_v36 = vadd.f32 %v5207_v34, %v1167_v31  ;;  %v376_v31 = vld [vmem:[%s8497_s5 + $0x70] sm:$0xff] }
 0xa6d   :  { %v6585_v32 = vpop.eup %6584 }
 0xa6e   :  { %v1168_v35 = vmul.f32 %v6585_v32, %v1166_v29  ;;  %v377_v32 = vld [vmem:[%s8497_s5 + $0x78] sm:$0xff] }
 0xa70   :  { %v1174_v38 = vadd.f32 %v5207_v34, %v1168_v35  ;;  %v7226_v34 = vpack.c.bf16 %v377_v32, %v376_v31 }
 0xa72   :  { %v1175_v39 = vpack.c.bf16 %v1174_v38, %v1173_v36 }
 0xa74   :  { %5715 = vmatmul.mubr.msk.bf16.vlgmr.msra.gmra.mxu0 %vm410_vm7, %v1175_v39  ;;  %v374_v39 = vld [vmem:[%s8497_s5 + $0x60] sm:$0xff] }
 0xa75   :  { %5732 = vmatprep.mubr.msk.bf16.mxu0 %vm6753_vm0, %v6752_v0  ;;  %v7237_v23 = vpack.c.bf16 %v375_v40, %v374_v39 }
 0xb34   :  { %v1217_v51 = vpop.f32.mrf.mxu0 }
 0xb35   :  { %v1218_v53 = vadd.f32 %v5208_v50, %v1217_v51 }
 0xb36   :  { %v5716_v52 = vpop.f32.mrf.mxu0 }
 0xb37   :  { %v1224_v59 = vmax.f32 %v1218_v53, 0.0 }
 0xb38   :  { %v1220_v55 = vpop.f32.mrf.mxu0 }
 0xb39   :  { %v1221_v56 = vadd.f32 %v5208_v50, %v1220_v55  ;;  %v6730_v55 = vld [vmem:[%s8494_s3 + $0x49] ss:$0 sm:$0xff] }
 0xb3a   :  { %v5717_v54 = vpop.f32.mrf.mxu0 }
 0xb3b   :  { %v1225_v60 = vmax.f32 %v1221_v56, 0.0  ;;  %v7247_v56 = vadd.f32 %v6730_v55, %v6940_v4  ;;  %v7250_v54 = vadd.f32 %v6730_v55, %v6942_v6 }
 0xb3d   :  { %v1226_v58 = vpack.c.bf16 %v1225_v60, %v1224_v59  ;;  %v1546_v59 = vsel %vm410_vm7, %v7247_v56, 0.0  ;;  %v1549_v60 = vsel %vm410_vm7, %v7250_v54, 0.0 }
 0xb3f   :  { %5727 = vmatmul.mubr.msk.bf16.vlgmr.msra.gmra.mxu1 %vm1231_vm4, %v1226_v58 }
 0xb40   :  { %5762 = vmatprep.mubr.msk.bf16.mxu1 %vm6753_vm0, %v6752_v0 }
 0xbff   :  { %v1269_v2 = vpop.f32.mrf.mxu1 }
 0xc00   :  { %v1270_v7 = vadd.f32 %v5210_v63, %v1269_v2 }
 0xc01   :  { %v5728_v3 = vpop.f32.mrf.mxu1 }
 0xc02   :  { %v7161_v14 = vadd.f32 %v1270_v7, %v7069_v41  ;;  %v384_v41 = vld [vmem:[%s8497_s5 + $0xb0] sm:$0xff] }
 0xc03   :  { %v1272_v10 = vpop.f32.mrf.mxu1 }
 0xc04   :  { %v1273_v11 = vadd.f32 %v5210_v63, %v1272_v10 }
 0xc05   :  { %v5729_v13 = vpop.f32.mrf.mxu1 }
 0xc06   :  { %v7164_v15 = vadd.f32 %v1273_v11, %v7074_v44  ;;  %v385_v44 = vld [vmem:[%s8497_s5 + $0xb8] sm:$0xff] }
 0xc07   :  { %v7190_v18 = vpack.c.bf16 %v385_v44, %v384_v41 }
 0xc08   :  { %v1278_v16 = vpack.c.bf16 %v7164_v15, %v7161_v14 }
 0xc0a   :  { %5731 = vmatpush3.bf16.msra.mxu0 %v1278_v16 }
 0xc0b   :  { %5744 = vmatprep.subr.bf16.mxu0 %v6752_v0 }
 0xc0d   :  { %5733 = vmatmul.mubr.msk.bf16.vlgmr.msra.gmra.mxu0 %vm59_vm1, %v6825_v8 }
 0xc0e   :  { %5736 = vmatprep.mubr.msk.bf16.mxu0 %vm6753_vm0, %v6752_v0  ;;  %5745 = vmatpush3.bf16.msra.mxu0 %v7190_v18 }
 0xc0f   :  { %5746 = vmatprep.subr.bf16.mxu0 %v6752_v0 }
 0xc12   :  { %5747 = vmatpush3.bf16.msra.mxu0 %v7196_v21 }
 0xc13   :  { %5748 = vmatprep.subr.bf16.mxu0 %v6752_v0 }
 0xc15   :  { %5737 = vmatmul.mubr.msk.bf16.gmra.mxu0 %vm59_vm1, %v6845_v12 }
 0xc16   :  { %5740 = vmatprep.mubr.msk.bf16.mxu0 %vm6753_vm0, %v6752_v0  ;;  %5749 = vmatpush3.bf16.msra.mxu0 %v7206_v25 }
 0xc17   :  { %5750 = vmatprep.subr.bf16.mxu0 %v6752_v0 }
 0xc1a   :  { %5751 = vmatpush3.bf16.msra.mxu0 %v7217_v28 }
 0xc1b   :  { %5752 = vmatprep.subr.bf16.mxu0 %v6752_v0 }
 0xc1d   :  { %5741 = vmatmul.mubr.msk.bf16.gmra.mxu0 %vm59_vm1, %v6827_v9 }
 0xc1e   :  { %5756 = vmatprep.mubr.msk.bf16.mxu0 %vm6753_vm0, %v6752_v0  ;;  %5753 = vmatpush3.bf16.msra.mxu0 %v7226_v34 }
 0xc1f   :  { %5754 = vmatprep.subr.bf16.mxu0 %v6752_v0 }
 0xc22   :  { %5755 = vmatpush3.bf16.msra.mxu0 %v7237_v23 }
 0xc23   :  { %5790 = vmatprep.subr.bf16.mxu0 %v6752_v0 }
 0xccd   :  { %v1313_v26 = vpop.f32.mrf.mxu0 }
 0xccf   :  { %v5734_v30 = vpop.f32.mrf.mxu0 }
 0xcd1   :  { %v1316_v29 = vpop.f32.mrf.mxu0 }
 0xcd3   :  { %v5735_v35 = vpop.f32.mrf.mxu0 }
 0xcd5   :  { %v1321_v36 = vpop.f32.mrf.mxu0 }
 0xcd7   :  { %v5738_v38 = vpop.f32.mrf.mxu0 }
 0xcd9   :  { %v1324_v43 = vpop.f32.mrf.mxu0 }
 0xcda   :  { %v6348_v19 = vpack.i.bf16 %v1324_v43, %v1321_v36 }
 0xcdb   :  { %v5739_v47 = vpop.f32.mrf.mxu0 }
 0xcdc   :  { %6349 = vrot.lane.b32.xlu1 %v6348_v19, %s6765_s18  ;;  %v5217_v19 = vld [vmem:[%s8498_s2] ss:$0 sm:$0xff] }
 0xcdd   :  { %v1329_v48 = vpop.f32.mrf.mxu0 }
 0xcdf   :  { %v5742_v50 = vpop.f32.mrf.mxu0 }
 0xce1   :  { %v1332_v51 = vpop.f32.mrf.mxu0 }
 0xce2   :  { %v6353_v52 = vpack.i.bf16 %v1332_v51, %v1329_v48 }
 0xce3   :  { %v5743_v53 = vpop.f32.mrf.mxu0 }
 0xce4   :  { %6354 = vrot.lane.b32.xlu0 %v6353_v52, %s6761_s20 }
 0xd00   :  { %1547 = vadd.xlane.f32.xlu1 %v1546_v59 }
 0xd03   :  { %1550 = vadd.xlane.f32.xlu0 %v1549_v60 }
 0xd4e   :  { %v6350_v58 = vpop.permute.xlu1 %6349 }
 0xd4f   :  { %v6352_v63 = vunpack.i.h.bf16 %v6350_v58  ;;  %v6351_v2 = vunpack.i.l.bf16 %v6350_v58 }
 0xd51   :  { %v1353_v4 = vsel %vm410_vm7, %v1316_v29, %v6352_v63  ;;  %v1352_v11 = vsel %vm410_vm7, %v1313_v26, %v6351_v2  ;;  %v5215_v29 = vld [vmem:[%s8495_s4 + $0x48] ss:$0 sm:$0xff] }
 0xd56   :  { %v6355_v3 = vpop.permute.xlu0 %6354 }
 0xd57   :  { %v6357_v7 = vunpack.i.h.bf16 %v6355_v3  ;;  %v6356_v10 = vunpack.i.l.bf16 %v6355_v3 }
 0xd59   :  { %v1355_v6 = vsel %vm1231_vm4, %v1353_v4, %v6357_v7  ;;  %v1354_v13 = vsel %vm1231_vm4, %v1352_v11, %v6356_v10 }
 0xd5a   :  { %v1356_v16 = vpack.c.bf16 %v1355_v6, %v1354_v13  ;;  %v6731_v13 = vld [vmem:[%s8495_s4 + $0x40] ss:$0 sm:$0xff] }
 0xd5c   :  { %5757 = vmatmul.mubr.msk.bf16.vlgmr.msra.gmra.mxu0 %vm1361_vm5, %v1356_v16 }
 0xd5d   :  { %5791 = vmatpush3.bf16.msra.mxu0 %v6914_v37  ;;  %5794 = vmatprep.mubr.msk.bf16.mxu0 %vm6753_vm0, %v6752_v0 }
 0xd5e   :  { %5792 = vmatprep.subr.bf16.mxu0 %v6752_v0 }
 0xd61   :  { %5793 = vmatpush3.bf16.msra.mxu0 %v6924_v45 }
 0xd62   :  { %5798 = vmatprep.subr.bf16.mxu0 %v6752_v0 }
 0xd89   :  { %v1548_v41 = vpop.xlane.xlu1 %1547 }
 0xd8a   :  { %v1552_v44 = vmul.f32 0.03125, %v1548_v41 }
 0xd8c   :  { %v1554_v17 = vsub.f32 %v7247_v56, %v1552_v44  ;;  %v1551_v20 = vpop.xlane.xlu0 %1550 }
 0xd8d   :  { %v1553_v22 = vmul.f32 0.03125, %v1551_v20 }
 0xd8e   :  { %v1556_v24 = vmul.f32 %v1554_v17, %v1554_v17  ;;  %v1584_v16 = vmul.f32 %v6731_v13, %v1554_v17  ;;  %v402_v17 = vld [vmem:[%s8497_s5 + $0x110] sm:$0xff] }
 0xd8f   :  { %v1555_v26 = vsub.f32 %v7250_v54, %v1553_v22 }
 0xd90   :  { %v1558_v37 = vsel %vm410_vm7, %v1556_v24, 0.0  ;;  %v6732_v24 = vld [vmem:[%s8495_s4 + $0x41] ss:$0 sm:$0xff] }
 0xd91   :  { %1559 = vadd.xlane.f32.xlu1 %v1558_v37  ;;  %v1557_v30 = vmul.f32 %v1555_v26, %v1555_v26  ;;  %v1585_v41 = vmul.f32 %v6731_v13, %v1555_v26  ;;  %v403_v26 = vld [vmem:[%s8497_s5 + $0x118] sm:$0xff] }
 0xd93   :  { %v1561_v27 = vsel %vm410_vm7, %v1557_v30, 0.0 }
 0xd94   :  { %1562 = vadd.xlane.f32.xlu0 %v1561_v27 }
 0xe1a   :  { %v1560_v33 = vpop.xlane.xlu1 %1559 }
 0xe1b   :  { %v1564_v45 = vmul.f32 0.032258064, %v1560_v33  ;;  %v400_v33 = vld [vmem:[%s8497_s5 + $0x100] sm:$0xff] }
 0xe1c   :  { %v1399_v31 = vpop.f32.mrf.mxu0 }
 0xe1d   :  { %6586 = vrsqrt.f32 %v1564_v45  ;;  %v1563_v32 = vpop.xlane.xlu0 %1562  ;;  %v1400_v35 = vadd.f32 %v5215_v29, %v1399_v31  ;;  %vm1568_vm6 = vcmp.eq.f32.partialorder %v1564_v45, inf  ;;  %v1571_v59 = vand.u32 2147483648, %v1564_v45 }
 0xe1e   :  { %v1565_v36 = vmul.f32 0.032258064, %v1563_v32  ;;  %v5758_v38 = vpop.f32.mrf.mxu0  ;;  %vm1570_vm8 = vcmp.eq.f32.partialorder %v1564_v45, 0.0  ;;  %v398_v32 = vld [vmem:[%s8497_s5 + $0xf0] sm:$0xff] }
 0xe1f   :  { %v1406_v40 = vmax.f32 %v1400_v35, 0.0  ;;  %v399_v35 = vld [vmem:[%s8497_s5 + $0xf8] sm:$0xff] }
 0xe20   :  { %6588 = vrsqrt.f32 %v1565_v36  ;;  %v1402_v39 = vpop.f32.mrf.mxu0  ;;  %vm1575_vm9 = vcmp.eq.f32.partialorder %v1565_v36, inf  ;;  %v1578_v7 = vand.u32 2147483648, %v1565_v36  ;;  %vm1577_vm10 = vcmp.eq.f32.partialorder %v1565_v36, 0.0 }
 0xe21   :  { %v1403_v43 = vadd.f32 %v5215_v29, %v1402_v39  ;;  %v1413_v50 = vadd.f32 %v5217_v19, %v1406_v40  ;;  %v401_v29 = vld [vmem:[%s8497_s5 + $0x108] sm:$0xff] }
 0xe22   :  { %v5759_v47 = vpop.f32.mrf.mxu0  ;;  %v7314_v31 = vpack.c.bf16 %v401_v29, %v400_v33 }
 0xe23   :  { %v1407_v48 = vmax.f32 %v1403_v43, 0.0 }
 0xe25   :  { %v1414_v51 = vadd.f32 %v5217_v19, %v1407_v48 }
 0xe27   :  { %v1415_v52 = vpack.c.bf16 %v1414_v51, %v1413_v50 }
 0xe29   :  { %5761 = vmatpush3.bf16.msra.mxu1 %v1415_v52 }
 0xe2a   :  { %v6587_v53 = vpop.eup %6586  ;;  %5774 = vmatprep.subr.bf16.mxu1 %v6752_v0 }
 0xe2b   :  { %v1567_v55 = vmul.f32 %v6587_v53, %v1564_v45 }
 0xe2c   :  { %5763 = vmatmul.mubr.msk.bf16.vlgmr.msra.gmra.mxu1 %vm59_vm1, %v6825_v8 }
 0xe2d   :  { %v6589_v60 = vpop.eup %6588  ;;  %v1569_v58 = vsel %vm1568_vm6, %v1564_v45, %v1567_v55  ;;  %5766 = vmatprep.mubr.msk.bf16.mxu1 %vm6753_vm0, %v6752_v0  ;;  %v7308_v45 = vpack.c.bf16 %v403_v26, %v402_v17 }
 0xe2e   :  { %v1572_v63 = vsel %vm1570_vm8, %v1571_v59, %v1569_v58  ;;  %v1574_v2 = vmul.f32 %v6589_v60, %v1565_v36  ;;  %v396_v59 = vld [vmem:[%s8497_s5 + $0xe0] sm:$0xff]  ;;  %v397_v60 = vld [vmem:[%s8497_s5 + $0xe8] sm:$0xff] }
 0xe2f   :  { %v1580_v3 = vadd.f32 1e-06, %v1572_v63  ;;  %5775 = vmatpush3.bf16.msra.mxu1 %v7308_v45  ;;  %v7339_v58 = vpack.c.bf16 %v397_v60, %v396_v59 }
 0xe30   :  { %v1576_v10 = vsel %vm1575_vm9, %v1565_v36, %v1574_v2  ;;  %5776 = vmatprep.subr.bf16.mxu1 %v6752_v0  ;;  %v7324_v36 = vpack.c.bf16 %v399_v35, %v398_v32  ;;  %v394_v2 = vld [vmem:[%s8497_s5 + $0xd0] sm:$0xff] }
 0xe31   :  { %6590 = vrcp.f32 %v1580_v3  ;;  %v1579_v4 = vsel %vm1577_vm10, %v1578_v7, %v1576_v10  ;;  %v395_v3 = vld [vmem:[%s8497_s5 + $0xd8] sm:$0xff] }
 0xe32   :  { %v1581_v11 = vadd.f32 1e-06, %v1579_v4  ;;  %v7349_v7 = vpack.c.bf16 %v395_v3, %v394_v2 }
 0xe33   :  { %5777 = vmatpush3.bf16.msra.mxu1 %v7314_v31 }
 0xe34   :  { %6592 = vrcp.f32 %v1581_v11  ;;  %5767 = vmatmul.mubr.msk.bf16.gmra.mxu1 %vm59_vm1, %v6845_v12  ;;  %5778 = vmatprep.subr.bf16.mxu1 %v6752_v0  ;;  %v6733_v11 = vld [vmem:[%s8495_s4 + $0x42] ss:$0 sm:$0xff] }
 0xe35   :  { %5770 = vmatprep.mubr.msk.bf16.mxu1 %vm6753_vm0, %v6752_v0 }
 0xe37   :  { %5779 = vmatpush3.bf16.msra.mxu1 %v7324_v36 }
 0xe38   :  { %5780 = vmatprep.subr.bf16.mxu1 %v6752_v0 }
 0xe3b   :  { %5781 = vmatpush3.bf16.msra.mxu1 %v7339_v58 }
 0xe3c   :  { %5771 = vmatmul.mubr.msk.bf16.gmra.mxu1 %vm59_vm1, %v6827_v9  ;;  %5782 = vmatprep.subr.bf16.mxu1 %v6752_v0 }
 0xe3d   :  { %5786 = vmatprep.mubr.msk.bf16.mxu1 %vm6753_vm0, %v6752_v0 }
 0xe3e   :  { %v6591_v6 = vpop.eup %6590 }
 0xe3f   :  { %v1586_v44 = vmul.f32 %v6591_v6, %v1584_v16  ;;  %5783 = vmatpush3.bf16.msra.mxu1 %v7349_v7  ;;  %v392_v16 = vld [vmem:[%s8497_s5 + $0xc0] sm:$0xff] }
 0xe40   :  { %5784 = vmatprep.subr.bf16.mxu1 %v6752_v0 }
 0xe41   :  { %v6593_v20 = vpop.eup %6592  ;;  %v1588_v37 = vadd.f32 %v6732_v24, %v1586_v44 }
 0xe42   :  { %v1587_v22 = vmul.f32 %v6593_v20, %v1585_v41  ;;  %v393_v41 = vld [vmem:[%s8497_s5 + $0xc8] sm:$0xff] }
 0xe43   :  { %v7362_v20 = vpack.c.bf16 %v393_v41, %v392_v16 }
 0xe44   :  { %v1589_v30 = vadd.f32 %v6732_v24, %v1587_v22 }
 0xe45   :  { %5785 = vmatpush3.bf16.msra.mxu1 %v7362_v20 }
 0xe46   :  { %v1590_v27 = vpack.c.bf16 %v1589_v30, %v1588_v37  ;;  %5804 = vmatprep.subr.bf16.mxu1 %v6752_v0 }
 0xe48   :  { %5795 = vmatmul.mubr.msk.bf16.vlgmr.msra.gmra.mxu0 %vm410_vm7, %v1590_v27 }
 0xe49   :  { %5800 = vmatprep.mubr.msk.bf16.mxu0 %vm6753_vm0, %v6752_v0 }
 0xeec   :  { %v7329_v38 = vpop.f32.mrf.mxu1 }
 0xeee   :  { %v5764_v39 = vpop.f32.mrf.mxu1 }
 0xef0   :  { %v7331_v40 = vpop.f32.mrf.mxu1 }
 0xef2   :  { %v5765_v43 = vpop.f32.mrf.mxu1 }
 0xef4   :  { %v1458_v19 = vpop.f32.mrf.mxu1 }
 0xef6   :  { %v5768_v47 = vpop.f32.mrf.mxu1 }
 0xef8   :  { %v1461_v48 = vpop.f32.mrf.mxu1 }
 0xef9   :  { %v6373_v37 = vpack.i.bf16 %v1461_v48, %v1458_v19 }
 0xefa   :  { %v5769_v50 = vpop.f32.mrf.mxu1 }
 0xefc   :  { %v1466_v51 = vpop.f32.mrf.mxu1 }
 0xefe   :  { %v5772_v52 = vpop.f32.mrf.mxu1 }
 0xf00   :  { %v1469_v53 = vpop.f32.mrf.mxu1 }
 0xf01   :  { %v6378_v24 = vpack.i.bf16 %v1469_v53, %v1466_v51 }
 0xf02   :  { %v5773_v55 = vpop.f32.mrf.mxu1 }
 0xf08   :  { %v1628_v63 = vpop.f32.mrf.mxu0 }
 0xf09   :  { %v1629_v6 = vadd.f32 %v6733_v11, %v1628_v63 }
 0xf0a   :  { %v5796_v10 = vpop.f32.mrf.mxu0 }
 0xf0c   :  { %v1631_v4 = vpop.f32.mrf.mxu0 }
 0xf0d   :  { %v1632_v13 = vadd.f32 %v6733_v11, %v1631_v4 }
 0xf0e   :  { %v5797_v44 = vpop.f32.mrf.mxu0 }
 0xf0f   :  { %v6363_v22 = vpack.i.bf16 %v1632_v13, %v1629_v6  ;;  %v7371_v30 = vpack.c.bf16 %v1632_v13, %v1629_v6 }
 0xf11   :  { %6364 = vrot.lane.b32.xlu0 %v6363_v22, %s6759_s16  ;;  %6359 = vrot.lane.b32.xlu1 %v6363_v22, %s6758_s15 }
 0xf15   :  { %6369 = vrot.lane.b32.xlu1 %v6363_v22, %s6757_s14  ;;  %6379 = vrot.lane.b32.xlu0 %v6378_v24, %s6761_s20 }
 0xf19   :  { %6374 = vrot.lane.b32.xlu1 %v6373_v37, %s6765_s18 }
 0xf1d   :  { %1660 = vrot.lane.b32.xlu1 %v7371_v30, %s6760_s17 }
 0xf83   :  { %v6365_v27 = vpop.permute.xlu0 %6364  ;;  %v6360_v17 = vpop.permute.xlu1 %6359 }
 0xf84   :  { %v6367_v26 = vunpack.i.h.bf16 %v6365_v27  ;;  %v6366_v33 = vunpack.i.l.bf16 %v6365_v27  ;;  %v6362_v29 = vunpack.i.h.bf16 %v6360_v17  ;;  %v6361_v32 = vunpack.i.l.bf16 %v6360_v17  ;;  %v5228_v17 = vld [vmem:[%s8496_s1 + $0x1] ss:$0 sm:$0xff] }
 0xf86   :  { %v7375_v35 = vpack.c.bf16 %v6362_v29, %v6361_v32  ;;  %v7377_v39 = vpack.c.bf16 %v6367_v26, %v6366_v33 }
 0xf87   :  { %v6370_v43 = vpop.permute.xlu1 %6369  ;;  %v6380_v48 = vpop.permute.xlu0 %6379 }
 0xf88   :  { %v6372_v19 = vunpack.i.h.bf16 %v6370_v43  ;;  %v6371_v47 = vunpack.i.l.bf16 %v6370_v43  ;;  %1710 = vrot.lane.b32.xlu0 %v7375_v35, %s6760_s17  ;;  %1760 = vrot.lane.b32.xlu1 %v7377_v39, %s6760_s17  ;;  %v6382_v52 = vunpack.i.h.bf16 %v6380_v48  ;;  %v6381_v53 = vunpack.i.l.bf16 %v6380_v48 }
 0xf8a   :  { %v7383_v50 = vpack.c.bf16 %v6372_v19, %v6371_v47 }
 0xf8b   :  { %v6375_v51 = vpop.permute.xlu1 %6374 }
 0xf8c   :  { %v6377_v55 = vunpack.i.h.bf16 %v6375_v51  ;;  %v6376_v59 = vunpack.i.l.bf16 %v6375_v51  ;;  %1810 = vrot.lane.b32.xlu0 %v7383_v50, %s6760_s17 }
 0xf8e   :  { %v1490_v60 = vsel %vm410_vm7, %v7331_v40, %v6377_v55  ;;  %v1489_v63 = vsel %vm410_vm7, %v7329_v38, %v6376_v59 }
 0xf8f   :  { %v1491_v2 = vsel %vm1231_vm4, %v1489_v63, %v6381_v53  ;;  %v1492_v3 = vsel %vm1231_vm4, %v1490_v60, %v6382_v52  ;;  %v1661_v10 = vpop.permute.xlu1 %1660 }
 0xf90   :  { %v1493_v4 = vpack.c.bf16 %v1492_v3, %v1491_v2  ;;  %v1666_v11 = vsel %vm541_vm12, %v1661_v10, 0 }
 0xf91   :  { %5799 = vmatpush3.bf16.xpose.msra.mxu0 %v1666_v11 }
 0xf92   :  { %5787 = vmatmul.mubr.msk.bf16.vlgmr.msra.gmra.mxu1 %vm1361_vm5, %v1493_v4  ;;  %5810 = vmatprep.subr.bf16.mxu0 %v6752_v0 }
 0xf93   :  { %5806 = vmatprep.mubr.msk.bf16.mxu1 %vm6753_vm0, %v6752_v0 }
 0xf98   :  { %5801 = vmatmul.mubr.msk.bf16.vlgmr.msra.gmra.mxu0 %vm541_vm12, %v7371_v30 }
 0xf99   :  { %5812 = vmatprep.mubr.msk.bf16.mxu0 %vm6753_vm0, %v6752_v0 }
 0xffa   :  { %v1711_v38 = vpop.permute.xlu0 %1710  ;;  %v1761_v40 = vpop.permute.xlu1 %1760 }
 0xffb   :  { %v1716_v6 = vsel %vm541_vm12, %v1711_v38, 0  ;;  %v1766_v13 = vsel %vm541_vm12, %v1761_v40, 0 }
 0xffc   :  { %5805 = vmatpush3.bf16.xpose.msra.mxu1 %v1716_v6  ;;  %5811 = vmatpush3.bf16.xpose.msra.mxu0 %v1766_v13 }
 0xffd   :  { %5816 = vmatprep.subr.bf16.mxu1 %v6752_v0  ;;  %5822 = vmatprep.subr.bf16.mxu0 %v6752_v0 }
 0xffe   :  { %v1811_v16 = vpop.permute.xlu0 %1810 }
 0xfff   :  { %v1816_v41 = vsel %vm541_vm12, %v1811_v16, 0 }
0x1003   :  { %5807 = vmatmul.mubr.msk.bf16.vlgmr.msra.gmra.mxu1 %vm541_vm12, %v7375_v35  ;;  %5813 = vmatmul.mubr.msk.bf16.vlgmr.msra.gmra.mxu0 %vm541_vm12, %v7377_v39 }
0x1004   :  { %5817 = vmatpush3.bf16.xpose.msra.mxu1 %v1816_v41  ;;  %5818 = vmatprep.mubr.msk.bf16.mxu1 %vm6753_vm0, %v6752_v0 }
0x1005   :  { %5828 = vmatprep.subr.bf16.mxu1 %v6752_v0  ;;  %5824 = vmatprep.mubr.msk.bf16.mxu0 %vm6753_vm0, %v6752_v0 }
0x100b   :  { %5819 = vmatmul.mubr.msk.bf16.vlgmr.msra.gmra.mxu1 %vm541_vm12, %v7383_v50 }
0x100c   :  { %5830 = vmatprep.mubr.msk.bf16.mxu1 %vm6753_vm0, %v6752_v0 }
0x1052   :  { %v7420_v44 = vpop.f32.mrf.mxu1 }
0x1054   :  { %v5788_v22 = vpop.f32.mrf.mxu1 }
0x1056   :  { %v7422_v24 = vpop.f32.mrf.mxu1 }
0x1058   :  { %v5789_v37 = vpop.f32.mrf.mxu1  ;;  %v1702_v27 = vpop.f32.mrf.mxu0 }
0x1059   :  { %v1859_v26 = vmul.f32 0.35355338, %v1702_v27 }
0x105a   :  { %v5802_v33 = vpop.f32.mrf.mxu0 }
0x105b   :  { %v1873_v29 = vadd.f32 %v5228_v17, %v1859_v26 }
0x105c   :  { %v1705_v32 = vpop.f32.mrf.mxu0 }
0x105d   :  { %v1860_v43 = vmul.f32 0.35355338, %v1705_v32  ;;  %v1881_v19 = vsel %vm59_vm1, %v1873_v29, -inf }
0x105e   :  { %1882 = vmax.xlane.f32.xlu1 %v1881_v19  ;;  %v5803_v47 = vpop.f32.mrf.mxu0 }
0x105f   :  { %v1874_v48 = vadd.f32 %v5228_v17, %v1860_v43 }
0x1061   :  { %v1884_v51 = vsel %vm59_vm1, %v1874_v48, -inf }
0x1062   :  { %1885 = vmax.xlane.f32.xlu0 %v1884_v51 }
0x10c3   :  { %v1752_v52 = vpop.f32.mrf.mxu1  ;;  %v1802_v53 = vpop.f32.mrf.mxu0 }
0x10c4   :  { %v1861_v55 = vmul.f32 0.35355338, %v1752_v52  ;;  %v1863_v59 = vmul.f32 0.35355338, %v1802_v53 }
0x10c5   :  { %v5808_v60 = vpop.f32.mrf.mxu1  ;;  %v5814_v63 = vpop.f32.mrf.mxu0 }
0x10c6   :  { %v1875_v2 = vadd.f32 %v5228_v17, %v1861_v55  ;;  %v1877_v40 = vadd.f32 %v5228_v17, %v1863_v59 }
0x10c7   :  { %v1755_v3 = vpop.f32.mrf.mxu1  ;;  %v1805_v10 = vpop.f32.mrf.mxu0 }
0x10c8   :  { %v1862_v4 = vmul.f32 0.35355338, %v1755_v3  ;;  %v1864_v11 = vmul.f32 0.35355338, %v1805_v10  ;;  %v1887_v38 = vsel %vm59_vm1, %v1875_v2, -inf  ;;  %v1893_v27 = vsel %vm59_vm1, %v1877_v40, -inf }
0x10c9   :  { %v5809_v6 = vpop.f32.mrf.mxu1  ;;  %1888 = vmax.xlane.f32.xlu0 %v1887_v38  ;;  %v5815_v13 = vpop.f32.mrf.mxu0 }
0x10ca   :  { %v1876_v16 = vadd.f32 %v5228_v17, %v1862_v4  ;;  %v1878_v26 = vadd.f32 %v5228_v17, %v1864_v11 }
0x10cb   :  { %v1852_v41 = vpop.f32.mrf.mxu1 }
0x10cc   :  { %v1865_v22 = vmul.f32 0.35355338, %v1852_v41  ;;  %v1890_v37 = vsel %vm59_vm1, %v1876_v16, -inf  ;;  %v1896_v51 = vsel %vm59_vm1, %v1878_v26, -inf }
0x10cd   :  { %v5820_v33 = vpop.f32.mrf.mxu1  ;;  %1891 = vmax.xlane.f32.xlu1 %v1890_v37  ;;  %1894 = vmax.xlane.f32.xlu0 %v1893_v27 }
0x10ce   :  { %v1879_v32 = vadd.f32 %v5228_v17, %v1865_v22 }
0x10cf   :  { %v1855_v43 = vpop.f32.mrf.mxu1 }
0x10d0   :  { %v1866_v19 = vmul.f32 0.35355338, %v1855_v43  ;;  %v1899_v47 = vsel %vm59_vm1, %v1879_v32, -inf }
0x10d1   :  { %v5821_v52 = vpop.f32.mrf.mxu1  ;;  %1900 = vmax.xlane.f32.xlu0 %v1899_v47  ;;  %1897 = vmax.xlane.f32.xlu1 %v1896_v51 }
0x10d2   :  { %v1880_v53 = vadd.f32 %v5228_v17, %v1866_v19 }
0x10d4   :  { %v1902_v55 = vsel %vm59_vm1, %v1880_v53, -inf }
0x10d5   :  { %1903 = vmax.xlane.f32.xlu1 %v1902_v55 }
0x10e7   :  { %v1883_v59 = vpop.xlane.xlu1 %1882 }
0x10e8   :  { %v1905_v60 = vsub.f32 %v1873_v29, %v1883_v59 }
0x10ea   :  { %v1913_v63 = vmul.f32 1.442695, %v1905_v60 }
0x10eb   :  { %v1886_v3 = vpop.xlane.xlu0 %1885 }
0x10ec   :  { %6594 = vpow2.f32 %v1913_v63  ;;  %v1906_v10 = vsub.f32 %v1874_v48, %v1886_v3 }
0x10ee   :  { %v1915_v4 = vmul.f32 1.442695, %v1906_v10 }
0x10f0   :  { %6596 = vpow2.f32 %v1915_v4 }
0x10f9   :  { %v7435_v11 = vpop.eup %6594 }
0x10fa   :  { %v1929_v38 = vsel %vm59_vm1, %v7435_v11, 0.0 }
0x10fb   :  { %1930 = vadd.xlane.f32.xlu0 %v1929_v38 }
0x10fd   :  { %v6597_v6 = vpop.eup %6596 }
0x10fe   :  { %v1932_v17 = vsel %vm59_vm1, %v6597_v6, 0.0 }
0x10ff   :  { %1933 = vadd.xlane.f32.xlu1 %v1932_v17 }
0x1110   :  { %2020 = vrot.lane.b32.xlu1 %v7375_v35, %s6761_s20 }
0x1111   :  { %1973 = vrot.lane.b32.xlu0 %v7371_v30, %s6761_s20 }
0x1152   :  { %v1889_v29 = vpop.xlane.xlu0 %1888 }
0x1153   :  { %v1907_v48 = vsub.f32 %v1875_v2, %v1889_v29 }
0x1155   :  { %v1917_v33 = vmul.f32 1.442695, %v1907_v48 }
0x1156   :  { %v1892_v13 = vpop.xlane.xlu1 %1891  ;;  %v1895_v41 = vpop.xlane.xlu0 %1894 }
0x1157   :  { %v1909_v22 = vsub.f32 %v1877_v40, %v1895_v41  ;;  %v1908_v37 = vsub.f32 %v1876_v16, %v1892_v13 }
0x1159   :  { %v1921_v27 = vmul.f32 1.442695, %v1909_v22  ;;  %v1919_v52 = vmul.f32 1.442695, %v1908_v37 }
0x115a   :  { %v1901_v43 = vpop.xlane.xlu0 %1900  ;;  %v1898_v19 = vpop.xlane.xlu1 %1897 }
0x115b   :  { %v1911_v47 = vsub.f32 %v1879_v32, %v1901_v43  ;;  %v1910_v51 = vsub.f32 %v1878_v26, %v1898_v19  ;;  %6598 = vpow2.f32 %v1921_v27 }
0x115c   :  { %6600 = vpow2.f32 %v1917_v33 }
0x115d   :  { %v1923_v55 = vmul.f32 1.442695, %v1910_v51  ;;  %v1925_v35 = vmul.f32 1.442695, %v1911_v47 }
0x115e   :  { %v1904_v59 = vpop.xlane.xlu1 %1903 }
0x115f   :  { %v1912_v60 = vsub.f32 %v1880_v53, %v1904_v59  ;;  %6602 = vpow2.f32 %v1923_v55 }
0x1160   :  { %6604 = vpow2.f32 %v1919_v52 }
0x1161   :  { %6606 = vpow2.f32 %v1925_v35  ;;  %v1927_v30 = vmul.f32 1.442695, %v1912_v60 }
0x1163   :  { %6608 = vpow2.f32 %v1927_v30 }
0x1168   :  { %v6599_v2 = vpop.eup %6598 }
0x1169   :  { %v1941_v40 = vsel %vm59_vm1, %v6599_v2, 0.0  ;;  %v6601_v16 = vpop.eup %6600 }
0x116a   :  { %1942 = vadd.xlane.f32.xlu0 %v1941_v40  ;;  %v1935_v26 = vsel %vm59_vm1, %v6601_v16, 0.0 }
0x116c   :  { %v6603_v63 = vpop.eup %6602 }
0x116d   :  { %v6605_v32 = vpop.eup %6604  ;;  %v1944_v3 = vsel %vm59_vm1, %v6603_v63, 0.0 }
0x116e   :  { %v7447_v10 = vpop.eup %6606  ;;  %1936 = vadd.xlane.f32.xlu0 %v1935_v26  ;;  %1945 = vadd.xlane.f32.xlu1 %v1944_v3  ;;  %v1938_v4 = vsel %vm59_vm1, %v6605_v32, 0.0 }
0x116f   :  { %v1947_v53 = vsel %vm59_vm1, %v7447_v10, 0.0 }
0x1170   :  { %v6609_v38 = vpop.eup %6608 }
0x1171   :  { %v1950_v17 = vsel %vm59_vm1, %v6609_v38, 0.0 }
0x1172   :  { %1948 = vadd.xlane.f32.xlu0 %v1947_v53  ;;  %1939 = vadd.xlane.f32.xlu1 %v1938_v4 }
0x1176   :  { %1951 = vadd.xlane.f32.xlu1 %v1950_v17 }
0x1184   :  { %v1931_v29 = vpop.xlane.xlu0 %1930 }
0x1185   :  { %6610 = vrcp.f32 %v1931_v29 }
0x1187   :  { %2067 = vrot.lane.b32.xlu1 %v7377_v39, %s6761_s20 }
0x1188   :  { %v1974_v48 = vpop.permute.xlu0 %1973  ;;  %v1934_v13 = vpop.xlane.xlu1 %1933  ;;  %2114 = vrot.lane.b32.xlu0 %v7383_v50, %s6761_s20 }
0x1189   :  { %6612 = vrcp.f32 %v1934_v13  ;;  %5823 = vmatpush3.bf16.msra.mxu0 %v1974_v48 }
0x118a   :  { %5834 = vmatprep.subr.bf16.mxu0 %v6752_v0 }
0x118c   :  { %v2021_v41 = vpop.permute.xlu1 %2020 }
0x118d   :  { %5829 = vmatpush3.bf16.msra.mxu1 %v2021_v41 }
0x118e   :  { %5840 = vmatprep.subr.bf16.mxu1 %v6752_v0 }
0x1192   :  { %v6611_v22 = vpop.eup %6610 }
0x1193   :  { %v1961_v27 = vmul.f32 %v6611_v22, %v7435_v11 }
0x1196   :  { %v6613_v37 = vpop.eup %6612 }
0x1197   :  { %v1962_v33 = vmul.f32 %v6613_v37, %v6597_v6 }
0x1199   :  { %v1969_v43 = vpack.c.bf16 %v1962_v33, %v1961_v27 }
0x119b   :  { %5825 = vmatmul.mubr.msk.bf16.vlgmr.msra.gmra.mxu0 %vm59_vm1, %v1969_v43 }
0x119c   :  { %5836 = vmatprep.mubr.msk.bf16.mxu0 %vm6753_vm0, %v6752_v0 }
0x11f3   :  { %v1943_v39 = vpop.xlane.xlu0 %1942 }
0x11f4   :  { %6614 = vrcp.f32 %v1943_v39 }
0x11f7   :  { %v1946_v50 = vpop.xlane.xlu1 %1945  ;;  %v1937_v19 = vpop.xlane.xlu0 %1936 }
0x11f8   :  { %6616 = vrcp.f32 %v1946_v50 }
0x11f9   :  { %6618 = vrcp.f32 %v1937_v19 }
0x11fb   :  { %v1940_v47 = vpop.xlane.xlu1 %1939  ;;  %v1949_v52 = vpop.xlane.xlu0 %1948 }
0x11fc   :  { %6620 = vrcp.f32 %v1940_v47 }
0x11ff   :  { %v1952_v51 = vpop.xlane.xlu1 %1951  ;;  %v2115_v17 = vpop.permute.xlu0 %2114 }
0x1200   :  { %6622 = vrcp.f32 %v1952_v51 }
0x1201   :  { %6624 = vrcp.f32 %v1949_v52  ;;  %v6615_v6 = vpop.eup %6614 }
0x1202   :  { %v1965_v35 = vmul.f32 %v6615_v6, %v6599_v2 }
0x1203   :  { %v2068_v11 = vpop.permute.xlu1 %2067 }
0x1204   :  { %5835 = vmatpush3.bf16.msra.mxu0 %v2068_v11 }
0x1205   :  { %5846 = vmatprep.subr.bf16.mxu0 %v6752_v0  ;;  %v6617_v55 = vpop.eup %6616 }
0x1206   :  { %v1966_v59 = vmul.f32 %v6617_v55, %v6603_v63  ;;  %v6619_v60 = vpop.eup %6618 }
0x1207   :  { %v1963_v26 = vmul.f32 %v6619_v60, %v6601_v16 }
0x1208   :  { %v1971_v30 = vpack.c.bf16 %v1966_v59, %v1965_v35 }
0x1209   :  { %v6621_v40 = vpop.eup %6620 }
0x120a   :  { %5837 = vmatmul.mubr.msk.bf16.vlgmr.msra.gmra.mxu0 %vm59_vm1, %v1971_v30  ;;  %v1964_v3 = vmul.f32 %v6621_v40, %v6605_v32 }
0x120b   :  { %5847 = vmatpush3.bf16.msra.mxu0 %v7039_v57  ;;  %5850 = vmatprep.mubr.msk.bf16.mxu0 %vm6753_vm0, %v6752_v0 }
0x120c   :  { %v1970_v53 = vpack.c.bf16 %v1964_v3, %v1963_v26  ;;  %5848 = vmatprep.subr.bf16.mxu0 %v6752_v0 }
0x120d   :  { %v6623_v4 = vpop.eup %6622 }
0x120e   :  { %5831 = vmatmul.mubr.msk.bf16.vlgmr.msra.gmra.mxu1 %vm59_vm1, %v1970_v53  ;;  %v6625_v2 = vpop.eup %6624  ;;  %v1968_v63 = vmul.f32 %v6623_v4, %v6609_v38 }
0x120f   :  { %5841 = vmatpush3.bf16.msra.mxu1 %v2115_v17  ;;  %5842 = vmatprep.mubr.msk.bf16.mxu1 %vm6753_vm0, %v6752_v0  ;;  %v1967_v57 = vmul.f32 %v6625_v2, %v7447_v10 }
0x1210   :  { %5849 = vmatpush3.bf16.msra.mxu0 %v7049_v62  ;;  %5854 = vmatprep.subr.bf16.mxu1 %v6752_v0 }
0x1211   :  { %5862 = vmatprep.subr.bf16.mxu0 %v6752_v0  ;;  %v1972_v16 = vpack.c.bf16 %v1968_v63, %v1967_v57 }
0x1216   :  { %5843 = vmatmul.mubr.msk.bf16.vlgmr.msra.gmra.mxu1 %vm59_vm1, %v1972_v16 }
0x1217   :  { %5855 = vmatpush3.bf16.msra.mxu1 %v7091_v61  ;;  %5858 = vmatprep.mubr.msk.bf16.mxu1 %vm6753_vm0, %v6752_v0 }
0x1218   :  { %5856 = vmatprep.subr.bf16.mxu1 %v6752_v0 }
0x121b   :  { %5857 = vmatpush3.bf16.msra.mxu1 %v7097_v1 }
0x121c   :  { %5874 = vmatprep.subr.bf16.mxu1 %v6752_v0 }
0x125b   :  { %v2013_v62 = vpop.f32.mrf.mxu0 }
0x125d   :  { %v5826_v32 = vpop.f32.mrf.mxu0 }
0x125f   :  { %v2016_v38 = vpop.f32.mrf.mxu0 }
0x1261   :  { %v5827_v29 = vpop.f32.mrf.mxu0 }
0x12ca   :  { %v2107_v48 = vpop.f32.mrf.mxu0 }
0x12cc   :  { %v5838_v10 = vpop.f32.mrf.mxu0 }
0x12ce   :  { %v2060_v13 = vpop.f32.mrf.mxu1  ;;  %v2110_v41 = vpop.f32.mrf.mxu0 }
0x12cf   :  { %v6383_v22 = vpack.i.bf16 %v2110_v41, %v2107_v48 }
0x12d0   :  { %v5832_v37 = vpop.f32.mrf.mxu1  ;;  %v5839_v61 = vpop.f32.mrf.mxu0 }
0x12d1   :  { %6384 = vrot.lane.b32.xlu0 %v6383_v22, %s6763_s29 }
0x12d2   :  { %v2063_v27 = vpop.f32.mrf.mxu1 }
0x12d3   :  { %v6388_v33 = vpack.i.bf16 %v2063_v27, %v2060_v13 }
0x12d4   :  { %v5833_v43 = vpop.f32.mrf.mxu1 }
0x12d5   :  { %6389 = vrot.lane.b32.xlu1 %v6388_v33, %s6762_s28 }
0x12d6   :  { %v2154_v1 = vpop.f32.mrf.mxu1 }
0x12d8   :  { %v5844_v39 = vpop.f32.mrf.mxu1 }
0x12da   :  { %v2157_v50 = vpop.f32.mrf.mxu1 }
0x12db   :  { %v6393_v19 = vpack.i.bf16 %v2157_v50, %v2154_v1 }
0x12dc   :  { %v5845_v47 = vpop.f32.mrf.mxu1 }
0x12dd   :  { %6394 = vrot.lane.b32.xlu1 %v6393_v19, %s6764_s30 }
0x1343   :  { %v6385_v6 = vpop.permute.xlu0 %6384 }
0x1344   :  { %v6387_v59 = vunpack.i.h.bf16 %v6385_v6  ;;  %v6386_v60 = vunpack.i.l.bf16 %v6385_v6 }
0x1347   :  { %v6390_v51 = vpop.permute.xlu1 %6389 }
0x1348   :  { %v6392_v52 = vunpack.i.h.bf16 %v6390_v51  ;;  %v6391_v11 = vunpack.i.l.bf16 %v6390_v51 }
0x134a   :  { %v2185_v55 = vsel %vm541_vm12, %v2013_v62, %v6391_v11  ;;  %v2186_v35 = vsel %vm541_vm12, %v2016_v38, %v6392_v52 }
0x134b   :  { %v2187_v3 = vsel %vm59_vm1, %v2185_v55, %v6386_v60  ;;  %v2188_v53 = vsel %vm59_vm1, %v2186_v35, %v6387_v59 }
0x134f   :  { %v6395_v30 = vpop.permute.xlu1 %6394 }
0x1350   :  { %v6397_v40 = vunpack.i.h.bf16 %v6395_v30  ;;  %v6396_v26 = vunpack.i.l.bf16 %v6395_v30 }
0x1352   :  { %v2189_v4 = vsel %vm1069_vm13, %v2187_v3, %v6396_v26  ;;  %v2190_v17 = vsel %vm1069_vm13, %v2188_v53, %v6397_v40  ;;  %v6735_v26 = vld [vmem:[%s8495_s4 + $0x44] ss:$0 sm:$0xff] }
0x1353   :  { %v2191_v2 = vpack.c.bf16 %v2190_v17, %v2189_v4 }
0x1355   :  { %5851 = vmatmul.mubr.msk.bf16.vlgmr.msra.gmra.mxu0 %vm410_vm7, %v2191_v2 }
0x1356   :  { %5863 = vmatpush3.bf16.msra.mxu0 %v7108_v5  ;;  %5870 = vmatprep.mubr.msk.bf16.mxu0 %vm6753_vm0, %v6752_v0  ;;  %v6734_v5 = vld [vmem:[%s8495_s4 + $0x43] ss:$0 sm:$0xff] }
0x1357   :  { %5864 = vmatprep.subr.bf16.mxu0 %v6752_v0 }
0x135a   :  { %5865 = vmatpush3.bf16.msra.mxu0 %v7127_v42 }
0x135b   :  { %5866 = vmatprep.subr.bf16.mxu0 %v6752_v0 }
0x135e   :  { %5867 = vmatpush3.bf16.msra.mxu0 %v7137_v46 }
0x135f   :  { %5868 = vmatprep.subr.bf16.mxu0 %v6752_v0 }
0x1362   :  { %5869 = vmatpush3.bf16.msra.mxu0 %v7147_v49 }
0x1363   :  { %5904 = vmatprep.subr.bf16.mxu0 %v6752_v0 }
0x1415   :  { %v2229_v63 = vpop.f32.mrf.mxu0 }
0x1416   :  { %v2230_v57 = vadd.f32 %v6734_v5, %v2229_v63  ;;  %v6736_v63 = vld [vmem:[%s8495_s4 + $0x45] ss:$0 sm:$0xff] }
0x1417   :  { %v5852_v16 = vpop.f32.mrf.mxu0 }
0x1418   :  { %v7507_v62 = vadd.f32 %v2230_v57, %v7247_v56 }
0x1419   :  { %v2232_v42 = vpop.f32.mrf.mxu0 }
0x141a   :  { %v2233_v32 = vadd.f32 %v6734_v5, %v2232_v42  ;;  %v2238_v46 = vsel %vm410_vm7, %v7507_v62, 0.0 }
0x141b   :  { %2239 = vadd.xlane.f32.xlu0 %v2238_v46  ;;  %v5853_v38 = vpop.f32.mrf.mxu0  ;;  %v6737_v46 = vld [vmem:[%s8495_s4 + $0x46] ss:$0 sm:$0xff] }
0x141c   :  { %v7512_v49 = vadd.f32 %v2233_v32, %v7250_v54 }
0x141e   :  { %v2241_v29 = vsel %vm410_vm7, %v7512_v49, 0.0 }
0x141f   :  { %2242 = vadd.xlane.f32.xlu1 %v2241_v29 }
0x14a4   :  { %v2240_v48 = vpop.xlane.xlu0 %2239 }
0x14a5   :  { %v2244_v10 = vmul.f32 0.03125, %v2240_v48 }
0x14a7   :  { %v2246_v13 = vsub.f32 %v7507_v62, %v2244_v10 }
0x14a8   :  { %v2243_v56 = vpop.xlane.xlu1 %2242 }
0x14a9   :  { %v2245_v41 = vmul.f32 0.03125, %v2243_v56  ;;  %v2248_v22 = vmul.f32 %v2246_v13, %v2246_v13  ;;  %v2276_v3 = vmul.f32 %v6735_v26, %v2246_v13 }
0x14ab   :  { %v2247_v37 = vsub.f32 %v7512_v49, %v2245_v41  ;;  %v2250_v61 = vsel %vm410_vm7, %v2248_v22, 0.0 }
0x14ac   :  { %2251 = vadd.xlane.f32.xlu0 %v2250_v61  ;;  %v6738_v61 = vld [vmem:[%s8495_s4 + $0x47] ss:$0 sm:$0xff] }
0x14ad   :  { %v2249_v27 = vmul.f32 %v2247_v37, %v2247_v37  ;;  %v2277_v53 = vmul.f32 %v6735_v26, %v2247_v37 }
0x14af   :  { %v2253_v54 = vsel %vm410_vm7, %v2249_v27, 0.0 }
0x14b0   :  { %2254 = vadd.xlane.f32.xlu0 %v2253_v54 }
0x1535   :  { %v2252_v33 = vpop.xlane.xlu0 %2251 }
0x1536   :  { %v2256_v43 = vmul.f32 0.032258064, %v2252_v33 }
0x1538   :  { %6626 = vrsqrt.f32 %v2256_v43  ;;  %vm2260_vm11 = vcmp.eq.f32.partialorder %v2256_v43, inf  ;;  %v2263_v47 = vand.u32 2147483648, %v2256_v43  ;;  %vm2262_vm14 = vcmp.eq.f32.partialorder %v2256_v43, 0.0 }
0x1539   :  { %v2255_v1 = vpop.xlane.xlu0 %2254 }
0x153a   :  { %v2257_v39 = vmul.f32 0.032258064, %v2255_v1 }
0x153c   :  { %6628 = vrsqrt.f32 %v2257_v39  ;;  %vm2267_vm15 = vcmp.eq.f32.partialorder %v2257_v39, inf  ;;  %v2270_v35 = vand.u32 2147483648, %v2257_v39  ;;  %vm2269_vm2 = vcmp.eq.f32.partialorder %v2257_v39, 0.0 }
0x1545   :  { %v6627_v50 = vpop.eup %6626 }
0x1546   :  { %v2259_v19 = vmul.f32 %v6627_v50, %v2256_v43 }
0x1548   :  { %v2261_v51 = vsel %vm2260_vm11, %v2256_v43, %v2259_v19 }
0x1549   :  { %v6629_v52 = vpop.eup %6628  ;;  %v2264_v11 = vsel %vm2262_vm14, %v2263_v47, %v2261_v51 }
0x154a   :  { %v2272_v6 = vadd.f32 1e-06, %v2264_v11  ;;  %v2266_v55 = vmul.f32 %v6629_v52, %v2257_v39 }
0x154c   :  { %6630 = vrcp.f32 %v2272_v6  ;;  %v2268_v59 = vsel %vm2267_vm15, %v2257_v39, %v2266_v55 }
0x154d   :  { %v2271_v60 = vsel %vm2269_vm2, %v2270_v35, %v2268_v59 }
0x154e   :  { %v2273_v30 = vadd.f32 1e-06, %v2271_v60 }
0x1550   :  { %6632 = vrcp.f32 %v2273_v30 }
0x1559   :  { %v6631_v40 = vpop.eup %6630 }
0x155a   :  { %v2278_v4 = vmul.f32 %v6631_v40, %v2276_v3 }
0x155c   :  { %v2280_v5 = vadd.f32 %v6736_v63, %v2278_v4 }
0x155d   :  { %v6633_v17 = vpop.eup %6632 }
0x155e   :  { %v2279_v2 = vmul.f32 %v6633_v17, %v2277_v53 }
0x1560   :  { %v2281_v57 = vadd.f32 %v6736_v63, %v2279_v2 }
0x1562   :  { %v2282_v16 = vpack.c.bf16 %v2281_v57, %v2280_v5 }
0x1564   :  { %5859 = vmatmul.mubr.msk.bf16.vlgmr.msra.gmra.mxu1 %vm410_vm7, %v2282_v16 }
0x1565   :  { %5876 = vmatprep.mubr.msk.bf16.mxu1 %vm6753_vm0, %v6752_v0 }
0x1624   :  { %v2320_v42 = vpop.f32.mrf.mxu1 }
0x1625   :  { %v2321_v38 = vadd.f32 %v6737_v46, %v2320_v42 }
0x1626   :  { %v5860_v32 = vpop.f32.mrf.mxu1 }
0x1627   :  { %v2327_v13 = vmax.f32 %v2321_v38, 0.0 }
0x1628   :  { %v2323_v29 = vpop.f32.mrf.mxu1 }
0x1629   :  { %v2324_v48 = vadd.f32 %v6737_v46, %v2323_v29 }
0x162a   :  { %v5861_v10 = vpop.f32.mrf.mxu1 }
0x162b   :  { %v2328_v56 = vmax.f32 %v2324_v48, 0.0 }
0x162d   :  { %v2329_v41 = vpack.c.bf16 %v2328_v56, %v2327_v13 }
0x162f   :  { %5871 = vmatmul.mubr.msk.bf16.vlgmr.msra.gmra.mxu0 %vm1231_vm4, %v2329_v41 }
0x1630   :  { %5906 = vmatprep.mubr.msk.bf16.mxu0 %vm6753_vm0, %v6752_v0 }
0x16ef   :  { %v2367_v22 = vpop.f32.mrf.mxu0 }
0x16f0   :  { %v2368_v27 = vadd.f32 %v6738_v61, %v2367_v22  ;;  %v5248_v22 = vld [vmem:[%s8495_s4 + $0x60] sm:$0xff] }
0x16f1   :  { %v5872_v37 = vpop.f32.mrf.mxu0 }
0x16f2   :  { %v7539_v1 = vadd.f32 %v2368_v27, %v7507_v62  ;;  %v5249_v37 = vld [vmem:[%s8495_s4 + $0x68] sm:$0xff] }
0x16f3   :  { %v2370_v54 = vpop.f32.mrf.mxu0  ;;  %v7616_v27 = vpack.c.bf16 %v5249_v37, %v5248_v22 }
0x16f4   :  { %v2371_v33 = vadd.f32 %v6738_v61, %v2370_v54  ;;  %v5246_v61 = vld [vmem:[%s8495_s4 + $0x50] sm:$0xff]  ;;  %v5247_v54 = vld [vmem:[%s8495_s4 + $0x58] sm:$0xff] }
0x16f5   :  { %v5873_v43 = vpop.f32.mrf.mxu0 }
0x16f6   :  { %v7542_v39 = vadd.f32 %v2371_v33, %v7512_v49  ;;  %v7622_v33 = vpack.c.bf16 %v5247_v54, %v5246_v61  ;;  %v5302_v54 = vld [vmem:[%s8495_s4 + $0x92] ss:$0 sm:$0xff] }
0x16f8   :  { %v2376_v50 = vpack.c.bf16 %v7542_v39, %v7539_v1 }
0x16fa   :  { %5875 = vmatpush3.bf16.msra.mxu1 %v2376_v50 }
0x16fb   :  { %5888 = vmatprep.subr.bf16.mxu1 %v6752_v0 }
0x16fd   :  { %5877 = vmatmul.mubr.msk.bf16.vlgmr.msra.gmra.mxu1 %vm59_vm1, %v6825_v8 }
0x16fe   :  { %5880 = vmatprep.mubr.msk.bf16.mxu1 %vm6753_vm0, %v6752_v0  ;;  %5889 = vmatpush3.bf16.msra.mxu1 %v7190_v18 }
0x16ff   :  { %5890 = vmatprep.subr.bf16.mxu1 %v6752_v0 }
0x1702   :  { %5891 = vmatpush3.bf16.msra.mxu1 %v7196_v21 }
0x1703   :  { %5892 = vmatprep.subr.bf16.mxu1 %v6752_v0 }
0x1705   :  { %5881 = vmatmul.mubr.msk.bf16.gmra.mxu1 %vm59_vm1, %v6845_v12 }
0x1706   :  { %5884 = vmatprep.mubr.msk.bf16.mxu1 %vm6753_vm0, %v6752_v0  ;;  %5893 = vmatpush3.bf16.msra.mxu1 %v7206_v25 }
0x1707   :  { %5894 = vmatprep.subr.bf16.mxu1 %v6752_v0 }
0x170a   :  { %5895 = vmatpush3.bf16.msra.mxu1 %v7217_v28 }
0x170b   :  { %5896 = vmatprep.subr.bf16.mxu1 %v6752_v0 }
0x170d   :  { %5885 = vmatmul.mubr.msk.bf16.gmra.mxu1 %vm59_vm1, %v6827_v9 }
0x170e   :  { %5897 = vmatpush3.bf16.msra.mxu1 %v7226_v34  ;;  %5900 = vmatprep.mubr.msk.bf16.mxu1 %vm6753_vm0, %v6752_v0 }
0x170f   :  { %5898 = vmatprep.subr.bf16.mxu1 %v6752_v0 }
0x1712   :  { %5899 = vmatpush3.bf16.msra.mxu1 %v7237_v23  ;;  %v5221_v23 = vld [vmem:[%s8495_s4 + $0x49] ss:$0 sm:$0xff] }
0x1713   :  { %5934 = vmatprep.subr.bf16.mxu1 %v6752_v0  ;;  %v1536_v35 = vadd.f32 %v5221_v23, %v7420_v44  ;;  %v1539_v59 = vadd.f32 %v5221_v23, %v7422_v24 }
0x1715   :  { %v1542_v60 = vmax.f32 %v1536_v35, 0.0  ;;  %v1543_v30 = vmax.f32 %v1539_v59, 0.0 }
0x1717   :  { %v7579_v40 = vadd.f32 %v1542_v60, %v7161_v14  ;;  %v7582_v26 = vadd.f32 %v1543_v30, %v7164_v15 }
0x1719   :  { %v2714_v3 = vsel %vm410_vm7, %v7579_v40, 0.0  ;;  %v2717_v53 = vsel %vm410_vm7, %v7582_v26, 0.0 }
0x17bd   :  { %v2411_v18 = vpop.f32.mrf.mxu1 }
0x17bf   :  { %v5878_v21 = vpop.f32.mrf.mxu1 }
0x17c1   :  { %v2414_v25 = vpop.f32.mrf.mxu1 }
0x17c3   :  { %v5879_v28 = vpop.f32.mrf.mxu1 }
0x17c5   :  { %v2419_v62 = vpop.f32.mrf.mxu1 }
0x17c7   :  { %v5882_v49 = vpop.f32.mrf.mxu1 }
0x17c9   :  { %v2422_v19 = vpop.f32.mrf.mxu1 }
0x17ca   :  { %v6398_v47 = vpack.i.bf16 %v2422_v19, %v2419_v62 }
0x17cb   :  { %v5883_v51 = vpop.f32.mrf.mxu1 }
0x17cc   :  { %6399 = vrot.lane.b32.xlu1 %v6398_v47, %s6765_s18 }
0x17cd   :  { %v2427_v34 = vpop.f32.mrf.mxu1 }
0x17cf   :  { %v5886_v52 = vpop.f32.mrf.mxu1 }
0x17d1   :  { %v2430_v11 = vpop.f32.mrf.mxu1 }
0x17d2   :  { %v6403_v6 = vpack.i.bf16 %v2430_v11, %v2427_v34  ;;  %v5241_v34 = vld [vmem:[%s8498_s2 + $0x2] ss:$0 sm:$0xff] }
0x17d3   :  { %v5887_v55 = vpop.f32.mrf.mxu1 }
0x17d4   :  { %6404 = vrot.lane.b32.xlu0 %v6403_v6, %s6761_s20 }
0x17f0   :  { %2715 = vadd.xlane.f32.xlu1 %v2714_v3 }
0x17f3   :  { %2718 = vadd.xlane.f32.xlu0 %v2717_v53 }
0x183e   :  { %v6400_v4 = vpop.permute.xlu1 %6399 }
0x183f   :  { %v6402_v44 = vunpack.i.h.bf16 %v6400_v4  ;;  %v6401_v17 = vunpack.i.l.bf16 %v6400_v4 }
0x1841   :  { %v2451_v14 = vsel %vm410_vm7, %v2414_v25, %v6402_v44  ;;  %v2450_v5 = vsel %vm410_vm7, %v2411_v18, %v6401_v17  ;;  %v6739_v25 = vld [vmem:[%s8495_s4 + $0x48] ss:$0 sm:$0xff] }
0x1846   :  { %v6405_v24 = vpop.permute.xlu0 %6404 }
0x1847   :  { %v6407_v2 = vunpack.i.h.bf16 %v6405_v24  ;;  %v6406_v63 = vunpack.i.l.bf16 %v6405_v24 }
0x1849   :  { %v2453_v15 = vsel %vm1231_vm4, %v2451_v14, %v6407_v2  ;;  %v2452_v57 = vsel %vm1231_vm4, %v2450_v5, %v6406_v63 }
0x184a   :  { %v2454_v16 = vpack.c.bf16 %v2453_v15, %v2452_v57  ;;  %v5301_v15 = vld [vmem:[%s8495_s4 + $0x91] ss:$0 sm:$0xff] }
0x184c   :  { %5901 = vmatmul.mubr.msk.bf16.vlgmr.msra.gmra.mxu1 %vm1361_vm5, %v2454_v16 }
0x184d   :  { %5938 = vmatprep.mubr.msk.bf16.mxu1 %vm6753_vm0, %v6752_v0  ;;  %5935 = vmatpush3.bf16.msra.mxu1 %v7616_v27 }
0x184e   :  { %5936 = vmatprep.subr.bf16.mxu1 %v6752_v0 }
0x1851   :  { %5937 = vmatpush3.bf16.msra.mxu1 %v7622_v33 }
0x1852   :  { %5942 = vmatprep.subr.bf16.mxu1 %v6752_v0 }
0x1879   :  { %v2716_v42 = vpop.xlane.xlu1 %2715 }
0x187a   :  { %v2720_v32 = vmul.f32 0.03125, %v2716_v42 }
0x187c   :  { %v7596_v46 = vsub.f32 %v7579_v40, %v2720_v32  ;;  %v2719_v38 = vpop.xlane.xlu0 %2718 }
0x187d   :  { %v2721_v29 = vmul.f32 0.03125, %v2719_v38 }
0x187e   :  { %v2724_v48 = vmul.f32 %v7596_v46, %v7596_v46 }
0x187f   :  { %v7601_v10 = vsub.f32 %v7582_v26, %v2721_v29 }
0x1880   :  { %v2726_v13 = vsel %vm410_vm7, %v2724_v48, 0.0 }
0x1881   :  { %2727 = vadd.xlane.f32.xlu1 %v2726_v13  ;;  %v2725_v56 = vmul.f32 %v7601_v10, %v7601_v10 }
0x1883   :  { %v2729_v41 = vsel %vm410_vm7, %v2725_v56, 0.0 }
0x1884   :  { %2730 = vadd.xlane.f32.xlu0 %v2729_v41 }
0x190a   :  { %v2728_v43 = vpop.xlane.xlu1 %2727 }
0x190b   :  { %v2732_v50 = vmul.f32 0.032258064, %v2728_v43 }
0x190c   :  { %v2492_v18 = vpop.f32.mrf.mxu1 }
0x190d   :  { %6634 = vrsqrt.f32 %v2732_v50  ;;  %v2731_v21 = vpop.xlane.xlu0 %2730  ;;  %v2493_v28 = vadd.f32 %v6739_v25, %v2492_v18  ;;  %vm2736_vm3 = vcmp.eq.f32.partialorder %v2732_v50, inf  ;;  %v2739_v60 = vand.u32 2147483648, %v2732_v50 }
0x190e   :  { %v2733_v62 = vmul.f32 0.032258064, %v2731_v21  ;;  %v5902_v49 = vpop.f32.mrf.mxu1  ;;  %vm2738_vm6 = vcmp.eq.f32.partialorder %v2732_v50, 0.0 }
0x190f   :  { %v2499_v47 = vmax.f32 %v2493_v28, 0.0 }
0x1910   :  { %6636 = vrsqrt.f32 %v2733_v62  ;;  %v2495_v19 = vpop.f32.mrf.mxu1  ;;  %vm2743_vm8 = vcmp.eq.f32.partialorder %v2733_v62, inf  ;;  %v2746_v17 = vand.u32 2147483648, %v2733_v62  ;;  %vm2745_vm9 = vcmp.eq.f32.partialorder %v2733_v62, 0.0 }
0x1911   :  { %v2496_v51 = vadd.f32 %v6739_v25, %v2495_v19  ;;  %v2507_v6 = vadd.f32 %v5241_v34, %v2499_v47 }
0x1912   :  { %v5903_v52 = vpop.f32.mrf.mxu1 }
0x1913   :  { %v2500_v11 = vmax.f32 %v2496_v51, 0.0 }
0x1915   :  { %v2508_v55 = vadd.f32 %v5241_v34, %v2500_v11 }
0x1917   :  { %v2509_v23 = vpack.c.bf16 %v2508_v55, %v2507_v6 }
0x1919   :  { %5905 = vmatpush3.bf16.msra.mxu0 %v2509_v23 }
0x191a   :  { %v6635_v35 = vpop.eup %6634  ;;  %5918 = vmatprep.subr.bf16.mxu0 %v6752_v0 }
0x191b   :  { %v2735_v59 = vmul.f32 %v6635_v35, %v2732_v50 }
0x191c   :  { %5907 = vmatmul.mubr.msk.bf16.vlgmr.msra.gmra.mxu0 %vm59_vm1, %v6825_v8 }
0x191d   :  { %v6637_v30 = vpop.eup %6636  ;;  %v2737_v3 = vsel %vm2736_vm3, %v2732_v50, %v2735_v59  ;;  %5910 = vmatprep.mubr.msk.bf16.mxu0 %vm6753_vm0, %v6752_v0  ;;  %5919 = vmatpush3.bf16.msra.mxu0 %v7308_v45  ;;  %v5300_v45 = vld [vmem:[%s8495_s4 + $0x90] ss:$0 sm:$0xff] }
0x191e   :  { %v2740_v53 = vsel %vm2738_vm6, %v2739_v60, %v2737_v3  ;;  %v2742_v4 = vmul.f32 %v6637_v30, %v2733_v62  ;;  %5920 = vmatprep.subr.bf16.mxu0 %v6752_v0 }
0x191f   :  { %v2748_v44 = vadd.f32 1e-06, %v2740_v53 }
0x1920   :  { %v2744_v24 = vsel %vm2743_vm8, %v2733_v62, %v2742_v4 }
0x1921   :  { %6638 = vrcp.f32 %v2748_v44  ;;  %v2747_v2 = vsel %vm2745_vm9, %v2746_v17, %v2744_v24  ;;  %5921 = vmatpush3.bf16.msra.mxu0 %v7314_v31 }
0x1922   :  { %v2749_v63 = vadd.f32 1e-06, %v2747_v2  ;;  %5922 = vmatprep.subr.bf16.mxu0 %v6752_v0 }
0x1924   :  { %6640 = vrcp.f32 %v2749_v63  ;;  %5911 = vmatmul.mubr.msk.bf16.gmra.mxu0 %vm59_vm1, %v6845_v12 }
0x1925   :  { %5914 = vmatprep.mubr.msk.bf16.mxu0 %vm6753_vm0, %v6752_v0  ;;  %5923 = vmatpush3.bf16.msra.mxu0 %v7324_v36  ;;  %v2756_v36 = vmul.f32 %v5300_v45, %v7596_v46 }
0x1926   :  { %5924 = vmatprep.subr.bf16.mxu0 %v6752_v0 }
0x1929   :  { %5925 = vmatpush3.bf16.msra.mxu0 %v7339_v58  ;;  %v2757_v58 = vmul.f32 %v5300_v45, %v7601_v10 }
0x192a   :  { %5926 = vmatprep.subr.bf16.mxu0 %v6752_v0 }
0x192c   :  { %5915 = vmatmul.mubr.msk.bf16.gmra.mxu0 %vm59_vm1, %v6827_v9 }
0x192d   :  { %5927 = vmatpush3.bf16.msra.mxu0 %v7349_v7  ;;  %5930 = vmatprep.mubr.msk.bf16.mxu0 %vm6753_vm0, %v6752_v0 }
0x192e   :  { %v6639_v31 = vpop.eup %6638  ;;  %5928 = vmatprep.subr.bf16.mxu0 %v6752_v0 }
0x192f   :  { %v2758_v14 = vmul.f32 %v6639_v31, %v2756_v36 }
0x1931   :  { %v6641_v5 = vpop.eup %6640  ;;  %5929 = vmatpush3.bf16.msra.mxu0 %v7362_v20  ;;  %v2764_v7 = vadd.f32 %v5301_v15, %v2758_v14 }
0x1932   :  { %v2759_v57 = vmul.f32 %v6641_v5, %v2757_v58  ;;  %5948 = vmatprep.subr.bf16.mxu0 %v6752_v0 }
0x1934   :  { %v2765_v16 = vadd.f32 %v5301_v15, %v2759_v57 }
0x1936   :  { %v2766_v42 = vpack.c.bf16 %v2765_v16, %v2764_v7 }
0x1938   :  { %5939 = vmatmul.mubr.msk.bf16.vlgmr.msra.gmra.mxu1 %vm410_vm7, %v2766_v42 }
0x1939   :  { %5944 = vmatprep.mubr.msk.bf16.mxu1 %vm6753_vm0, %v6752_v0 }
0x19dc   :  { %v2544_v32 = vpop.f32.mrf.mxu0 }
0x19de   :  { %v5908_v46 = vpop.f32.mrf.mxu0 }
0x19e0   :  { %v2547_v38 = vpop.f32.mrf.mxu0 }
0x19e2   :  { %v5909_v29 = vpop.f32.mrf.mxu0 }
0x19e4   :  { %v2552_v48 = vpop.f32.mrf.mxu0 }
0x19e6   :  { %v5912_v10 = vpop.f32.mrf.mxu0 }
0x19e8   :  { %v2555_v13 = vpop.f32.mrf.mxu0 }
0x19e9   :  { %v6423_v49 = vpack.i.bf16 %v2555_v13, %v2552_v48 }
0x19ea   :  { %v5913_v56 = vpop.f32.mrf.mxu0 }
0x19eb   :  { %v6740_v56 = vld [vmem:[%s8496_s1] ss:$0 sm:$0xff] }
0x19ec   :  { %v2560_v20 = vpop.f32.mrf.mxu0 }
0x19ee   :  { %v5916_v41 = vpop.f32.mrf.mxu0 }
0x19f0   :  { %v2563_v22 = vpop.f32.mrf.mxu0 }
0x19f1   :  { %v6428_v62 = vpack.i.bf16 %v2563_v22, %v2560_v20 }
0x19f2   :  { %v5917_v37 = vpop.f32.mrf.mxu0 }
0x19f8   :  { %v2808_v61 = vpop.f32.mrf.mxu1 }
0x19f9   :  { %v2809_v18 = vadd.f32 %v5302_v54, %v2808_v61 }
0x19fa   :  { %v5940_v43 = vpop.f32.mrf.mxu1 }
0x19fc   :  { %v2811_v50 = vpop.f32.mrf.mxu1 }
0x19fd   :  { %v2812_v21 = vadd.f32 %v5302_v54, %v2811_v50 }
0x19fe   :  { %v5941_v25 = vpop.f32.mrf.mxu1 }
0x19ff   :  { %v6413_v28 = vpack.i.bf16 %v2812_v21, %v2809_v18  ;;  %v7677_v19 = vpack.c.bf16 %v2812_v21, %v2809_v18 }
0x1a01   :  { %6414 = vrot.lane.b32.xlu0 %v6413_v28, %s6759_s16  ;;  %6409 = vrot.lane.b32.xlu1 %v6413_v28, %s6758_s15 }
0x1a05   :  { %6419 = vrot.lane.b32.xlu1 %v6413_v28, %s6757_s14  ;;  %6429 = vrot.lane.b32.xlu0 %v6428_v62, %s6761_s20 }
0x1a09   :  { %6424 = vrot.lane.b32.xlu1 %v6423_v49, %s6765_s18 }
0x1a0d   :  { %2840 = vrot.lane.b32.xlu1 %v7677_v19, %s6760_s17 }
0x1a73   :  { %v6415_v47 = vpop.permute.xlu0 %6414  ;;  %v6410_v51 = vpop.permute.xlu1 %6409 }
0x1a74   :  { %v6417_v34 = vunpack.i.h.bf16 %v6415_v47  ;;  %v6416_v52 = vunpack.i.l.bf16 %v6415_v47  ;;  %v6412_v11 = vunpack.i.h.bf16 %v6410_v51  ;;  %v6411_v6 = vunpack.i.l.bf16 %v6410_v51 }
0x1a76   :  { %v7681_v55 = vpack.c.bf16 %v6417_v34, %v6416_v52  ;;  %v7683_v23 = vpack.c.bf16 %v6412_v11, %v6411_v6 }
0x1a77   :  { %v6420_v35 = vpop.permute.xlu1 %6419  ;;  %v6430_v30 = vpop.permute.xlu0 %6429 }
0x1a78   :  { %v6422_v59 = vunpack.i.h.bf16 %v6420_v35  ;;  %v6421_v60 = vunpack.i.l.bf16 %v6420_v35  ;;  %2940 = vrot.lane.b32.xlu1 %v7681_v55, %s6760_s17  ;;  %2890 = vrot.lane.b32.xlu0 %v7683_v23, %s6760_s17  ;;  %v6432_v4 = vunpack.i.h.bf16 %v6430_v30  ;;  %v6431_v44 = vunpack.i.l.bf16 %v6430_v30 }
0x1a7a   :  { %v7689_v3 = vpack.c.bf16 %v6422_v59, %v6421_v60 }
0x1a7b   :  { %v6425_v53 = vpop.permute.xlu1 %6424 }
0x1a7c   :  { %v6427_v17 = vunpack.i.h.bf16 %v6425_v53  ;;  %v6426_v24 = vunpack.i.l.bf16 %v6425_v53  ;;  %2990 = vrot.lane.b32.xlu0 %v7689_v3, %s6760_s17 }
0x1a7e   :  { %v2584_v2 = vsel %vm410_vm7, %v2547_v38, %v6427_v17  ;;  %v2583_v63 = vsel %vm410_vm7, %v2544_v32, %v6426_v24 }
0x1a7f   :  { %v2586_v45 = vsel %vm1231_vm4, %v2584_v2, %v6432_v4  ;;  %v2585_v31 = vsel %vm1231_vm4, %v2583_v63, %v6431_v44  ;;  %v2841_v36 = vpop.permute.xlu1 %2840 }
0x1a80   :  { %v2587_v58 = vpack.c.bf16 %v2586_v45, %v2585_v31  ;;  %v2846_v14 = vsel %vm541_vm12, %v2841_v36, 0 }
0x1a81   :  { %5943 = vmatpush3.bf16.xpose.msra.mxu1 %v2846_v14 }
0x1a82   :  { %5931 = vmatmul.mubr.msk.bf16.vlgmr.msra.gmra.mxu0 %vm1361_vm5, %v2587_v58  ;;  %5954 = vmatprep.subr.bf16.mxu1 %v6752_v0 }
0x1a83   :  { %5950 = vmatprep.mubr.msk.bf16.mxu0 %vm6753_vm0, %v6752_v0 }
0x1a88   :  { %5945 = vmatmul.mubr.msk.bf16.vlgmr.msra.gmra.mxu1 %vm541_vm12, %v7677_v19 }
0x1a89   :  { %5956 = vmatprep.mubr.msk.bf16.mxu1 %vm6753_vm0, %v6752_v0 }
0x1aea   :  { %v2941_v5 = vpop.permute.xlu1 %2940  ;;  %v2891_v15 = vpop.permute.xlu0 %2890 }
0x1aeb   :  { %v2946_v57 = vsel %vm541_vm12, %v2941_v5, 0  ;;  %v2896_v7 = vsel %vm541_vm12, %v2891_v15, 0 }
0x1aec   :  { %5949 = vmatpush3.bf16.xpose.msra.mxu0 %v2896_v7  ;;  %5955 = vmatpush3.bf16.xpose.msra.mxu1 %v2946_v57 }
0x1aed   :  { %5960 = vmatprep.subr.bf16.mxu0 %v6752_v0  ;;  %5966 = vmatprep.subr.bf16.mxu1 %v6752_v0 }
0x1aee   :  { %v2991_v16 = vpop.permute.xlu0 %2990 }
0x1aef   :  { %v2996_v42 = vsel %vm541_vm12, %v2991_v16, 0 }
0x1af3   :  { %5951 = vmatmul.mubr.msk.bf16.vlgmr.msra.gmra.mxu0 %vm541_vm12, %v7683_v23  ;;  %5957 = vmatmul.mubr.msk.bf16.vlgmr.msra.gmra.mxu1 %vm541_vm12, %v7681_v55 }
0x1af4   :  { %5961 = vmatpush3.bf16.xpose.msra.mxu0 %v2996_v42  ;;  %5962 = vmatprep.mubr.msk.bf16.mxu0 %vm6753_vm0, %v6752_v0 }
0x1af5   :  { %5972 = vmatprep.subr.bf16.mxu0 %v6752_v0  ;;  %5968 = vmatprep.mubr.msk.bf16.mxu1 %vm6753_vm0, %v6752_v0 }
0x1afb   :  { %5963 = vmatmul.mubr.msk.bf16.vlgmr.msra.gmra.mxu0 %vm541_vm12, %v7689_v3 }
0x1afc   :  { %5974 = vmatprep.mubr.msk.bf16.mxu0 %vm6753_vm0, %v6752_v0 }
0x1b42   :  { %v7724_v32 = vpop.f32.mrf.mxu0 }
0x1b44   :  { %v5932_v46 = vpop.f32.mrf.mxu0 }
0x1b46   :  { %v7726_v38 = vpop.f32.mrf.mxu0 }
0x1b48   :  { %v5933_v29 = vpop.f32.mrf.mxu0  ;;  %v2882_v48 = vpop.f32.mrf.mxu1 }
0x1b49   :  { %v3039_v10 = vmul.f32 0.35355338, %v2882_v48 }
0x1b4a   :  { %v5946_v13 = vpop.f32.mrf.mxu1 }
0x1b4b   :  { %v3047_v20 = vadd.f32 %v6740_v56, %v3039_v10 }
0x1b4c   :  { %v2885_v41 = vpop.f32.mrf.mxu1 }
0x1b4d   :  { %v3040_v22 = vmul.f32 0.35355338, %v2885_v41  ;;  %v3055_v37 = vsel %vm59_vm1, %v3047_v20, -inf }
0x1b4e   :  { %3056 = vmax.xlane.f32.xlu1 %v3055_v37  ;;  %v5947_v61 = vpop.f32.mrf.mxu1 }
0x1b4f   :  { %v3048_v54 = vadd.f32 %v6740_v56, %v3040_v22 }
0x1b51   :  { %v3058_v43 = vsel %vm59_vm1, %v3048_v54, -inf }
0x1b52   :  { %3059 = vmax.xlane.f32.xlu0 %v3058_v43 }
0x1bb3   :  { %v2932_v50 = vpop.f32.mrf.mxu0  ;;  %v2982_v18 = vpop.f32.mrf.mxu1 }
0x1bb4   :  { %v3041_v21 = vmul.f32 0.35355338, %v2932_v50  ;;  %v3043_v25 = vmul.f32 0.35355338, %v2982_v18 }
0x1bb5   :  { %v5952_v28 = vpop.f32.mrf.mxu0  ;;  %v5958_v62 = vpop.f32.mrf.mxu1 }
0x1bb6   :  { %v3049_v49 = vadd.f32 %v6740_v56, %v3041_v21  ;;  %v3051_v6 = vadd.f32 %v6740_v56, %v3043_v25 }
0x1bb7   :  { %v2935_v47 = vpop.f32.mrf.mxu0  ;;  %v2985_v51 = vpop.f32.mrf.mxu1 }
0x1bb8   :  { %v3042_v34 = vmul.f32 0.35355338, %v2935_v47  ;;  %v3044_v52 = vmul.f32 0.35355338, %v2985_v51  ;;  %v3061_v11 = vsel %vm59_vm1, %v3049_v49, -inf  ;;  %v3067_v44 = vsel %vm59_vm1, %v3051_v6, -inf }
0x1bb9   :  { %v5959_v35 = vpop.f32.mrf.mxu1  ;;  %3062 = vmax.xlane.f32.xlu0 %v3061_v11  ;;  %v5953_v59 = vpop.f32.mrf.mxu0 }
0x1bba   :  { %v3050_v60 = vadd.f32 %v6740_v56, %v3042_v34  ;;  %v3052_v53 = vadd.f32 %v6740_v56, %v3044_v52 }
0x1bbb   :  { %v3032_v30 = vpop.f32.mrf.mxu0 }
0x1bbc   :  { %v3045_v4 = vmul.f32 0.35355338, %v3032_v30  ;;  %v3064_v17 = vsel %vm59_vm1, %v3050_v60, -inf  ;;  %v3070_v31 = vsel %vm59_vm1, %v3052_v53, -inf }
0x1bbd   :  { %3068 = vmax.xlane.f32.xlu0 %v3067_v44  ;;  %3065 = vmax.xlane.f32.xlu1 %v3064_v17  ;;  %v5964_v24 = vpop.f32.mrf.mxu0 }
0x1bbe   :  { %v3053_v2 = vadd.f32 %v6740_v56, %v3045_v4 }
0x1bbf   :  { %v3035_v63 = vpop.f32.mrf.mxu0 }
0x1bc0   :  { %v3046_v45 = vmul.f32 0.35355338, %v3035_v63  ;;  %v3073_v36 = vsel %vm59_vm1, %v3053_v2, -inf }
0x1bc1   :  { %3071 = vmax.xlane.f32.xlu1 %v3070_v31  ;;  %3074 = vmax.xlane.f32.xlu0 %v3073_v36  ;;  %v5965_v58 = vpop.f32.mrf.mxu0 }
0x1bc2   :  { %v3054_v14 = vadd.f32 %v6740_v56, %v3046_v45 }
0x1bc4   :  { %v3076_v5 = vsel %vm59_vm1, %v3054_v14, -inf }
0x1bc5   :  { %3077 = vmax.xlane.f32.xlu1 %v3076_v5 }
0x1bd7   :  { %v3057_v15 = vpop.xlane.xlu1 %3056 }
0x1bd8   :  { %v3079_v57 = vsub.f32 %v3047_v20, %v3057_v15 }
0x1bda   :  { %v3087_v7 = vmul.f32 1.442695, %v3079_v57 }
0x1bdb   :  { %v3060_v16 = vpop.xlane.xlu0 %3059 }
0x1bdc   :  { %6642 = vpow2.f32 %v3087_v7  ;;  %v3080_v42 = vsub.f32 %v3048_v54, %v3060_v16 }
0x1bde   :  { %v3089_v46 = vmul.f32 1.442695, %v3080_v42 }
0x1be0   :  { %6644 = vpow2.f32 %v3089_v46 }
0x1be9   :  { %v7739_v29 = vpop.eup %6642 }
0x1bea   :  { %v3103_v48 = vsel %vm59_vm1, %v7739_v29, 0.0 }
0x1beb   :  { %3104 = vadd.xlane.f32.xlu0 %v3103_v48 }
0x1bed   :  { %v6645_v10 = vpop.eup %6644 }
0x1bee   :  { %v3106_v13 = vsel %vm59_vm1, %v6645_v10, 0.0 }
0x1bef   :  { %3107 = vadd.xlane.f32.xlu1 %v3106_v13 }
0x1c00   :  { %3194 = vrot.lane.b32.xlu1 %v7683_v23, %s6761_s20 }
0x1c01   :  { %3147 = vrot.lane.b32.xlu0 %v7677_v19, %s6761_s20 }
0x1c42   :  { %v3063_v56 = vpop.xlane.xlu0 %3062 }
0x1c43   :  { %v3081_v20 = vsub.f32 %v3049_v49, %v3063_v56 }
0x1c45   :  { %v3091_v54 = vmul.f32 1.442695, %v3081_v20 }
0x1c46   :  { %v3069_v41 = vpop.xlane.xlu0 %3068  ;;  %v3066_v22 = vpop.xlane.xlu1 %3065 }
0x1c47   :  { %v3083_v37 = vsub.f32 %v3051_v6, %v3069_v41  ;;  %v3082_v61 = vsub.f32 %v3050_v60, %v3066_v22 }
0x1c49   :  { %v3095_v43 = vmul.f32 1.442695, %v3083_v37  ;;  %v3093_v28 = vmul.f32 1.442695, %v3082_v61 }
0x1c4a   :  { %v3072_v50 = vpop.xlane.xlu1 %3071  ;;  %v3075_v18 = vpop.xlane.xlu0 %3074 }
0x1c4b   :  { %6646 = vpow2.f32 %v3095_v43  ;;  %v3084_v21 = vsub.f32 %v3052_v53, %v3072_v50  ;;  %v3085_v25 = vsub.f32 %v3053_v2, %v3075_v18 }
0x1c4c   :  { %6648 = vpow2.f32 %v3091_v54 }
0x1c4d   :  { %v3097_v62 = vmul.f32 1.442695, %v3084_v21  ;;  %v3099_v23 = vmul.f32 1.442695, %v3085_v25 }
0x1c4e   :  { %v3078_v47 = vpop.xlane.xlu1 %3077 }
0x1c4f   :  { %6650 = vpow2.f32 %v3097_v62  ;;  %v3086_v19 = vsub.f32 %v3054_v14, %v3078_v47  ;;  %v5266_v47 = vld [vmem:[%s8497_s5 + $0x130] sm:$0xff] }
0x1c50   :  { %6652 = vpow2.f32 %v3093_v28 }
0x1c51   :  { %6654 = vpow2.f32 %v3099_v23  ;;  %v3101_v49 = vmul.f32 1.442695, %v3086_v19  ;;  %v5267_v19 = vld [vmem:[%s8497_s5 + $0x138] sm:$0xff] }
0x1c53   :  { %6656 = vpow2.f32 %v3101_v49  ;;  %v7785_v49 = vpack.c.bf16 %v5267_v19, %v5266_v47 }
0x1c58   :  { %v6647_v51 = vpop.eup %6646 }
0x1c59   :  { %v3115_v34 = vsel %vm59_vm1, %v6647_v51, 0.0  ;;  %v6649_v52 = vpop.eup %6648 }
0x1c5a   :  { %3116 = vadd.xlane.f32.xlu0 %v3115_v34  ;;  %v3109_v35 = vsel %vm59_vm1, %v6649_v52, 0.0 }
0x1c5c   :  { %v6651_v11 = vpop.eup %6650 }
0x1c5d   :  { %v6653_v6 = vpop.eup %6652  ;;  %v3118_v59 = vsel %vm59_vm1, %v6651_v11, 0.0 }
0x1c5e   :  { %v7751_v60 = vpop.eup %6654  ;;  %3110 = vadd.xlane.f32.xlu0 %v3109_v35  ;;  %3119 = vadd.xlane.f32.xlu1 %v3118_v59  ;;  %v3112_v53 = vsel %vm59_vm1, %v6653_v6, 0.0  ;;  %v5264_v59 = vld [vmem:[%s8497_s5 + $0x120] sm:$0xff] }
0x1c5f   :  { %v3121_v30 = vsel %vm59_vm1, %v7751_v60, 0.0 }
0x1c60   :  { %v6657_v4 = vpop.eup %6656 }
0x1c61   :  { %v3124_v44 = vsel %vm59_vm1, %v6657_v4, 0.0 }
0x1c62   :  { %3122 = vadd.xlane.f32.xlu0 %v3121_v30  ;;  %3113 = vadd.xlane.f32.xlu1 %v3112_v53 }
0x1c66   :  { %3125 = vadd.xlane.f32.xlu1 %v3124_v44 }
0x1c74   :  { %v3105_v17 = vpop.xlane.xlu0 %3104 }
0x1c75   :  { %6658 = vrcp.f32 %v3105_v17 }
0x1c77   :  { %3241 = vrot.lane.b32.xlu1 %v7681_v55, %s6761_s20 }
0x1c78   :  { %3288 = vrot.lane.b32.xlu0 %v7689_v3, %s6761_s20  ;;  %v3148_v24 = vpop.permute.xlu0 %3147  ;;  %v3108_v2 = vpop.xlane.xlu1 %3107 }
0x1c79   :  { %6660 = vrcp.f32 %v3108_v2  ;;  %5967 = vmatpush3.bf16.msra.mxu1 %v3148_v24 }
0x1c7a   :  { %5978 = vmatprep.subr.bf16.mxu1 %v6752_v0 }
0x1c7c   :  { %v3195_v63 = vpop.permute.xlu1 %3194 }
0x1c7d   :  { %5973 = vmatpush3.bf16.msra.mxu0 %v3195_v63 }
0x1c7e   :  { %5984 = vmatprep.subr.bf16.mxu0 %v6752_v0 }
0x1c82   :  { %v6659_v45 = vpop.eup %6658 }
0x1c83   :  { %v3135_v36 = vmul.f32 %v6659_v45, %v7739_v29 }
0x1c86   :  { %v6661_v31 = vpop.eup %6660 }
0x1c87   :  { %v3136_v58 = vmul.f32 %v6661_v31, %v6645_v10 }
0x1c89   :  { %v3143_v14 = vpack.c.bf16 %v3136_v58, %v3135_v36 }
0x1c8b   :  { %5969 = vmatmul.mubr.msk.bf16.vlgmr.msra.gmra.mxu1 %vm59_vm1, %v3143_v14 }
0x1c8c   :  { %5980 = vmatprep.mubr.msk.bf16.mxu1 %vm6753_vm0, %v6752_v0 }
0x1ce3   :  { %v3117_v55 = vpop.xlane.xlu0 %3116 }
0x1ce4   :  { %6662 = vrcp.f32 %v3117_v55 }
0x1ce7   :  { %v3120_v3 = vpop.xlane.xlu1 %3119  ;;  %v3111_v5 = vpop.xlane.xlu0 %3110 }
0x1ce8   :  { %6664 = vrcp.f32 %v3120_v3 }
0x1ce9   :  { %6666 = vrcp.f32 %v3111_v5 }
0x1ceb   :  { %v3114_v15 = vpop.xlane.xlu1 %3113  ;;  %v3123_v7 = vpop.xlane.xlu0 %3122 }
0x1cec   :  { %6668 = vrcp.f32 %v3114_v15 }
0x1cef   :  { %v3126_v57 = vpop.xlane.xlu1 %3125  ;;  %v3289_v61 = vpop.permute.xlu0 %3288 }
0x1cf0   :  { %6670 = vrcp.f32 %v3126_v57 }
0x1cf1   :  { %6672 = vrcp.f32 %v3123_v7  ;;  %v6663_v42 = vpop.eup %6662 }
0x1cf2   :  { %v3139_v29 = vmul.f32 %v6663_v42, %v6647_v51 }
0x1cf3   :  { %v3242_v16 = vpop.permute.xlu1 %3241 }
0x1cf4   :  { %5979 = vmatpush3.bf16.msra.mxu1 %v3242_v16 }
0x1cf5   :  { %5990 = vmatprep.subr.bf16.mxu1 %v6752_v0  ;;  %v6665_v46 = vpop.eup %6664 }
0x1cf6   :  { %v3140_v48 = vmul.f32 %v6665_v46, %v6651_v11  ;;  %v6667_v10 = vpop.eup %6666 }
0x1cf7   :  { %v3137_v20 = vmul.f32 %v6667_v10, %v6649_v52 }
0x1cf8   :  { %v3145_v13 = vpack.c.bf16 %v3140_v48, %v3139_v29 }
0x1cf9   :  { %v6669_v56 = vpop.eup %6668 }
0x1cfa   :  { %5981 = vmatmul.mubr.msk.bf16.vlgmr.msra.gmra.mxu1 %vm59_vm1, %v3145_v13  ;;  %v3138_v41 = vmul.f32 %v6669_v56, %v6653_v6  ;;  %v5312_v13 = vld [vmem:[%s8495_s4 + $0x93] ss:$0 sm:$0xff] }
0x1cfb   :  { %5994 = vmatprep.mubr.msk.bf16.mxu1 %vm6753_vm0, %v6752_v0  ;;  %5991 = vmatpush3.bf16.msra.mxu1 %v7785_v49 }
0x1cfc   :  { %v3144_v22 = vpack.c.bf16 %v3138_v41, %v3137_v20  ;;  %5992 = vmatprep.subr.bf16.mxu1 %v6752_v0 }
0x1cfd   :  { %v6671_v37 = vpop.eup %6670 }
0x1cfe   :  { %5975 = vmatmul.mubr.msk.bf16.vlgmr.msra.gmra.mxu0 %vm59_vm1, %v3144_v22  ;;  %v6673_v54 = vpop.eup %6672  ;;  %v3142_v43 = vmul.f32 %v6671_v37, %v6657_v4 }
0x1cff   :  { %5985 = vmatpush3.bf16.msra.mxu0 %v3289_v61  ;;  %5986 = vmatprep.mubr.msk.bf16.mxu0 %vm6753_vm0, %v6752_v0  ;;  %v3141_v50 = vmul.f32 %v6673_v54, %v7751_v60  ;;  %v5265_v60 = vld [vmem:[%s8497_s5 + $0x128] sm:$0xff] }
0x1d00   :  { %5998 = vmatprep.subr.bf16.mxu0 %v6752_v0  ;;  %v7796_v30 = vpack.c.bf16 %v5265_v60, %v5264_v59  ;;  %v5274_v60 = vld [vmem:[%s8497_s5 + $0x170] sm:$0xff] }
0x1d01   :  { %v3146_v18 = vpack.c.bf16 %v3142_v43, %v3141_v50 }
0x1d02   :  { %5993 = vmatpush3.bf16.msra.mxu1 %v7796_v30 }
0x1d03   :  { %6006 = vmatprep.subr.bf16.mxu1 %v6752_v0 }
0x1d06   :  { %5987 = vmatmul.mubr.msk.bf16.vlgmr.msra.gmra.mxu0 %vm59_vm1, %v3146_v18 }
0x1d07   :  { %6002 = vmatprep.mubr.msk.bf16.mxu0 %vm6753_vm0, %v6752_v0 }
0x1d4b   :  { %v3187_v21 = vpop.f32.mrf.mxu1 }
0x1d4d   :  { %v5970_v25 = vpop.f32.mrf.mxu1 }
0x1d4f   :  { %v3190_v28 = vpop.f32.mrf.mxu1 }
0x1d51   :  { %v5971_v62 = vpop.f32.mrf.mxu1 }
0x1dba   :  { %v3281_v23 = vpop.f32.mrf.mxu1 }
0x1dbc   :  { %v5982_v51 = vpop.f32.mrf.mxu1 }
0x1dbe   :  { %v3234_v34 = vpop.f32.mrf.mxu0  ;;  %v3284_v52 = vpop.f32.mrf.mxu1 }
0x1dbf   :  { %v6433_v11 = vpack.i.bf16 %v3284_v52, %v3281_v23  ;;  %v5253_v52 = vld [vmem:[%s8495_s4 + $0x88] sm:$0xff] }
0x1dc0   :  { %v5976_v6 = vpop.f32.mrf.mxu0  ;;  %v5983_v35 = vpop.f32.mrf.mxu1 }
0x1dc1   :  { %6434 = vrot.lane.b32.xlu0 %v6433_v11, %s6763_s29  ;;  %v5250_v11 = vld [vmem:[%s8495_s4 + $0x70] sm:$0xff]  ;;  %v5251_v35 = vld [vmem:[%s8495_s4 + $0x78] sm:$0xff] }
0x1dc2   :  { %v3237_v53 = vpop.f32.mrf.mxu0  ;;  %v7843_v59 = vpack.c.bf16 %v5251_v35, %v5250_v11 }
0x1dc3   :  { %v6438_v4 = vpack.i.bf16 %v3237_v53, %v3234_v34  ;;  %v5252_v34 = vld [vmem:[%s8495_s4 + $0x80] sm:$0xff]  ;;  %v5275_v53 = vld [vmem:[%s8497_s5 + $0x178] sm:$0xff] }
0x1dc4   :  { %v5977_v44 = vpop.f32.mrf.mxu0  ;;  %v7837_v6 = vpack.c.bf16 %v5253_v52, %v5252_v34 }
0x1dc5   :  { %6439 = vrot.lane.b32.xlu1 %v6438_v4, %s6762_s28  ;;  %v7854_v4 = vpack.c.bf16 %v5275_v53, %v5274_v60  ;;  %v5318_v53 = vld [vmem:[%s8495_s4 + $0x97] ss:$0 sm:$0xff] }
0x1dc6   :  { %v3328_v17 = vpop.f32.mrf.mxu0  ;;  %5999 = vmatpush3.bf16.msra.mxu0 %v7837_v6 }
0x1dc7   :  { %6000 = vmatprep.subr.bf16.mxu0 %v6752_v0 }
0x1dc8   :  { %v5988_v24 = vpop.f32.mrf.mxu0 }
0x1dca   :  { %v3331_v2 = vpop.f32.mrf.mxu0  ;;  %6001 = vmatpush3.bf16.msra.mxu0 %v7843_v59 }
0x1dcb   :  { %v6443_v63 = vpack.i.bf16 %v3331_v2, %v3328_v17  ;;  %6018 = vmatprep.subr.bf16.mxu0 %v6752_v0 }
0x1dcc   :  { %v5989_v45 = vpop.f32.mrf.mxu0 }
0x1dcd   :  { %6444 = vrot.lane.b32.xlu1 %v6443_v63, %s6764_s30 }
0x1e33   :  { %v6435_v14 = vpop.permute.xlu0 %6434 }
0x1e34   :  { %v6437_v5 = vunpack.i.h.bf16 %v6435_v14  ;;  %v6436_v15 = vunpack.i.l.bf16 %v6435_v14 }
0x1e37   :  { %v6440_v31 = vpop.permute.xlu1 %6439 }
0x1e38   :  { %v6442_v36 = vunpack.i.h.bf16 %v6440_v31  ;;  %v6441_v58 = vunpack.i.l.bf16 %v6440_v31 }
0x1e3a   :  { %v3360_v55 = vsel %vm541_vm12, %v3190_v28, %v6442_v36  ;;  %v3359_v3 = vsel %vm541_vm12, %v3187_v21, %v6441_v58 }
0x1e3b   :  { %v3361_v42 = vsel %vm59_vm1, %v3359_v3, %v6436_v15  ;;  %v3362_v46 = vsel %vm59_vm1, %v3360_v55, %v6437_v5 }
0x1e3f   :  { %v6445_v57 = vpop.permute.xlu1 %6444 }
0x1e40   :  { %v6447_v7 = vunpack.i.h.bf16 %v6445_v57  ;;  %v6446_v16 = vunpack.i.l.bf16 %v6445_v57 }
0x1e42   :  { %v3364_v29 = vsel %vm1069_vm13, %v3362_v46, %v6447_v7  ;;  %v3363_v48 = vsel %vm1069_vm13, %v3361_v42, %v6446_v16  ;;  %v5314_v16 = vld [vmem:[%s8495_s4 + $0x94] ss:$0 sm:$0xff] }
0x1e43   :  { %v3365_v10 = vpack.c.bf16 %v3364_v29, %v3363_v48 }
0x1e45   :  { %5995 = vmatmul.mubr.msk.bf16.vlgmr.msra.gmra.mxu1 %vm410_vm7, %v3365_v10 }
0x1e46   :  { %6014 = vmatprep.mubr.msk.bf16.mxu1 %vm6753_vm0, %v6752_v0  ;;  %6007 = vmatpush3.bf16.msra.mxu1 %v7854_v4 }
0x1e47   :  { %6008 = vmatprep.subr.bf16.mxu1 %v6752_v0 }
0x1f05   :  { %v3407_v56 = vpop.f32.mrf.mxu1 }
0x1f06   :  { %v3408_v20 = vadd.f32 %v5312_v13, %v3407_v56 }
0x1f07   :  { %v5996_v41 = vpop.f32.mrf.mxu1 }
0x1f08   :  { %v7815_v22 = vadd.f32 %v3408_v20, %v7579_v40 }
0x1f09   :  { %v3410_v37 = vpop.f32.mrf.mxu1 }
0x1f0a   :  { %v3411_v61 = vadd.f32 %v5312_v13, %v3410_v37  ;;  %v3416_v54 = vsel %vm410_vm7, %v7815_v22, 0.0  ;;  %v5315_v13 = vld [vmem:[%s8495_s4 + $0x95] ss:$0 sm:$0xff] }
0x1f0b   :  { %3417 = vadd.xlane.f32.xlu0 %v3416_v54  ;;  %v5997_v43 = vpop.f32.mrf.mxu1  ;;  %v5273_v54 = vld [vmem:[%s8497_s5 + $0x168] sm:$0xff] }
0x1f0c   :  { %v7820_v50 = vadd.f32 %v3411_v61, %v7582_v26  ;;  %v5272_v61 = vld [vmem:[%s8497_s5 + $0x160] sm:$0xff] }
0x1f0d   :  { %v7873_v43 = vpack.c.bf16 %v5273_v54, %v5272_v61  ;;  %v5276_v54 = vld [vmem:[%s8497_s5 + $0x180] sm:$0xff] }
0x1f0e   :  { %v3419_v18 = vsel %vm410_vm7, %v7820_v50, 0.0 }
0x1f0f   :  { %3420 = vadd.xlane.f32.xlu1 %v3419_v18  ;;  %6009 = vmatpush3.bf16.msra.mxu1 %v7873_v43  ;;  %v5270_v18 = vld [vmem:[%s8497_s5 + $0x150] sm:$0xff] }
0x1f10   :  { %6010 = vmatprep.subr.bf16.mxu1 %v6752_v0 }
0x1f94   :  { %v3418_v21 = vpop.xlane.xlu0 %3417 }
0x1f95   :  { %v3422_v25 = vmul.f32 0.03125, %v3418_v21  ;;  %v5271_v21 = vld [vmem:[%s8497_s5 + $0x158] sm:$0xff] }
0x1f97   :  { %v3424_v28 = vsub.f32 %v7815_v22, %v3422_v25  ;;  %v7883_v25 = vpack.c.bf16 %v5271_v21, %v5270_v18  ;;  %v5277_v18 = vld [vmem:[%s8497_s5 + $0x188] sm:$0xff] }
0x1f98   :  { %v3421_v40 = vpop.xlane.xlu1 %3420  ;;  %v7983_v21 = vpack.c.bf16 %v5277_v18, %v5276_v54 }
0x1f99   :  { %v3423_v62 = vmul.f32 0.03125, %v3421_v40  ;;  %v3426_v23 = vmul.f32 %v3424_v28, %v3424_v28  ;;  %v3458_v46 = vmul.f32 %v5314_v16, %v3424_v28  ;;  %6011 = vmatpush3.bf16.msra.mxu1 %v7883_v25  ;;  %v5268_v28 = vld [vmem:[%s8497_s5 + $0x140] sm:$0xff]  ;;  %v5269_v40 = vld [vmem:[%s8497_s5 + $0x148] sm:$0xff] }
0x1f9a   :  { %6012 = vmatprep.subr.bf16.mxu1 %v6752_v0 }
0x1f9b   :  { %v3425_v47 = vsub.f32 %v7820_v50, %v3423_v62  ;;  %v3428_v19 = vsel %vm410_vm7, %v3426_v23, 0.0  ;;  %v7893_v62 = vpack.c.bf16 %v5269_v40, %v5268_v28  ;;  %v5316_v23 = vld [vmem:[%s8495_s4 + $0x96] ss:$0 sm:$0xff] }
0x1f9c   :  { %3429 = vadd.xlane.f32.xlu0 %v3428_v19 }
0x1f9d   :  { %v3427_v51 = vmul.f32 %v3425_v47, %v3425_v47  ;;  %v3459_v29 = vmul.f32 %v5314_v16, %v3425_v47  ;;  %6013 = vmatpush3.bf16.msra.mxu1 %v7893_v62 }
0x1f9e   :  { %6048 = vmatprep.subr.bf16.mxu1 %v6752_v0 }
0x1f9f   :  { %v3431_v26 = vsel %vm410_vm7, %v3427_v51, 0.0 }
0x1fa0   :  { %3432 = vadd.xlane.f32.xlu0 %v3431_v26 }
0x2025   :  { %v3430_v44 = vpop.xlane.xlu0 %3429 }
0x2026   :  { %v3434_v17 = vmul.f32 0.032258064, %v3430_v44 }
0x2028   :  { %6674 = vrsqrt.f32 %v3434_v17  ;;  %vm3438_vm10 = vcmp.eq.f32.partialorder %v3434_v17, inf  ;;  %v3441_v31 = vand.u32 2147483648, %v3434_v17  ;;  %vm3440_vm11 = vcmp.eq.f32.partialorder %v3434_v17, 0.0 }
0x2029   :  { %v3433_v24 = vpop.xlane.xlu0 %3432 }
0x202a   :  { %v3435_v2 = vmul.f32 0.032258064, %v3433_v24 }
0x202c   :  { %6676 = vrsqrt.f32 %v3435_v2  ;;  %vm3445_vm14 = vcmp.eq.f32.partialorder %v3435_v2, inf  ;;  %v3448_v5 = vand.u32 2147483648, %v3435_v2  ;;  %vm3447_vm15 = vcmp.eq.f32.partialorder %v3435_v2, 0.0 }
0x2035   :  { %v6675_v63 = vpop.eup %6674 }
0x2036   :  { %v3437_v45 = vmul.f32 %v6675_v63, %v3434_v17 }
0x2038   :  { %v3439_v36 = vsel %vm3438_vm10, %v3434_v17, %v3437_v45 }
0x2039   :  { %v6677_v58 = vpop.eup %6676  ;;  %v3442_v14 = vsel %vm3440_vm11, %v3441_v31, %v3439_v36 }
0x203a   :  { %v3450_v55 = vadd.f32 1e-06, %v3442_v14  ;;  %v3444_v3 = vmul.f32 %v6677_v58, %v3435_v2  ;;  %v5284_v14 = vld [vmem:[%s8497_s5 + $0x1c0] sm:$0xff] }
0x203c   :  { %6678 = vrcp.f32 %v3450_v55  ;;  %v3446_v15 = vsel %vm3445_vm14, %v3435_v2, %v3444_v3  ;;  %v5285_v3 = vld [vmem:[%s8497_s5 + $0x1c8] sm:$0xff] }
0x203d   :  { %v3449_v57 = vsel %vm3447_vm15, %v3448_v5, %v3446_v15  ;;  %v7942_v5 = vpack.c.bf16 %v5285_v3, %v5284_v14  ;;  %v5282_v15 = vld [vmem:[%s8497_s5 + $0x1b0] sm:$0xff] }
0x203e   :  { %v3451_v7 = vadd.f32 1e-06, %v3449_v57  ;;  %v5283_v57 = vld [vmem:[%s8497_s5 + $0x1b8] sm:$0xff] }
0x2040   :  { %6680 = vrcp.f32 %v3451_v7  ;;  %v7952_v7 = vpack.c.bf16 %v5283_v57, %v5282_v15 }
0x2049   :  { %v6679_v42 = vpop.eup %6678 }
0x204a   :  { %v3460_v48 = vmul.f32 %v6679_v42, %v3458_v46  ;;  %v5280_v46 = vld [vmem:[%s8497_s5 + $0x1a0] sm:$0xff] }
0x204c   :  { %v3466_v20 = vadd.f32 %v5315_v13, %v3460_v48 }
0x204d   :  { %v6681_v10 = vpop.eup %6680 }
0x204e   :  { %v3461_v56 = vmul.f32 %v6681_v10, %v3459_v29  ;;  %v5281_v29 = vld [vmem:[%s8497_s5 + $0x1a8] sm:$0xff] }
0x204f   :  { %v7963_v48 = vpack.c.bf16 %v5281_v29, %v5280_v46 }
0x2050   :  { %v3467_v41 = vadd.f32 %v5315_v13, %v3461_v56  ;;  %v5278_v13 = vld [vmem:[%s8497_s5 + $0x190] sm:$0xff]  ;;  %v5279_v56 = vld [vmem:[%s8497_s5 + $0x198] sm:$0xff] }
0x2052   :  { %v3468_v37 = vpack.c.bf16 %v3467_v41, %v3466_v20  ;;  %v7972_v20 = vpack.c.bf16 %v5279_v56, %v5278_v13 }
0x2054   :  { %6003 = vmatmul.mubr.msk.bf16.vlgmr.msra.gmra.mxu0 %vm410_vm7, %v3468_v37 }
0x2055   :  { %6020 = vmatprep.mubr.msk.bf16.mxu0 %vm6753_vm0, %v6752_v0 }
0x2114   :  { %v3510_v47 = vpop.f32.mrf.mxu0 }
0x2115   :  { %v3511_v51 = vadd.f32 %v5316_v23, %v3510_v47 }
0x2116   :  { %v6004_v19 = vpop.f32.mrf.mxu0 }
0x2117   :  { %v3517_v11 = vmax.f32 %v3511_v51, 0.0 }
0x2118   :  { %v3513_v26 = vpop.f32.mrf.mxu0 }
0x2119   :  { %v3514_v34 = vadd.f32 %v5316_v23, %v3513_v26 }
0x211a   :  { %v6005_v52 = vpop.f32.mrf.mxu0 }
0x211b   :  { %v3518_v35 = vmax.f32 %v3514_v34, 0.0  ;;  %v6741_v52 = vld [vmem:[%s8495_s4 + $0x49] ss:$0 sm:$0xff] }
0x211d   :  { %v3519_v60 = vpack.c.bf16 %v3518_v35, %v3517_v11  ;;  %v2626_v11 = vadd.f32 %v6741_v52, %v7724_v32  ;;  %v2629_v35 = vadd.f32 %v6741_v52, %v7726_v38 }
0x211f   :  { %6015 = vmatmul.mubr.msk.bf16.vlgmr.msra.gmra.mxu1 %vm1231_vm4, %v3519_v60  ;;  %v2632_v60 = vmax.f32 %v2626_v11, 0.0 }
0x2120   :  { %6050 = vmatprep.mubr.msk.bf16.mxu1 %vm6753_vm0, %v6752_v0 }
0x21df   :  { %v3561_v44 = vpop.f32.mrf.mxu1 }
0x21e0   :  { %v3562_v24 = vadd.f32 %v5318_v53, %v3561_v44  ;;  %v7995_v44 = vadd.f32 %v2632_v60, %v7539_v1 }
0x21e1   :  { %v6016_v17 = vpop.f32.mrf.mxu1 }
0x21e2   :  { %v7907_v31 = vadd.f32 %v3562_v24, %v7815_v22  ;;  %v5286_v22 = vld [vmem:[%s8497_s5 + $0x1d0] sm:$0xff]  ;;  %v3837_v24 = vsel %vm410_vm7, %v7995_v44, 0.0 }
0x21e3   :  { %v3564_v2 = vpop.f32.mrf.mxu1 }
0x21e4   :  { %v3565_v63 = vadd.f32 %v5318_v53, %v3564_v2  ;;  %v2633_v53 = vmax.f32 %v2629_v35, 0.0 }
0x21e5   :  { %v6017_v45 = vpop.f32.mrf.mxu1 }
0x21e6   :  { %v7910_v36 = vadd.f32 %v3565_v63, %v7820_v50  ;;  %v5287_v50 = vld [vmem:[%s8497_s5 + $0x1d8] sm:$0xff]  ;;  %v7998_v17 = vadd.f32 %v2633_v53, %v7542_v39 }
0x21e7   :  { %v7936_v55 = vpack.c.bf16 %v5287_v50, %v5286_v22 }
0x21e8   :  { %v3570_v58 = vpack.c.bf16 %v7910_v36, %v7907_v31  ;;  %v3840_v2 = vsel %vm410_vm7, %v7998_v17, 0.0 }
0x21ea   :  { %6019 = vmatpush3.bf16.msra.mxu0 %v3570_v58 }
0x21eb   :  { %6032 = vmatprep.subr.bf16.mxu0 %v6752_v0 }
0x21ed   :  { %6021 = vmatmul.mubr.msk.bf16.vlgmr.msra.gmra.mxu0 %vm59_vm1, %v6825_v8 }
0x21ee   :  { %6024 = vmatprep.mubr.msk.bf16.mxu0 %vm6753_vm0, %v6752_v0  ;;  %6033 = vmatpush3.bf16.msra.mxu0 %v7936_v55 }
0x21ef   :  { %6034 = vmatprep.subr.bf16.mxu0 %v6752_v0 }
0x21f2   :  { %6035 = vmatpush3.bf16.msra.mxu0 %v7942_v5 }
0x21f3   :  { %6036 = vmatprep.subr.bf16.mxu0 %v6752_v0 }
0x21f5   :  { %6025 = vmatmul.mubr.msk.bf16.gmra.mxu0 %vm59_vm1, %v6845_v12 }
0x21f6   :  { %6028 = vmatprep.mubr.msk.bf16.mxu0 %vm6753_vm0, %v6752_v0  ;;  %6037 = vmatpush3.bf16.msra.mxu0 %v7952_v7 }
0x21f7   :  { %6038 = vmatprep.subr.bf16.mxu0 %v6752_v0 }
0x21fa   :  { %6039 = vmatpush3.bf16.msra.mxu0 %v7963_v48 }
0x21fb   :  { %6040 = vmatprep.subr.bf16.mxu0 %v6752_v0 }
0x21fd   :  { %6029 = vmatmul.mubr.msk.bf16.gmra.mxu0 %vm59_vm1, %v6827_v9 }
0x21fe   :  { %6044 = vmatprep.mubr.msk.bf16.mxu0 %vm6753_vm0, %v6752_v0  ;;  %6041 = vmatpush3.bf16.msra.mxu0 %v7972_v20 }
0x21ff   :  { %6042 = vmatprep.subr.bf16.mxu0 %v6752_v0 }
0x2202   :  { %6043 = vmatpush3.bf16.msra.mxu0 %v7983_v21 }
0x2203   :  { %6078 = vmatprep.subr.bf16.mxu0 %v6752_v0 }
0x22ad   :  { %v3605_v16 = vpop.f32.mrf.mxu0 }
0x22af   :  { %v6022_v42 = vpop.f32.mrf.mxu0 }
0x22b1   :  { %v3608_v10 = vpop.f32.mrf.mxu0 }
0x22b3   :  { %v6023_v41 = vpop.f32.mrf.mxu0 }
0x22b5   :  { %v3613_v37 = vpop.f32.mrf.mxu0 }
0x22b7   :  { %v6026_v61 = vpop.f32.mrf.mxu0 }
0x22b9   :  { %v3616_v28 = vpop.f32.mrf.mxu0 }
0x22ba   :  { %v6448_v40 = vpack.i.bf16 %v3616_v28, %v3613_v37  ;;  %v5323_v37 = vld [vmem:[%s8495_s4 + $0x98] ss:$0 sm:$0xff] }
0x22bb   :  { %v6027_v23 = vpop.f32.mrf.mxu0 }
0x22bc   :  { %6449 = vrot.lane.b32.xlu1 %v6448_v40, %s6765_s18 }
0x22bd   :  { %v3621_v47 = vpop.f32.mrf.mxu0 }
0x22bf   :  { %v6030_v19 = vpop.f32.mrf.mxu0 }
0x22c1   :  { %v3624_v51 = vpop.f32.mrf.mxu0 }
0x22c2   :  { %v6453_v26 = vpack.i.bf16 %v3624_v51, %v3621_v47  ;;  %v5325_v51 = vld [vmem:[%s8498_s2 + $0x1] ss:$0 sm:$0xff] }
0x22c3   :  { %v6031_v34 = vpop.f32.mrf.mxu0 }
0x22c4   :  { %6454 = vrot.lane.b32.xlu0 %v6453_v26, %s6761_s20 }
0x22e0   :  { %3838 = vadd.xlane.f32.xlu1 %v3837_v24 }
0x22e3   :  { %3841 = vadd.xlane.f32.xlu0 %v3840_v2 }
0x232e   :  { %v6450_v63 = vpop.permute.xlu1 %6449 }
0x232f   :  { %v6452_v32 = vunpack.i.h.bf16 %v6450_v63  ;;  %v6451_v45 = vunpack.i.l.bf16 %v6450_v63 }
0x2331   :  { %v3645_v1 = vsel %vm410_vm7, %v3608_v10, %v6452_v32  ;;  %v3644_v50 = vsel %vm410_vm7, %v3605_v16, %v6451_v45 }
0x2336   :  { %v6455_v38 = vpop.permute.xlu0 %6454 }
0x2337   :  { %v6457_v58 = vunpack.i.h.bf16 %v6455_v38  ;;  %v6456_v22 = vunpack.i.l.bf16 %v6455_v38 }
0x2339   :  { %v3647_v39 = vsel %vm1231_vm4, %v3645_v1, %v6457_v58  ;;  %v3646_v14 = vsel %vm1231_vm4, %v3644_v50, %v6456_v22 }
0x233a   :  { %v3648_v3 = vpack.c.bf16 %v3647_v39, %v3646_v14  ;;  %v6742_v14 = vld [vmem:[%s8495_s4 + $0x90] ss:$0 sm:$0xff] }
0x233c   :  { %6045 = vmatmul.mubr.msk.bf16.vlgmr.msra.gmra.mxu0 %vm1361_vm5, %v3648_v3 }
0x233d   :  { %6079 = vmatpush3.bf16.msra.mxu0 %v7616_v27  ;;  %6082 = vmatprep.mubr.msk.bf16.mxu0 %vm6753_vm0, %v6752_v0 }
0x233e   :  { %6080 = vmatprep.subr.bf16.mxu0 %v6752_v0 }
0x2341   :  { %6081 = vmatpush3.bf16.msra.mxu0 %v7622_v33 }
0x2342   :  { %6086 = vmatprep.subr.bf16.mxu0 %v6752_v0 }
0x2369   :  { %v3839_v15 = vpop.xlane.xlu1 %3838 }
0x236a   :  { %v3843_v57 = vmul.f32 0.03125, %v3839_v15 }
0x236c   :  { %v3845_v16 = vsub.f32 %v7995_v44, %v3843_v57  ;;  %v3842_v42 = vpop.xlane.xlu0 %3841 }
0x236d   :  { %v3844_v46 = vmul.f32 0.03125, %v3842_v42 }
0x236e   :  { %v3847_v29 = vmul.f32 %v3845_v16, %v3845_v16  ;;  %v3875_v3 = vmul.f32 %v6742_v14, %v3845_v16  ;;  %v5298_v16 = vld [vmem:[%s8497_s5 + $0x230] sm:$0xff] }
0x236f   :  { %v3846_v10 = vsub.f32 %v7998_v17, %v3844_v46 }
0x2370   :  { %v3849_v27 = vsel %vm410_vm7, %v3847_v29, 0.0  ;;  %v6743_v29 = vld [vmem:[%s8495_s4 + $0x91] ss:$0 sm:$0xff] }
0x2371   :  { %3850 = vadd.xlane.f32.xlu1 %v3849_v27  ;;  %v3848_v13 = vmul.f32 %v3846_v10, %v3846_v10  ;;  %v3876_v15 = vmul.f32 %v6742_v14, %v3846_v10  ;;  %v5299_v10 = vld [vmem:[%s8497_s5 + $0x238] sm:$0xff] }
0x2373   :  { %v3852_v56 = vsel %vm410_vm7, %v3848_v13, 0.0 }
0x2374   :  { %3853 = vadd.xlane.f32.xlu0 %v3852_v56 }
0x23fa   :  { %v3851_v41 = vpop.xlane.xlu1 %3850 }
0x23fb   :  { %v3855_v33 = vmul.f32 0.032258064, %v3851_v41  ;;  %v5296_v41 = vld [vmem:[%s8497_s5 + $0x220] sm:$0xff] }
0x23fc   :  { %v3690_v61 = vpop.f32.mrf.mxu0 }
0x23fd   :  { %6682 = vrsqrt.f32 %v3855_v33  ;;  %v3854_v54 = vpop.xlane.xlu0 %3853  ;;  %v3691_v18 = vadd.f32 %v5323_v37, %v3690_v61  ;;  %vm3859_vm2 = vcmp.eq.f32.partialorder %v3855_v33, inf  ;;  %v3862_v24 = vand.u32 2147483648, %v3855_v33 }
0x23fe   :  { %v3856_v28 = vmul.f32 0.032258064, %v3854_v54  ;;  %v6046_v40 = vpop.f32.mrf.mxu0  ;;  %vm3861_vm3 = vcmp.eq.f32.partialorder %v3855_v33, 0.0  ;;  %v5294_v54 = vld [vmem:[%s8497_s5 + $0x210] sm:$0xff] }
0x23ff   :  { %v3697_v47 = vmax.f32 %v3691_v18, 0.0  ;;  %v5295_v18 = vld [vmem:[%s8497_s5 + $0x218] sm:$0xff] }
0x2400   :  { %6684 = vrsqrt.f32 %v3856_v28  ;;  %v3693_v23 = vpop.f32.mrf.mxu0  ;;  %vm3866_vm6 = vcmp.eq.f32.partialorder %v3856_v28, inf  ;;  %v3869_v58 = vand.u32 2147483648, %v3856_v28  ;;  %vm3868_vm8 = vcmp.eq.f32.partialorder %v3856_v28, 0.0 }
0x2401   :  { %v3694_v19 = vadd.f32 %v5323_v37, %v3693_v23  ;;  %v3704_v52 = vadd.f32 %v5325_v51, %v3697_v47  ;;  %v5297_v37 = vld [vmem:[%s8497_s5 + $0x228] sm:$0xff] }
0x2402   :  { %v6047_v26 = vpop.f32.mrf.mxu0  ;;  %v8062_v61 = vpack.c.bf16 %v5297_v37, %v5296_v41 }
0x2403   :  { %v3698_v34 = vmax.f32 %v3694_v19, 0.0 }
0x2405   :  { %v3705_v11 = vadd.f32 %v5325_v51, %v3698_v34 }
0x2407   :  { %v3706_v35 = vpack.c.bf16 %v3705_v11, %v3704_v52 }
0x2409   :  { %6049 = vmatpush3.bf16.msra.mxu1 %v3706_v35 }
0x240a   :  { %v6683_v60 = vpop.eup %6682  ;;  %6062 = vmatprep.subr.bf16.mxu1 %v6752_v0 }
0x240b   :  { %v3858_v53 = vmul.f32 %v6683_v60, %v3855_v33 }
0x240c   :  { %6051 = vmatmul.mubr.msk.bf16.vlgmr.msra.gmra.mxu1 %vm59_vm1, %v6825_v8 }
0x240d   :  { %v6685_v2 = vpop.eup %6684  ;;  %v3860_v63 = vsel %vm3859_vm2, %v3855_v33, %v3858_v53  ;;  %6054 = vmatprep.mubr.msk.bf16.mxu1 %vm6753_vm0, %v6752_v0  ;;  %v8056_v33 = vpack.c.bf16 %v5299_v10, %v5298_v16 }
0x240e   :  { %v3863_v32 = vsel %vm3861_vm3, %v3862_v24, %v3860_v63  ;;  %v3865_v45 = vmul.f32 %v6685_v2, %v3856_v28  ;;  %v5292_v24 = vld [vmem:[%s8497_s5 + $0x200] sm:$0xff]  ;;  %v5293_v2 = vld [vmem:[%s8497_s5 + $0x208] sm:$0xff] }
0x240f   :  { %v3871_v38 = vadd.f32 1e-06, %v3863_v32  ;;  %6063 = vmatpush3.bf16.msra.mxu1 %v8056_v33  ;;  %v8087_v63 = vpack.c.bf16 %v5293_v2, %v5292_v24 }
0x2410   :  { %v3867_v22 = vsel %vm3866_vm6, %v3856_v28, %v3865_v45  ;;  %6064 = vmatprep.subr.bf16.mxu1 %v6752_v0  ;;  %v8072_v28 = vpack.c.bf16 %v5295_v18, %v5294_v54  ;;  %v5290_v45 = vld [vmem:[%s8497_s5 + $0x1f0] sm:$0xff] }
0x2411   :  { %6686 = vrcp.f32 %v3871_v38  ;;  %v3870_v1 = vsel %vm3868_vm8, %v3869_v58, %v3867_v22  ;;  %v5291_v38 = vld [vmem:[%s8497_s5 + $0x1f8] sm:$0xff] }
0x2412   :  { %v3872_v50 = vadd.f32 1e-06, %v3870_v1  ;;  %v8097_v22 = vpack.c.bf16 %v5291_v38, %v5290_v45 }
0x2413   :  { %6065 = vmatpush3.bf16.msra.mxu1 %v8062_v61 }
0x2414   :  { %6688 = vrcp.f32 %v3872_v50  ;;  %6055 = vmatmul.mubr.msk.bf16.gmra.mxu1 %vm59_vm1, %v6845_v12  ;;  %6066 = vmatprep.subr.bf16.mxu1 %v6752_v0  ;;  %v6744_v50 = vld [vmem:[%s8495_s4 + $0x92] ss:$0 sm:$0xff] }
0x2415   :  { %6058 = vmatprep.mubr.msk.bf16.mxu1 %vm6753_vm0, %v6752_v0 }
0x2417   :  { %6067 = vmatpush3.bf16.msra.mxu1 %v8072_v28 }
0x2418   :  { %6068 = vmatprep.subr.bf16.mxu1 %v6752_v0 }
0x241b   :  { %6069 = vmatpush3.bf16.msra.mxu1 %v8087_v63 }
0x241c   :  { %6059 = vmatmul.mubr.msk.bf16.gmra.mxu1 %vm59_vm1, %v6827_v9  ;;  %6070 = vmatprep.subr.bf16.mxu1 %v6752_v0 }
0x241d   :  { %6074 = vmatprep.mubr.msk.bf16.mxu1 %vm6753_vm0, %v6752_v0 }
0x241e   :  { %v6687_v39 = vpop.eup %6686 }
0x241f   :  { %v3877_v57 = vmul.f32 %v6687_v39, %v3875_v3  ;;  %6071 = vmatpush3.bf16.msra.mxu1 %v8097_v22  ;;  %v5288_v3 = vld [vmem:[%s8497_s5 + $0x1e0] sm:$0xff] }
0x2420   :  { %6072 = vmatprep.subr.bf16.mxu1 %v6752_v0 }
0x2421   :  { %v6689_v42 = vpop.eup %6688  ;;  %v3879_v27 = vadd.f32 %v6743_v29, %v3877_v57 }
0x2422   :  { %v3878_v46 = vmul.f32 %v6689_v42, %v3876_v15  ;;  %v5289_v15 = vld [vmem:[%s8497_s5 + $0x1e8] sm:$0xff] }
0x2423   :  { %v8110_v42 = vpack.c.bf16 %v5289_v15, %v5288_v3 }
0x2424   :  { %v3880_v13 = vadd.f32 %v6743_v29, %v3878_v46 }
0x2425   :  { %6073 = vmatpush3.bf16.msra.mxu1 %v8110_v42 }
0x2426   :  { %v3881_v56 = vpack.c.bf16 %v3880_v13, %v3879_v27  ;;  %6092 = vmatprep.subr.bf16.mxu1 %v6752_v0 }
0x2428   :  { %6083 = vmatmul.mubr.msk.bf16.vlgmr.msra.gmra.mxu0 %vm410_vm7, %v3881_v56 }
0x2429   :  { %6088 = vmatprep.mubr.msk.bf16.mxu0 %vm6753_vm0, %v6752_v0 }
0x24cc   :  { %v8077_v40 = vpop.f32.mrf.mxu1 }
0x24ce   :  { %v6052_v23 = vpop.f32.mrf.mxu1 }
0x24d0   :  { %v8079_v47 = vpop.f32.mrf.mxu1 }
0x24d2   :  { %v6053_v19 = vpop.f32.mrf.mxu1 }
0x24d4   :  { %v3749_v51 = vpop.f32.mrf.mxu1 }
0x24d6   :  { %v6056_v26 = vpop.f32.mrf.mxu1 }
0x24d8   :  { %v3752_v34 = vpop.f32.mrf.mxu1 }
0x24d9   :  { %v6473_v27 = vpack.i.bf16 %v3752_v34, %v3749_v51 }
0x24da   :  { %v6057_v52 = vpop.f32.mrf.mxu1 }
0x24dc   :  { %v3757_v11 = vpop.f32.mrf.mxu1 }
0x24de   :  { %v6060_v35 = vpop.f32.mrf.mxu1 }
0x24e0   :  { %v3760_v60 = vpop.f32.mrf.mxu1 }
0x24e1   :  { %v6478_v29 = vpack.i.bf16 %v3760_v60, %v3757_v11 }
0x24e2   :  { %v6061_v53 = vpop.f32.mrf.mxu1 }
0x24e8   :  { %v3919_v32 = vpop.f32.mrf.mxu0 }
0x24e9   :  { %v3920_v39 = vadd.f32 %v6744_v50, %v3919_v32 }
0x24ea   :  { %v6084_v58 = vpop.f32.mrf.mxu0 }
0x24ec   :  { %v3922_v1 = vpop.f32.mrf.mxu0 }
0x24ed   :  { %v3923_v14 = vadd.f32 %v6744_v50, %v3922_v1 }
0x24ee   :  { %v6085_v57 = vpop.f32.mrf.mxu0 }
0x24ef   :  { %v6463_v46 = vpack.i.bf16 %v3923_v14, %v3920_v39  ;;  %v8119_v13 = vpack.c.bf16 %v3923_v14, %v3920_v39  ;;  %v8171_v57 = vld [vmem:[%s8495_s4 + $0x99] ss:$0 sm:$0xff] }
0x24f1   :  { %6464 = vrot.lane.b32.xlu0 %v6463_v46, %s6759_s16  ;;  %6459 = vrot.lane.b32.xlu1 %v6463_v46, %s6758_s15 }
0x24f5   :  { %6469 = vrot.lane.b32.xlu1 %v6463_v46, %s6757_s14  ;;  %6479 = vrot.lane.b32.xlu0 %v6478_v29, %s6761_s20 }
0x24f9   :  { %6474 = vrot.lane.b32.xlu1 %v6473_v27, %s6765_s18 }
0x24fd   :  { %3951 = vrot.lane.b32.xlu1 %v8119_v13, %s6760_s17 }
0x2563   :  { %v6465_v56 = vpop.permute.xlu0 %6464  ;;  %v6460_v16 = vpop.permute.xlu1 %6459 }
0x2564   :  { %v6467_v10 = vunpack.i.h.bf16 %v6465_v56  ;;  %v6466_v41 = vunpack.i.l.bf16 %v6465_v56  ;;  %v6462_v37 = vunpack.i.h.bf16 %v6460_v16  ;;  %v6461_v54 = vunpack.i.l.bf16 %v6460_v16 }
0x2566   :  { %v8123_v18 = vpack.c.bf16 %v6467_v10, %v6466_v41  ;;  %v8125_v23 = vpack.c.bf16 %v6462_v37, %v6461_v54 }
0x2567   :  { %v6470_v19 = vpop.permute.xlu1 %6469  ;;  %v6480_v34 = vpop.permute.xlu0 %6479 }
0x2568   :  { %v6472_v51 = vunpack.i.h.bf16 %v6470_v19  ;;  %v6471_v26 = vunpack.i.l.bf16 %v6470_v19  ;;  %4001 = vrot.lane.b32.xlu0 %v8125_v23, %s6760_s17  ;;  %4051 = vrot.lane.b32.xlu1 %v8123_v18, %s6760_s17  ;;  %v6482_v35 = vunpack.i.h.bf16 %v6480_v34  ;;  %v6481_v60 = vunpack.i.l.bf16 %v6480_v34 }
0x256a   :  { %v8131_v52 = vpack.c.bf16 %v6472_v51, %v6471_v26 }
0x256b   :  { %v6475_v11 = vpop.permute.xlu1 %6474 }
0x256c   :  { %v6477_v53 = vunpack.i.h.bf16 %v6475_v11  ;;  %v6476_v24 = vunpack.i.l.bf16 %v6475_v11  ;;  %4101 = vrot.lane.b32.xlu0 %v8131_v52, %s6760_s17  ;;  %v6745_v11 = vld [vmem:[%s8496_s1 + $0x1] ss:$0 sm:$0xff] }
0x256e   :  { %v3781_v2 = vsel %vm410_vm7, %v8079_v47, %v6477_v53  ;;  %v3780_v32 = vsel %vm410_vm7, %v8077_v40, %v6476_v24 }
0x256f   :  { %v3782_v45 = vsel %vm1231_vm4, %v3780_v32, %v6481_v60  ;;  %v3783_v38 = vsel %vm1231_vm4, %v3781_v2, %v6482_v35  ;;  %v3952_v58 = vpop.permute.xlu1 %3951 }
0x2570   :  { %v3784_v1 = vpack.c.bf16 %v3783_v38, %v3782_v45  ;;  %v3957_v50 = vsel %vm541_vm12, %v3952_v58, 0 }
0x2571   :  { %6087 = vmatpush3.bf16.xpose.msra.mxu0 %v3957_v50 }
0x2572   :  { %6075 = vmatmul.mubr.msk.bf16.vlgmr.msra.gmra.mxu1 %vm1361_vm5, %v3784_v1  ;;  %6098 = vmatprep.subr.bf16.mxu0 %v6752_v0 }
0x2573   :  { %6094 = vmatprep.mubr.msk.bf16.mxu1 %vm6753_vm0, %v6752_v0 }
0x2578   :  { %6089 = vmatmul.mubr.msk.bf16.vlgmr.msra.gmra.mxu0 %vm541_vm12, %v8119_v13 }
0x2579   :  { %6100 = vmatprep.mubr.msk.bf16.mxu0 %vm6753_vm0, %v6752_v0 }
0x25da   :  { %v4002_v40 = vpop.permute.xlu0 %4001  ;;  %v4052_v47 = vpop.permute.xlu1 %4051 }
0x25db   :  { %v4007_v39 = vsel %vm541_vm12, %v4002_v40, 0  ;;  %v4057_v14 = vsel %vm541_vm12, %v4052_v47, 0 }
0x25dc   :  { %6093 = vmatpush3.bf16.xpose.msra.mxu1 %v4007_v39  ;;  %6099 = vmatpush3.bf16.xpose.msra.mxu0 %v4057_v14 }
0x25dd   :  { %6104 = vmatprep.subr.bf16.mxu1 %v6752_v0  ;;  %6110 = vmatprep.subr.bf16.mxu0 %v6752_v0 }
0x25de   :  { %v4102_v3 = vpop.permute.xlu0 %4101 }
0x25df   :  { %v4107_v15 = vsel %vm541_vm12, %v4102_v3, 0 }
0x25e3   :  { %6095 = vmatmul.mubr.msk.bf16.vlgmr.msra.gmra.mxu1 %vm541_vm12, %v8125_v23  ;;  %6101 = vmatmul.mubr.msk.bf16.vlgmr.msra.gmra.mxu0 %vm541_vm12, %v8123_v18 }
0x25e4   :  { %6105 = vmatpush3.bf16.xpose.msra.mxu1 %v4107_v15  ;;  %6106 = vmatprep.mubr.msk.bf16.mxu1 %vm6753_vm0, %v6752_v0 }
0x25e5   :  { %6116 = vmatprep.subr.bf16.mxu1 %v6752_v0  ;;  %6112 = vmatprep.mubr.msk.bf16.mxu0 %vm6753_vm0, %v6752_v0 }
0x25eb   :  { %6107 = vmatmul.mubr.msk.bf16.vlgmr.msra.gmra.mxu1 %vm541_vm12, %v8131_v52 }
0x25ec   :  { %6118 = vmatprep.mubr.msk.bf16.mxu1 %vm6753_vm0, %v6752_v0 }
0x2632   :  { %v3826_v46 = vpop.f32.mrf.mxu1 }
0x2633   :  { %v3827_v29 = vadd.f32 %v8171_v57, %v3826_v46 }
0x2634   :  { %v6076_v27 = vpop.f32.mrf.mxu1 }
0x2635   :  { %v3833_v16 = vmax.f32 %v3827_v29, 0.0 }
0x2636   :  { %v3829_v56 = vpop.f32.mrf.mxu1 }
0x2637   :  { %v3830_v10 = vadd.f32 %v8171_v57, %v3829_v56  ;;  %v8176_v26 = vadd.f32 %v3833_v16, %v7907_v31 }
0x2638   :  { %v6077_v41 = vpop.f32.mrf.mxu1  ;;  %v3993_v37 = vpop.f32.mrf.mxu0 }
0x2639   :  { %v3834_v54 = vmax.f32 %v3830_v10, 0.0  ;;  %v4150_v19 = vmul.f32 0.35355338, %v3993_v37 }
0x263a   :  { %v6090_v51 = vpop.f32.mrf.mxu0 }
0x263b   :  { %v8179_v34 = vadd.f32 %v3834_v54, %v7910_v36  ;;  %v4158_v35 = vadd.f32 %v6745_v11, %v4150_v19 }
0x263c   :  { %v3996_v60 = vpop.f32.mrf.mxu0 }
0x263d   :  { %v4920_v53 = vpack.c.bf16 %v8179_v34, %v8176_v26  ;;  %v4151_v24 = vmul.f32 0.35355338, %v3996_v60  ;;  %v4166_v2 = vsel %vm59_vm1, %v4158_v35, -inf  ;;  %v6751_v34 = vld [vmem:[%s8495_s4 + $0x98] ss:$0 sm:$0xff] }
0x263e   :  { %4167 = vmax.xlane.f32.xlu1 %v4166_v2  ;;  %v6091_v32 = vpop.f32.mrf.mxu0 }
0x263f   :  { %v4159_v45 = vadd.f32 %v6745_v11, %v4151_v24 }
0x2641   :  { %v4169_v31 = vsel %vm59_vm1, %v4159_v45, -inf }
0x2642   :  { %4170 = vmax.xlane.f32.xlu0 %v4169_v31 }
0x26a3   :  { %v4043_v36 = vpop.f32.mrf.mxu1  ;;  %v4093_v38 = vpop.f32.mrf.mxu0 }
0x26a4   :  { %v4152_v58 = vmul.f32 0.35355338, %v4043_v36  ;;  %v4154_v1 = vmul.f32 0.35355338, %v4093_v38 }
0x26a5   :  { %v6096_v50 = vpop.f32.mrf.mxu1  ;;  %v6102_v40 = vpop.f32.mrf.mxu0 }
0x26a6   :  { %v4160_v47 = vadd.f32 %v6745_v11, %v4152_v58  ;;  %v4162_v3 = vadd.f32 %v6745_v11, %v4154_v1 }
0x26a7   :  { %v4046_v39 = vpop.f32.mrf.mxu1  ;;  %v4096_v14 = vpop.f32.mrf.mxu0 }
0x26a8   :  { %v4153_v15 = vmul.f32 0.35355338, %v4046_v39  ;;  %v4155_v46 = vmul.f32 0.35355338, %v4096_v14  ;;  %v4172_v29 = vsel %vm59_vm1, %v4160_v47, -inf  ;;  %v4178_v19 = vsel %vm59_vm1, %v4162_v3, -inf }
0x26a9   :  { %v6097_v27 = vpop.f32.mrf.mxu1  ;;  %4173 = vmax.xlane.f32.xlu0 %v4172_v29  ;;  %v6103_v56 = vpop.f32.mrf.mxu0 }
0x26aa   :  { %v4161_v16 = vadd.f32 %v6745_v11, %v4153_v15  ;;  %v4163_v41 = vadd.f32 %v6745_v11, %v4155_v46 }
0x26ab   :  { %v4143_v10 = vpop.f32.mrf.mxu1 }
0x26ac   :  { %v4156_v37 = vmul.f32 0.35355338, %v4143_v10  ;;  %v4175_v54 = vsel %vm59_vm1, %v4161_v16, -inf  ;;  %v4181_v31 = vsel %vm59_vm1, %v4163_v41, -inf }
0x26ad   :  { %v6108_v51 = vpop.f32.mrf.mxu1  ;;  %4176 = vmax.xlane.f32.xlu1 %v4175_v54  ;;  %4179 = vmax.xlane.f32.xlu0 %v4178_v19 }
0x26ae   :  { %v4164_v60 = vadd.f32 %v6745_v11, %v4156_v37 }
0x26af   :  { %v4146_v24 = vpop.f32.mrf.mxu1 }
0x26b0   :  { %v4157_v2 = vmul.f32 0.35355338, %v4146_v24  ;;  %v4184_v32 = vsel %vm59_vm1, %v4164_v60, -inf }
0x26b1   :  { %v6109_v36 = vpop.f32.mrf.mxu1  ;;  %4185 = vmax.xlane.f32.xlu0 %v4184_v32  ;;  %4182 = vmax.xlane.f32.xlu1 %v4181_v31 }
0x26b2   :  { %v4165_v38 = vadd.f32 %v6745_v11, %v4157_v2 }
0x26b4   :  { %v4187_v58 = vsel %vm59_vm1, %v4165_v38, -inf }
0x26b5   :  { %4188 = vmax.xlane.f32.xlu1 %v4187_v58 }
0x26c7   :  { %v4168_v1 = vpop.xlane.xlu1 %4167 }
0x26c8   :  { %v4190_v50 = vsub.f32 %v4158_v35, %v4168_v1 }
0x26ca   :  { %v4198_v40 = vmul.f32 1.442695, %v4190_v50 }
0x26cb   :  { %v4171_v39 = vpop.xlane.xlu0 %4170 }
0x26cc   :  { %6690 = vpow2.f32 %v4198_v40  ;;  %v4191_v14 = vsub.f32 %v4159_v45, %v4171_v39 }
0x26ce   :  { %v4200_v15 = vmul.f32 1.442695, %v4191_v14 }
0x26d0   :  { %6692 = vpow2.f32 %v4200_v15 }
0x26d9   :  { %v8194_v46 = vpop.eup %6690 }
0x26da   :  { %v4214_v29 = vsel %vm59_vm1, %v8194_v46, 0.0 }
0x26db   :  { %4215 = vadd.xlane.f32.xlu0 %v4214_v29 }
0x26dd   :  { %v6693_v27 = vpop.eup %6692 }
0x26de   :  { %v4217_v11 = vsel %vm59_vm1, %v6693_v27, 0.0 }
0x26df   :  { %4218 = vadd.xlane.f32.xlu1 %v4217_v11 }
0x26f0   :  { %4305 = vrot.lane.b32.xlu1 %v8125_v23, %s6761_s20 }
0x26f1   :  { %4258 = vrot.lane.b32.xlu0 %v8119_v13, %s6761_s20 }
0x2732   :  { %v4174_v35 = vpop.xlane.xlu0 %4173 }
0x2733   :  { %v4192_v45 = vsub.f32 %v4160_v47, %v4174_v35 }
0x2735   :  { %v4202_v51 = vmul.f32 1.442695, %v4192_v45 }
0x2736   :  { %v4177_v56 = vpop.xlane.xlu1 %4176  ;;  %v4180_v10 = vpop.xlane.xlu0 %4179 }
0x2737   :  { %v4194_v37 = vsub.f32 %v4162_v3, %v4180_v10  ;;  %v4193_v54 = vsub.f32 %v4161_v16, %v4177_v56 }
0x2739   :  { %v4206_v19 = vmul.f32 1.442695, %v4194_v37  ;;  %v4204_v36 = vmul.f32 1.442695, %v4193_v54 }
0x273a   :  { %v4186_v24 = vpop.xlane.xlu0 %4185  ;;  %v4183_v2 = vpop.xlane.xlu1 %4182 }
0x273b   :  { %v4196_v32 = vsub.f32 %v4164_v60, %v4186_v24  ;;  %v4195_v31 = vsub.f32 %v4163_v41, %v4183_v2  ;;  %6694 = vpow2.f32 %v4206_v19 }
0x273c   :  { %6696 = vpow2.f32 %v4202_v51 }
0x273d   :  { %v4208_v58 = vmul.f32 1.442695, %v4195_v31  ;;  %v4210_v23 = vmul.f32 1.442695, %v4196_v32 }
0x273e   :  { %v4189_v1 = vpop.xlane.xlu1 %4188 }
0x273f   :  { %v4197_v50 = vsub.f32 %v4165_v38, %v4189_v1  ;;  %6698 = vpow2.f32 %v4208_v58 }
0x2740   :  { %6700 = vpow2.f32 %v4204_v36 }
0x2741   :  { %6702 = vpow2.f32 %v4210_v23  ;;  %v4212_v13 = vmul.f32 1.442695, %v4197_v50 }
0x2743   :  { %6704 = vpow2.f32 %v4212_v13 }
0x2748   :  { %v6695_v47 = vpop.eup %6694 }
0x2749   :  { %v4226_v3 = vsel %vm59_vm1, %v6695_v47, 0.0  ;;  %v6697_v16 = vpop.eup %6696 }
0x274a   :  { %4227 = vadd.xlane.f32.xlu0 %v4226_v3  ;;  %v4220_v41 = vsel %vm59_vm1, %v6697_v16, 0.0 }
0x274c   :  { %v6699_v40 = vpop.eup %6698 }
0x274d   :  { %v6701_v60 = vpop.eup %6700  ;;  %v4229_v39 = vsel %vm59_vm1, %v6699_v40, 0.0 }
0x274e   :  { %v8206_v14 = vpop.eup %6702  ;;  %4221 = vadd.xlane.f32.xlu0 %v4220_v41  ;;  %4230 = vadd.xlane.f32.xlu1 %v4229_v39  ;;  %v4223_v15 = vsel %vm59_vm1, %v6701_v60, 0.0 }
0x274f   :  { %v4232_v38 = vsel %vm59_vm1, %v8206_v14, 0.0 }
0x2750   :  { %v6705_v29 = vpop.eup %6704 }
0x2751   :  { %v4235_v11 = vsel %vm59_vm1, %v6705_v29, 0.0 }
0x2752   :  { %4233 = vadd.xlane.f32.xlu0 %v4232_v38  ;;  %4224 = vadd.xlane.f32.xlu1 %v4223_v15 }
0x2756   :  { %4236 = vadd.xlane.f32.xlu1 %v4235_v11 }
0x2764   :  { %v4216_v35 = vpop.xlane.xlu0 %4215 }
0x2765   :  { %6706 = vrcp.f32 %v4216_v35 }
0x2767   :  { %4352 = vrot.lane.b32.xlu1 %v8123_v18, %s6761_s20 }
0x2768   :  { %v4259_v45 = vpop.permute.xlu0 %4258  ;;  %v4219_v56 = vpop.xlane.xlu1 %4218  ;;  %4399 = vrot.lane.b32.xlu0 %v8131_v52, %s6761_s20 }
0x2769   :  { %6708 = vrcp.f32 %v4219_v56  ;;  %6111 = vmatpush3.bf16.msra.mxu0 %v4259_v45 }
0x276a   :  { %6122 = vmatprep.subr.bf16.mxu0 %v6752_v0 }
0x276c   :  { %v4306_v10 = vpop.permute.xlu1 %4305 }
0x276d   :  { %6117 = vmatpush3.bf16.msra.mxu1 %v4306_v10 }
0x276e   :  { %6128 = vmatprep.subr.bf16.mxu1 %v6752_v0 }
0x2772   :  { %v6707_v37 = vpop.eup %6706 }
0x2773   :  { %v4246_v19 = vmul.f32 %v6707_v37, %v8194_v46 }
0x2776   :  { %v6709_v54 = vpop.eup %6708 }
0x2777   :  { %v4247_v51 = vmul.f32 %v6709_v54, %v6693_v27 }
0x2779   :  { %v4254_v24 = vpack.c.bf16 %v4247_v51, %v4246_v19 }
0x277b   :  { %6113 = vmatmul.mubr.msk.bf16.vlgmr.msra.gmra.mxu0 %vm59_vm1, %v4254_v24 }
0x277c   :  { %6124 = vmatprep.mubr.msk.bf16.mxu0 %vm6753_vm0, %v6752_v0 }
0x27d3   :  { %v4228_v18 = vpop.xlane.xlu0 %4227 }
0x27d4   :  { %6710 = vrcp.f32 %v4228_v18 }
0x27d7   :  { %v4231_v52 = vpop.xlane.xlu1 %4230  ;;  %v4222_v2 = vpop.xlane.xlu0 %4221 }
0x27d8   :  { %6712 = vrcp.f32 %v4231_v52 }
0x27d9   :  { %6714 = vrcp.f32 %v4222_v2 }
0x27db   :  { %v4225_v32 = vpop.xlane.xlu1 %4224  ;;  %v4234_v36 = vpop.xlane.xlu0 %4233 }
0x27dc   :  { %6716 = vrcp.f32 %v4225_v32 }
0x27df   :  { %v4237_v31 = vpop.xlane.xlu1 %4236  ;;  %v4400_v11 = vpop.permute.xlu0 %4399 }
0x27e0   :  { %6718 = vrcp.f32 %v4237_v31 }
0x27e1   :  { %6720 = vrcp.f32 %v4234_v36  ;;  %v6711_v27 = vpop.eup %6710 }
0x27e2   :  { %v4250_v23 = vmul.f32 %v6711_v27, %v6695_v47 }
0x27e3   :  { %v4353_v46 = vpop.permute.xlu1 %4352 }
0x27e4   :  { %6123 = vmatpush3.bf16.msra.mxu0 %v4353_v46 }
0x27e5   :  { %6134 = vmatprep.subr.bf16.mxu0 %v6752_v0  ;;  %v6713_v58 = vpop.eup %6712 }
0x27e6   :  { %v4251_v1 = vmul.f32 %v6713_v58, %v6699_v40  ;;  %v6715_v50 = vpop.eup %6714 }
0x27e7   :  { %v4248_v41 = vmul.f32 %v6715_v50, %v6697_v16 }
0x27e8   :  { %v4256_v13 = vpack.c.bf16 %v4251_v1, %v4250_v23 }
0x27e9   :  { %v6717_v3 = vpop.eup %6716 }
0x27ea   :  { %v4249_v39 = vmul.f32 %v6717_v3, %v6701_v60  ;;  %6125 = vmatmul.mubr.msk.bf16.vlgmr.msra.gmra.mxu0 %vm59_vm1, %v4256_v13 }
0x27eb   :  { %6135 = vmatpush3.bf16.msra.mxu0 %v7785_v49  ;;  %6138 = vmatprep.mubr.msk.bf16.mxu0 %vm6753_vm0, %v6752_v0 }
0x27ec   :  { %v4255_v38 = vpack.c.bf16 %v4249_v39, %v4248_v41  ;;  %6136 = vmatprep.subr.bf16.mxu0 %v6752_v0 }
0x27ed   :  { %v6719_v15 = vpop.eup %6718 }
0x27ee   :  { %6119 = vmatmul.mubr.msk.bf16.vlgmr.msra.gmra.mxu1 %vm59_vm1, %v4255_v38  ;;  %v6721_v47 = vpop.eup %6720  ;;  %v4253_v16 = vmul.f32 %v6719_v15, %v6705_v29 }
0x27ef   :  { %6129 = vmatpush3.bf16.msra.mxu1 %v4400_v11  ;;  %6130 = vmatprep.mubr.msk.bf16.mxu1 %vm6753_vm0, %v6752_v0  ;;  %v4252_v49 = vmul.f32 %v6721_v47, %v8206_v14 }
0x27f0   :  { %6137 = vmatpush3.bf16.msra.mxu0 %v7796_v30  ;;  %6142 = vmatprep.subr.bf16.mxu1 %v6752_v0 }
0x27f1   :  { %6150 = vmatprep.subr.bf16.mxu0 %v6752_v0  ;;  %v4257_v40 = vpack.c.bf16 %v4253_v16, %v4252_v49 }
0x27f6   :  { %6131 = vmatmul.mubr.msk.bf16.vlgmr.msra.gmra.mxu1 %vm59_vm1, %v4257_v40 }
0x27f7   :  { %6143 = vmatpush3.bf16.msra.mxu1 %v7837_v6  ;;  %6146 = vmatprep.mubr.msk.bf16.mxu1 %vm6753_vm0, %v6752_v0 }
0x27f8   :  { %6144 = vmatprep.subr.bf16.mxu1 %v6752_v0 }
0x27fb   :  { %6145 = vmatpush3.bf16.msra.mxu1 %v7843_v59 }
0x27fc   :  { %6162 = vmatprep.subr.bf16.mxu1 %v6752_v0 }
0x283b   :  { %v4298_v30 = vpop.f32.mrf.mxu0 }
0x283d   :  { %v6114_v60 = vpop.f32.mrf.mxu0 }
0x283f   :  { %v4301_v29 = vpop.f32.mrf.mxu0 }
0x2841   :  { %v6115_v35 = vpop.f32.mrf.mxu0 }
0x28aa   :  { %v4392_v45 = vpop.f32.mrf.mxu0 }
0x28ac   :  { %v6126_v14 = vpop.f32.mrf.mxu0 }
0x28ae   :  { %v4345_v56 = vpop.f32.mrf.mxu1  ;;  %v4395_v10 = vpop.f32.mrf.mxu0 }
0x28af   :  { %v6483_v37 = vpack.i.bf16 %v4395_v10, %v4392_v45 }
0x28b0   :  { %v6120_v54 = vpop.f32.mrf.mxu1  ;;  %v6127_v6 = vpop.f32.mrf.mxu0 }
0x28b1   :  { %6484 = vrot.lane.b32.xlu0 %v6483_v37, %s6763_s29 }
0x28b2   :  { %v4348_v19 = vpop.f32.mrf.mxu1 }
0x28b3   :  { %v6488_v51 = vpack.i.bf16 %v4348_v19, %v4345_v56 }
0x28b4   :  { %v6121_v24 = vpop.f32.mrf.mxu1 }
0x28b5   :  { %6489 = vrot.lane.b32.xlu1 %v6488_v51, %s6762_s28 }
0x28b6   :  { %v4439_v59 = vpop.f32.mrf.mxu1 }
0x28b8   :  { %v6132_v18 = vpop.f32.mrf.mxu1 }
0x28ba   :  { %v4442_v52 = vpop.f32.mrf.mxu1 }
0x28bb   :  { %v6493_v2 = vpack.i.bf16 %v4442_v52, %v4439_v59 }
0x28bc   :  { %v6133_v32 = vpop.f32.mrf.mxu1 }
0x28bd   :  { %6494 = vrot.lane.b32.xlu1 %v6493_v2, %s6764_s30 }
0x2923   :  { %v6485_v27 = vpop.permute.xlu0 %6484 }
0x2924   :  { %v6487_v1 = vunpack.i.h.bf16 %v6485_v27  ;;  %v6486_v50 = vunpack.i.l.bf16 %v6485_v27 }
0x2927   :  { %v6490_v31 = vpop.permute.xlu1 %6489 }
0x2928   :  { %v6492_v36 = vunpack.i.h.bf16 %v6490_v31  ;;  %v6491_v46 = vunpack.i.l.bf16 %v6490_v31 }
0x292a   :  { %v4470_v58 = vsel %vm541_vm12, %v4298_v30, %v6491_v46  ;;  %v4471_v23 = vsel %vm541_vm12, %v4301_v29, %v6492_v36 }
0x292b   :  { %v4472_v39 = vsel %vm59_vm1, %v4470_v58, %v6486_v50  ;;  %v4473_v38 = vsel %vm59_vm1, %v4471_v23, %v6487_v1 }
0x292f   :  { %v6495_v13 = vpop.permute.xlu1 %6494 }
0x2930   :  { %v6497_v3 = vunpack.i.h.bf16 %v6495_v13  ;;  %v6496_v41 = vunpack.i.l.bf16 %v6495_v13 }
0x2932   :  { %v4474_v15 = vsel %vm1069_vm13, %v4472_v39, %v6496_v41  ;;  %v4475_v11 = vsel %vm1069_vm13, %v4473_v38, %v6497_v3  ;;  %v6747_v41 = vld [vmem:[%s8495_s4 + $0x94] ss:$0 sm:$0xff] }
0x2933   :  { %v4476_v47 = vpack.c.bf16 %v4475_v11, %v4474_v15 }
0x2935   :  { %6139 = vmatmul.mubr.msk.bf16.vlgmr.msra.gmra.mxu0 %vm410_vm7, %v4476_v47 }
0x2936   :  { %6151 = vmatpush3.bf16.msra.mxu0 %v7854_v4  ;;  %6158 = vmatprep.mubr.msk.bf16.mxu0 %vm6753_vm0, %v6752_v0  ;;  %v6746_v4 = vld [vmem:[%s8495_s4 + $0x93] ss:$0 sm:$0xff] }
0x2937   :  { %6152 = vmatprep.subr.bf16.mxu0 %v6752_v0 }
0x293a   :  { %6153 = vmatpush3.bf16.msra.mxu0 %v7873_v43 }
0x293b   :  { %6154 = vmatprep.subr.bf16.mxu0 %v6752_v0 }
0x293e   :  { %6155 = vmatpush3.bf16.msra.mxu0 %v7883_v25 }
0x293f   :  { %6156 = vmatprep.subr.bf16.mxu0 %v6752_v0 }
0x2942   :  { %6157 = vmatpush3.bf16.msra.mxu0 %v7893_v62 }
0x2943   :  { %6192 = vmatprep.subr.bf16.mxu0 %v6752_v0 }
0x29f5   :  { %v4514_v16 = vpop.f32.mrf.mxu0 }
0x29f6   :  { %v4515_v49 = vadd.f32 %v6746_v4, %v4514_v16  ;;  %v6748_v16 = vld [vmem:[%s8495_s4 + $0x95] ss:$0 sm:$0xff] }
0x29f7   :  { %v6140_v40 = vpop.f32.mrf.mxu0 }
0x29f8   :  { %v8266_v30 = vadd.f32 %v4515_v49, %v7995_v44 }
0x29f9   :  { %v4517_v43 = vpop.f32.mrf.mxu0 }
0x29fa   :  { %v4518_v60 = vadd.f32 %v6746_v4, %v4517_v43  ;;  %v4523_v25 = vsel %vm410_vm7, %v8266_v30, 0.0 }
0x29fb   :  { %4524 = vadd.xlane.f32.xlu0 %v4523_v25  ;;  %v6141_v29 = vpop.f32.mrf.mxu0  ;;  %v6749_v25 = vld [vmem:[%s8495_s4 + $0x96] ss:$0 sm:$0xff] }
0x29fc   :  { %v8271_v62 = vadd.f32 %v4518_v60, %v7998_v17 }
0x29fe   :  { %v4526_v35 = vsel %vm410_vm7, %v8271_v62, 0.0 }
0x29ff   :  { %4527 = vadd.xlane.f32.xlu1 %v4526_v35 }
0x2a84   :  { %v4525_v45 = vpop.xlane.xlu0 %4524 }
0x2a85   :  { %v4529_v14 = vmul.f32 0.03125, %v4525_v45 }
0x2a87   :  { %v4531_v56 = vsub.f32 %v8266_v30, %v4529_v14 }
0x2a88   :  { %v4528_v44 = vpop.xlane.xlu1 %4527 }
0x2a89   :  { %v4530_v10 = vmul.f32 0.03125, %v4528_v44  ;;  %v4533_v37 = vmul.f32 %v4531_v56, %v4531_v56  ;;  %v4561_v39 = vmul.f32 %v6747_v41, %v4531_v56 }
0x2a8b   :  { %v4532_v54 = vsub.f32 %v8271_v62, %v4530_v10  ;;  %v4535_v6 = vsel %vm410_vm7, %v4533_v37, 0.0 }
0x2a8c   :  { %4536 = vadd.xlane.f32.xlu0 %v4535_v6  ;;  %v6750_v6 = vld [vmem:[%s8495_s4 + $0x97] ss:$0 sm:$0xff] }
0x2a8d   :  { %v4534_v19 = vmul.f32 %v4532_v54, %v4532_v54  ;;  %v4562_v38 = vmul.f32 %v6747_v41, %v4532_v54 }
0x2a8f   :  { %v4538_v17 = vsel %vm410_vm7, %v4534_v19, 0.0 }
0x2a90   :  { %4539 = vadd.xlane.f32.xlu0 %v4538_v17 }
0x2b15   :  { %v4537_v51 = vpop.xlane.xlu0 %4536 }
0x2b16   :  { %v4541_v24 = vmul.f32 0.032258064, %v4537_v51 }
0x2b18   :  { %6722 = vrsqrt.f32 %v4541_v24  ;;  %vm4545_vm12 = vcmp.eq.f32.partialorder %v4541_v24, inf  ;;  %v4548_v32 = vand.u32 2147483648, %v4541_v24  ;;  %vm4547_vm13 = vcmp.eq.f32.partialorder %v4541_v24, 0.0 }
0x2b19   :  { %v4540_v59 = vpop.xlane.xlu0 %4539 }
0x2b1a   :  { %v4542_v18 = vmul.f32 0.032258064, %v4540_v59 }
0x2b1c   :  { %6724 = vrsqrt.f32 %v4542_v18  ;;  %vm4552_vm9 = vcmp.eq.f32.partialorder %v4542_v18, inf  ;;  %v4555_v23 = vand.u32 2147483648, %v4542_v18  ;;  %vm4554_vm10 = vcmp.eq.f32.partialorder %v4542_v18, 0.0 }
0x2b25   :  { %v6723_v52 = vpop.eup %6722 }
0x2b26   :  { %v4544_v2 = vmul.f32 %v6723_v52, %v4541_v24 }
0x2b28   :  { %v4546_v31 = vsel %vm4545_vm12, %v4541_v24, %v4544_v2 }
0x2b29   :  { %v6725_v36 = vpop.eup %6724  ;;  %v4549_v46 = vsel %vm4547_vm13, %v4548_v32, %v4546_v31 }
0x2b2a   :  { %v4557_v27 = vadd.f32 1e-06, %v4549_v46  ;;  %v4551_v58 = vmul.f32 %v6725_v36, %v4542_v18 }
0x2b2c   :  { %6726 = vrcp.f32 %v4557_v27  ;;  %v4553_v1 = vsel %vm4552_vm9, %v4542_v18, %v4551_v58 }
0x2b2d   :  { %v4556_v50 = vsel %vm4554_vm10, %v4555_v23, %v4553_v1 }
0x2b2e   :  { %v4558_v13 = vadd.f32 1e-06, %v4556_v50 }
0x2b30   :  { %6728 = vrcp.f32 %v4558_v13 }
0x2b39   :  { %v6727_v3 = vpop.eup %6726 }
0x2b3a   :  { %v4563_v15 = vmul.f32 %v6727_v3, %v4561_v39 }
0x2b3c   :  { %v4565_v4 = vadd.f32 %v6748_v16, %v4563_v15 }
0x2b3d   :  { %v6729_v11 = vpop.eup %6728 }
0x2b3e   :  { %v4564_v47 = vmul.f32 %v6729_v11, %v4562_v38 }
0x2b40   :  { %v4566_v49 = vadd.f32 %v6748_v16, %v4564_v47 }
0x2b42   :  { %v4567_v40 = vpack.c.bf16 %v4566_v49, %v4565_v4 }
0x2b44   :  { %6147 = vmatmul.mubr.msk.bf16.vlgmr.msra.gmra.mxu1 %vm410_vm7, %v4567_v40  ;;  %v5348_v40 = vld [vmem:[%s8498_s2 + $0x3] ss:$0 sm:$0xff] }
0x2b45   :  { %6164 = vmatprep.mubr.msk.bf16.mxu1 %vm6753_vm0, %v6752_v0 }
0x2c04   :  { %v4605_v43 = vpop.f32.mrf.mxu1 }
0x2c05   :  { %v4606_v29 = vadd.f32 %v6749_v25, %v4605_v43 }
0x2c06   :  { %v6148_v60 = vpop.f32.mrf.mxu1 }
0x2c07   :  { %v4612_v56 = vmax.f32 %v4606_v29, 0.0 }
0x2c08   :  { %v4608_v35 = vpop.f32.mrf.mxu1 }
0x2c09   :  { %v4609_v45 = vadd.f32 %v6749_v25, %v4608_v35 }
0x2c0a   :  { %v6149_v14 = vpop.f32.mrf.mxu1 }
0x2c0b   :  { %v4613_v44 = vmax.f32 %v4609_v45, 0.0 }
0x2c0d   :  { %v4614_v10 = vpack.c.bf16 %v4613_v44, %v4612_v56 }
0x2c0f   :  { %6159 = vmatmul.mubr.msk.bf16.vlgmr.msra.gmra.mxu0 %vm1231_vm4, %v4614_v10 }
0x2c10   :  { %6194 = vmatprep.mubr.msk.bf16.mxu0 %vm6753_vm0, %v6752_v0 }
0x2ccf   :  { %v4652_v37 = vpop.f32.mrf.mxu0 }
0x2cd0   :  { %v4653_v19 = vadd.f32 %v6750_v6, %v4652_v37 }
0x2cd1   :  { %v6160_v54 = vpop.f32.mrf.mxu0 }
0x2cd2   :  { %v8298_v59 = vadd.f32 %v4653_v19, %v8266_v30 }
0x2cd3   :  { %v4655_v17 = vpop.f32.mrf.mxu0 }
0x2cd4   :  { %v4656_v51 = vadd.f32 %v6750_v6, %v4655_v17 }
0x2cd5   :  { %v6161_v24 = vpop.f32.mrf.mxu0 }
0x2cd6   :  { %v8301_v18 = vadd.f32 %v4656_v51, %v8271_v62 }
0x2cd8   :  { %v4661_v52 = vpack.c.bf16 %v8301_v18, %v8298_v59 }
0x2cda   :  { %6163 = vmatpush3.bf16.msra.mxu1 %v4661_v52 }
0x2cdb   :  { %6176 = vmatprep.subr.bf16.mxu1 %v6752_v0 }
0x2cdd   :  { %6165 = vmatmul.mubr.msk.bf16.vlgmr.msra.gmra.mxu1 %vm59_vm1, %v6825_v8 }
0x2cde   :  { %6168 = vmatprep.mubr.msk.bf16.mxu1 %vm6753_vm0, %v6752_v0  ;;  %6177 = vmatpush3.bf16.msra.mxu1 %v7936_v55 }
0x2cdf   :  { %6178 = vmatprep.subr.bf16.mxu1 %v6752_v0 }
0x2ce2   :  { %6179 = vmatpush3.bf16.msra.mxu1 %v7942_v5 }
0x2ce3   :  { %6180 = vmatprep.subr.bf16.mxu1 %v6752_v0 }
0x2ce5   :  { %6169 = vmatmul.mubr.msk.bf16.gmra.mxu1 %vm59_vm1, %v6845_v12 }
0x2ce6   :  { %6172 = vmatprep.mubr.msk.bf16.mxu1 %vm6753_vm0, %v6752_v0  ;;  %6181 = vmatpush3.bf16.msra.mxu1 %v7952_v7 }
0x2ce7   :  { %6182 = vmatprep.subr.bf16.mxu1 %v6752_v0 }
0x2cea   :  { %6183 = vmatpush3.bf16.msra.mxu1 %v7963_v48 }
0x2ceb   :  { %6184 = vmatprep.subr.bf16.mxu1 %v6752_v0 }
0x2ced   :  { %6173 = vmatmul.mubr.msk.bf16.gmra.mxu1 %vm59_vm1, %v6827_v9 }
0x2cee   :  { %6185 = vmatpush3.bf16.msra.mxu1 %v7972_v20  ;;  %6188 = vmatprep.mubr.msk.bf16.mxu1 %vm6753_vm0, %v6752_v0 }
0x2cef   :  { %6186 = vmatprep.subr.bf16.mxu1 %v6752_v0 }
0x2cf2   :  { %6187 = vmatpush3.bf16.msra.mxu1 %v7983_v21 }
0x2cf3   :  { %6222 = vmatprep.subr.bf16.mxu1 %v6752_v0 }
0x2d9d   :  { %v4696_v55 = vpop.f32.mrf.mxu1 }
0x2d9f   :  { %v6166_v5 = vpop.f32.mrf.mxu1 }
0x2da1   :  { %v4699_v7 = vpop.f32.mrf.mxu1 }
0x2da3   :  { %v6167_v48 = vpop.f32.mrf.mxu1 }
0x2da5   :  { %v4704_v30 = vpop.f32.mrf.mxu1 }
0x2da7   :  { %v6170_v62 = vpop.f32.mrf.mxu1 }
0x2da9   :  { %v4707_v2 = vpop.f32.mrf.mxu1 }
0x2daa   :  { %v6498_v32 = vpack.i.bf16 %v4707_v2, %v4704_v30 }
0x2dab   :  { %v6171_v31 = vpop.f32.mrf.mxu1 }
0x2dac   :  { %6499 = vrot.lane.b32.xlu1 %v6498_v32, %s6765_s18  ;;  %v47_v32 = vld [vmem:[%s8494_s3 + $0x9a] sm:$0xff]  ;;  %v48_v31 = vld [vmem:[%s8494_s3 + $0xa2] sm:$0xff] }
0x2dad   :  { %v4712_v20 = vpop.f32.mrf.mxu1 }
0x2daf   :  { %v6174_v36 = vpop.f32.mrf.mxu1 }
0x2db0   :  { %v54_v36 = vpack.c.bf16 %v48_v31, %v47_v32 }
0x2db1   :  { %v4715_v46 = vpop.f32.mrf.mxu1 }
0x2db2   :  { %v6503_v27 = vpack.i.bf16 %v4715_v46, %v4712_v20  ;;  %v45_v20 = vld [vmem:[%s8494_s3 + $0x8a] sm:$0xff]  ;;  %v46_v46 = vld [vmem:[%s8494_s3 + $0x92] sm:$0xff] }
0x2db3   :  { %v6175_v58 = vpop.f32.mrf.mxu1 }
0x2db4   :  { %6504 = vrot.lane.b32.xlu0 %v6503_v27, %s6761_s20  ;;  %v53_v58 = vpack.c.bf16 %v46_v46, %v45_v20 }
0x2e1e   :  { %v6500_v21 = vpop.permute.xlu1 %6499 }
0x2e1f   :  { %v6502_v23 = vunpack.i.h.bf16 %v6500_v21  ;;  %v6501_v1 = vunpack.i.l.bf16 %v6500_v21 }
0x2e21   :  { %v4736_v41 = vsel %vm410_vm7, %v4699_v7, %v6502_v23  ;;  %v4735_v39 = vsel %vm410_vm7, %v4696_v55, %v6501_v1  ;;  %v43_v23 = vld [vmem:[%s8494_s3 + $0x7a] sm:$0xff]  ;;  %v44_v1 = vld [vmem:[%s8494_s3 + $0x82] sm:$0xff] }
0x2e26   :  { %v6505_v50 = vpop.permute.xlu0 %6504 }
0x2e27   :  { %v6507_v13 = vunpack.i.h.bf16 %v6505_v50  ;;  %v6506_v3 = vunpack.i.l.bf16 %v6505_v50 }
0x2e29   :  { %v4738_v38 = vsel %vm1231_vm4, %v4736_v41, %v6507_v13  ;;  %v4737_v15 = vsel %vm1231_vm4, %v4735_v39, %v6506_v3  ;;  %v52_v13 = vpack.c.bf16 %v44_v1, %v43_v23  ;;  %v41_v41 = vld [vmem:[%s8494_s3 + $0x6a] sm:$0xff]  ;;  %v42_v39 = vld [vmem:[%s8494_s3 + $0x72] sm:$0xff] }
0x2e2a   :  { %v4739_v11 = vpack.c.bf16 %v4738_v38, %v4737_v15  ;;  %v51_v15 = vpack.c.bf16 %v42_v39, %v41_v41 }
0x2e2c   :  { %6189 = vmatmul.mubr.msk.bf16.vlgmr.msra.gmra.mxu1 %vm1361_vm5, %v4739_v11 }
0x2e2d   :  { %6223 = vmatpush3.bf16.msra.mxu1 %v4920_v53  ;;  %6224 = vmatprep.mubr.msk.bf16.mxu1 %vm6753_vm0, %v6752_v0 }
0x2e2e   :  { %6236 = vmatprep.subr.bf16.mxu1 %v6752_v0 }
0x2e34   :  { %6225 = vmatmul.mubr.msk.bf16.vlgmr.msra.gmra.mxu1 %vm59_vm1, %v6825_v8 }
0x2e35   :  { %6228 = vmatprep.mubr.msk.bf16.mxu1 %vm6753_vm0, %v6752_v0  ;;  %6237 = vmatpush3.bf16.msra.mxu1 %v54_v36 }
0x2e36   :  { %6238 = vmatprep.subr.bf16.mxu1 %v6752_v0 }
0x2e39   :  { %6239 = vmatpush3.bf16.msra.mxu1 %v53_v58 }
0x2e3a   :  { %6240 = vmatprep.subr.bf16.mxu1 %v6752_v0 }
0x2e3c   :  { %6229 = vmatmul.mubr.msk.bf16.gmra.mxu1 %vm59_vm1, %v6845_v12 }
0x2e3d   :  { %6232 = vmatprep.mubr.msk.bf16.mxu1 %vm6753_vm0, %v6752_v0  ;;  %6241 = vmatpush3.bf16.msra.mxu1 %v52_v13 }
0x2e3e   :  { %6242 = vmatprep.subr.bf16.mxu1 %v6752_v0 }
0x2e41   :  { %6243 = vmatpush3.bf16.msra.mxu1 %v51_v15 }
0x2e42   :  { %6244 = vmatprep.subr.bf16.mxu1 %v6752_v0 }
0x2e44   :  { %6233 = vmatmul.mubr.msk.bf16.gmra.mxu1 %vm59_vm1, %v6827_v9 }
0x2e45   :  { %6248 = vmatprep.mubr.msk.bf16.mxu1 %vm6753_vm0, %v6752_v0 }
0x2eec   :  { %v4777_v26 = vpop.f32.mrf.mxu1 }
0x2eed   :  { %v4778_v53 = vadd.f32 %v6751_v34, %v4777_v26  ;;  %v39_v26 = vld [vmem:[%s8494_s3 + $0x5a] sm:$0xff] }
0x2eee   :  { %v6190_v47 = vpop.f32.mrf.mxu1 }
0x2eef   :  { %v4784_v4 = vmax.f32 %v4778_v53, 0.0 }
0x2ef0   :  { %v4780_v16 = vpop.f32.mrf.mxu1 }
0x2ef1   :  { %v4781_v49 = vadd.f32 %v6751_v34, %v4780_v16  ;;  %v4791_v25 = vadd.f32 %v5348_v40, %v4784_v4  ;;  %v40_v34 = vld [vmem:[%s8494_s3 + $0x62] sm:$0xff] }
0x2ef2   :  { %v6191_v43 = vpop.f32.mrf.mxu1  ;;  %v50_v16 = vpack.c.bf16 %v40_v34, %v39_v26 }
0x2ef3   :  { %v4785_v60 = vmax.f32 %v4781_v49, 0.0 }
0x2ef4   :  { %v8395_v2 = vpop.f32.mrf.mxu1  ;;  %6245 = vmatpush3.bf16.msra.mxu1 %v50_v16 }
0x2ef5   :  { %v4792_v29 = vadd.f32 %v5348_v40, %v4785_v60  ;;  %6246 = vmatprep.subr.bf16.mxu1 %v6752_v0 }
0x2ef6   :  { %v6226_v27 = vpop.f32.mrf.mxu1 }
0x2ef7   :  { %v4793_v35 = vpack.c.bf16 %v4792_v29, %v4791_v25 }
0x2ef8   :  { %v8409_v21 = vpop.f32.mrf.mxu1 }
0x2ef9   :  { %6193 = vmatpush3.bf16.msra.mxu0 %v4793_v35 }
0x2efa   :  { %6206 = vmatprep.subr.bf16.mxu0 %v6752_v0  ;;  %v6227_v50 = vpop.f32.mrf.mxu1 }
0x2efc   :  { %6195 = vmatmul.mubr.msk.bf16.vlgmr.msra.gmra.mxu0 %vm59_vm1, %v6825_v8  ;;  %v4963_v3 = vpop.f32.mrf.mxu1 }
0x2efd   :  { %6198 = vmatprep.mubr.msk.bf16.mxu0 %vm6753_vm0, %v6752_v0  ;;  %6207 = vmatpush3.bf16.msra.mxu0 %v8056_v33 }
0x2efe   :  { %6208 = vmatprep.subr.bf16.mxu0 %v6752_v0  ;;  %v6230_v38 = vpop.f32.mrf.mxu1 }
0x2f00   :  { %v4966_v11 = vpop.f32.mrf.mxu1 }
0x2f01   :  { %6209 = vmatpush3.bf16.msra.mxu0 %v8062_v61  ;;  %v6518_v53 = vpack.i.bf16 %v4966_v11, %v4963_v3 }
0x2f02   :  { %6210 = vmatprep.subr.bf16.mxu0 %v6752_v0  ;;  %v6231_v47 = vpop.f32.mrf.mxu1 }
0x2f03   :  { %6519 = vrot.lane.b32.xlu0 %v6518_v53, %s6765_s18 }
0x2f04   :  { %6199 = vmatmul.mubr.msk.bf16.gmra.mxu0 %vm59_vm1, %v6845_v12  ;;  %v4971_v4 = vpop.f32.mrf.mxu1 }
0x2f05   :  { %6202 = vmatprep.mubr.msk.bf16.mxu0 %vm6753_vm0, %v6752_v0  ;;  %6211 = vmatpush3.bf16.msra.mxu0 %v8072_v28 }
0x2f06   :  { %6212 = vmatprep.subr.bf16.mxu0 %v6752_v0  ;;  %v6234_v49 = vpop.f32.mrf.mxu1 }
0x2f08   :  { %v4974_v40 = vpop.f32.mrf.mxu1 }
0x2f09   :  { %6213 = vmatpush3.bf16.msra.mxu0 %v8087_v63  ;;  %v6528_v43 = vpack.i.bf16 %v4974_v40, %v4971_v4 }
0x2f0a   :  { %6214 = vmatprep.subr.bf16.mxu0 %v6752_v0  ;;  %v6235_v60 = vpop.f32.mrf.mxu1 }
0x2f0b   :  { %6529 = vrot.lane.b32.xlu0 %v6528_v43, %s6761_s20 }
0x2f0c   :  { %6203 = vmatmul.mubr.msk.bf16.gmra.mxu0 %vm59_vm1, %v6827_v9 }
0x2f0d   :  { %6215 = vmatpush3.bf16.msra.mxu0 %v8097_v22  ;;  %6218 = vmatprep.mubr.msk.bf16.mxu0 %vm6753_vm0, %v6752_v0 }
0x2f0e   :  { %6216 = vmatprep.subr.bf16.mxu0 %v6752_v0 }
0x2f11   :  { %6217 = vmatpush3.bf16.msra.mxu0 %v8110_v42 }
0x2f12   :  { %6252 = vmatprep.subr.bf16.mxu0 %v6752_v0 }
0x2fbc   :  { %v4828_v33 = vpop.f32.mrf.mxu0 }
0x2fbe   :  { %v6196_v61 = vpop.f32.mrf.mxu0 }
0x2fc0   :  { %v4831_v28 = vpop.f32.mrf.mxu0 }
0x2fc2   :  { %v6197_v63 = vpop.f32.mrf.mxu0 }
0x2fc4   :  { %v4836_v45 = vpop.f32.mrf.mxu0 }
0x2fc6   :  { %v6200_v14 = vpop.f32.mrf.mxu0 }
0x2fc8   :  { %v4839_v56 = vpop.f32.mrf.mxu0 }
0x2fc9   :  { %v6508_v44 = vpack.i.bf16 %v4839_v56, %v4836_v45 }
0x2fca   :  { %v6201_v10 = vpop.f32.mrf.mxu0 }
0x2fcb   :  { %6509 = vrot.lane.b32.xlu1 %v6508_v44, %s6765_s18 }
0x2fcc   :  { %v4844_v22 = vpop.f32.mrf.mxu0 }
0x2fce   :  { %v6204_v37 = vpop.f32.mrf.mxu0 }
0x2fd0   :  { %v4847_v54 = vpop.f32.mrf.mxu0 }
0x2fd1   :  { %v6513_v6 = vpack.i.bf16 %v4847_v54, %v4844_v22 }
0x2fd2   :  { %v6205_v19 = vpop.f32.mrf.mxu0 }
0x2fd3   :  { %6514 = vrot.lane.b32.xlu1 %v6513_v6, %s6761_s20  ;;  %v38_v6 = vld [vmem:[%s8494_s3 + $0x52] sm:$0xff] }
0x303d   :  { %v6510_v42 = vpop.permute.xlu1 %6509 }
0x303e   :  { %v6512_v17 = vunpack.i.h.bf16 %v6510_v42  ;;  %v6511_v51 = vunpack.i.l.bf16 %v6510_v42 }
0x3040   :  { %v4868_v5 = vsel %vm410_vm7, %v4831_v28, %v6512_v17  ;;  %v4867_v7 = vsel %vm410_vm7, %v4828_v33, %v6511_v51 }
0x3045   :  { %v6515_v24 = vpop.permute.xlu1 %6514 }
0x3046   :  { %v6517_v52 = vunpack.i.h.bf16 %v6515_v24  ;;  %v6516_v55 = vunpack.i.l.bf16 %v6515_v24 }
0x3048   :  { %v4870_v48 = vsel %vm1231_vm4, %v4868_v5, %v6517_v52  ;;  %v4869_v30 = vsel %vm1231_vm4, %v4867_v7, %v6516_v55 }
0x3049   :  { %v4871_v62 = vpack.c.bf16 %v4870_v48, %v4869_v30 }
0x304b   :  { %6219 = vmatmul.mubr.msk.bf16.vlgmr.msra.gmra.mxu0 %vm1361_vm5, %v4871_v62 }
0x304c   :  { %6254 = vmatprep.mubr.msk.bf16.mxu0 %vm6753_vm0, %v6752_v0 }
0x310b   :  { %v4909_v25 = vpop.f32.mrf.mxu0 }
0x310c   :  { %v4910_v29 = vadd.f32 %v8171_v57, %v4909_v25 }
0x310d   :  { %v6220_v35 = vpop.f32.mrf.mxu0 }
0x310e   :  { %v4916_v61 = vmax.f32 %v4910_v29, 0.0 }
0x310f   :  { %v4912_v33 = vpop.f32.mrf.mxu0 }
0x3110   :  { %v4913_v28 = vadd.f32 %v8171_v57, %v4912_v33  ;;  %v4918_v14 = vadd.f32 %v4916_v61, %v8298_v59 }
0x3111   :  { %v6221_v63 = vpop.f32.mrf.mxu0 }
0x3112   :  { %v4917_v45 = vmax.f32 %v4913_v28, 0.0 }
0x3114   :  { %v4919_v56 = vadd.f32 %v4917_v45, %v8301_v18 }
0x3116   :  { %v5049_v44 = vpack.c.bf16 %v4919_v56, %v4918_v14 }
0x3118   :  { %6253 = vmatpush3.bf16.msra.mxu0 %v5049_v44 }
0x3119   :  { %6266 = vmatprep.subr.bf16.mxu0 %v6752_v0 }
0x311b   :  { %6255 = vmatmul.mubr.msk.bf16.vlgmr.msra.gmra.mxu0 %vm59_vm1, %v6825_v8  ;;  %v6520_v8 = vpop.permute.xlu0 %6519 }
0x311c   :  { %6258 = vmatprep.mubr.msk.bf16.mxu0 %vm6753_vm0, %v6752_v0  ;;  %6267 = vmatpush3.bf16.msra.mxu0 %v54_v36  ;;  %v6521_v57 = vunpack.i.l.bf16 %v6520_v8  ;;  %v5356_v36 = vld [vmem:[%s8494_s3 + $0xaa] ss:$0 sm:$0xff] }
0x311d   :  { %6268 = vmatprep.subr.bf16.mxu0 %v6752_v0 }
0x311e   :  { %v4994_v37 = vsel %vm410_vm7, %v8395_v2, %v6521_v57 }
0x311f   :  { %v6530_v59 = vpop.permute.xlu0 %6529 }
0x3120   :  { %6269 = vmatpush3.bf16.msra.mxu0 %v53_v58  ;;  %v6532_v18 = vunpack.i.h.bf16 %v6530_v59  ;;  %v6531_v10 = vunpack.i.l.bf16 %v6530_v59 }
0x3121   :  { %6270 = vmatprep.subr.bf16.mxu0 %v6752_v0 }
0x3122   :  { %v4996_v54 = vsel %vm1231_vm4, %v4994_v37, %v6531_v10 }
0x3123   :  { %6259 = vmatmul.mubr.msk.bf16.gmra.mxu0 %vm59_vm1, %v6845_v12  ;;  %v6522_v12 = vunpack.i.h.bf16 %v6520_v8 }
0x3124   :  { %6262 = vmatprep.mubr.msk.bf16.mxu0 %vm6753_vm0, %v6752_v0  ;;  %6271 = vmatpush3.bf16.msra.mxu0 %v52_v13 }
0x3125   :  { %6272 = vmatprep.subr.bf16.mxu0 %v6752_v0  ;;  %v4995_v22 = vsel %vm410_vm7, %v8409_v21, %v6522_v12 }
0x3128   :  { %6273 = vmatpush3.bf16.msra.mxu0 %v51_v15 }
0x3129   :  { %6274 = vmatprep.subr.bf16.mxu0 %v6752_v0 }
0x312b   :  { %6263 = vmatmul.mubr.msk.bf16.gmra.mxu0 %vm59_vm1, %v6827_v9  ;;  %v4997_v9 = vsel %vm1231_vm4, %v4995_v22, %v6532_v18 }
0x312c   :  { %6275 = vmatpush3.bf16.msra.mxu0 %v50_v16  ;;  %6278 = vmatprep.mubr.msk.bf16.mxu0 %vm6753_vm0, %v6752_v0  ;;  %v4998_v42 = vpack.c.bf16 %v4997_v9, %v4996_v54 }
0x312d   :  { %6276 = vmatprep.subr.bf16.mxu0 %v6752_v0  ;;  %v37_v0 = vld [vmem:[%s8494_s3 + $0x4a] sm:$0xff] }
0x312e   :  { %v49_v19 = vpack.c.bf16 %v38_v6, %v37_v0 }
0x3130   :  { %6247 = vmatpush3.bf16.msra.mxu1 %v49_v19  ;;  %6277 = vmatpush3.bf16.msra.mxu0 %v49_v19 }
0x3133   :  { %6249 = vmatmul.mubr.msk.bf16.vlgmr.msra.gmra.mxu1 %vm1361_vm5, %v4998_v42 }
0x31db   :  { %v5084_v17 = vpop.f32.mrf.mxu0 }
0x31dd   :  { %v6256_v51 = vpop.f32.mrf.mxu0 }
0x31df   :  { %v5087_v24 = vpop.f32.mrf.mxu0 }
0x31e1   :  { %v6257_v52 = vpop.f32.mrf.mxu0 }
0x31e3   :  { %v5092_v55 = vpop.f32.mrf.mxu0 }
0x31e5   :  { %v6260_v5 = vpop.f32.mrf.mxu0 }
0x31e7   :  { %v5095_v7 = vpop.f32.mrf.mxu0 }
0x31e8   :  { %v6523_v48 = vpack.i.bf16 %v5095_v7, %v5092_v55 }
0x31e9   :  { %v6261_v30 = vpop.f32.mrf.mxu0 }
0x31ea   :  { %6524 = vrot.lane.b32.xlu1 %v6523_v48, %s6765_s18 }
0x31eb   :  { %v5100_v62 = vpop.f32.mrf.mxu0 }
0x31ed   :  { %v6264_v2 = vpop.f32.mrf.mxu0 }
0x31ef   :  { %v5103_v32 = vpop.f32.mrf.mxu0 }
0x31f0   :  { %v6533_v31 = vpack.i.bf16 %v5103_v32, %v5100_v62 }
0x31f1   :  { %v6265_v20 = vpop.f32.mrf.mxu0 }
0x31f2   :  { %6534 = vrot.lane.b32.xlu1 %v6533_v31, %s6761_s20 }
0x31f3   :  { %v5040_v46 = vpop.f32.mrf.mxu1 }
0x31f4   :  { %v5041_v27 = vadd.f32 %v5356_v36, %v5040_v46 }
0x31f5   :  { %v6250_v58 = vpop.f32.mrf.mxu1 }
0x31f6   :  { %5047 = vst [vmem:[%s8499_s6] sm:$0xff] %v5041_v27 }
0x31f7   :  { %v5043_v21 = vpop.f32.mrf.mxu1 }
0x31f8   :  { %v5044_v23 = vadd.f32 %v5356_v36, %v5043_v21 }
0x31f9   :  { %v6251_v1 = vpop.f32.mrf.mxu1 }
0x31fa   :  { %5048 = vst [vmem:[%s8499_s6 + $0x8] sm:$0xff] %v5044_v23 }
0x325c   :  { %v6525_v50 = vpop.permute.xlu1 %6524 }
0x325d   :  { %v6527_v13 = vunpack.i.h.bf16 %v6525_v50  ;;  %v6526_v3 = vunpack.i.l.bf16 %v6525_v50 }
0x325f   :  { %v5124_v15 = vsel %vm410_vm7, %v5087_v24, %v6527_v13  ;;  %v5123_v11 = vsel %vm410_vm7, %v5084_v17, %v6526_v3 }
0x3264   :  { %v6535_v41 = vpop.permute.xlu1 %6534 }
0x3265   :  { %v6537_v39 = vunpack.i.h.bf16 %v6535_v41  ;;  %v6536_v38 = vunpack.i.l.bf16 %v6535_v41 }
0x3267   :  { %v5126_v26 = vsel %vm1231_vm4, %v5124_v15, %v6537_v39  ;;  %v5125_v34 = vsel %vm1231_vm4, %v5123_v11, %v6536_v38 }
0x3268   :  { %v5127_v53 = vpack.c.bf16 %v5126_v26, %v5125_v34 }
0x326a   :  { %6279 = vmatmul.mubr.msk.bf16.vlgmr.msra.gmra.mxu0 %vm1361_vm5, %v5127_v53 }
0x332a   :  { %v5165_v47 = vpop.f32.mrf.mxu0 }
0x332b   :  { %v5166_v16 = vadd.f32 %v5356_v36, %v5165_v47 }
0x332c   :  { %v6280_v4 = vpop.f32.mrf.mxu0 }
0x332d   :  { %5362 = vst [vmem:[%s8499_s6 + $0x10] sm:$0xff] %v5166_v16 }
0x332e   :  { %v5168_v49 = vpop.f32.mrf.mxu0 }
0x332f   :  { %v5169_v40 = vadd.f32 %v5356_v36, %v5168_v49 }
0x3330   :  { %v6281_v43 = vpop.f32.mrf.mxu0 }
0x3331   :  { %5363 = vst [vmem:[%s8499_s6 + $0x18] sm:$0xff] %v5169_v40 }

</bundles_post_ra>
